<compile_context>
chip_gen: v7x
topology: tpu7x:2x2x1
jax: 0.10.0
libtpu: 0.0.40
codegen_flags: <defaults>
</compile_context>

<pallas_src>
import functools

import jax
import jax.numpy as jnp
from jax.experimental import pallas as pl
from jax.experimental.pallas import tpu as pltpu


# ----------------------------------------------------------------------------
# Helpers
# ----------------------------------------------------------------------------

_SQRT1_2 = 0.7071067811865476


def _erf_f32(x):
    # Exact-GELU needs erf; Abramowitz & Stegun 7.1.26 (|err| < 1.5e-7), built
    # from exp (EUP) + Horner polynomial; the divide goes to the EUP via
    # pl.reciprocal(approx=True).
    a1, a2, a3, a4, a5 = 0.254829592, -0.284496736, 1.421413741, -1.453152027, 1.061405429
    p = 0.3275911
    sign = jnp.where(x >= 0.0, 1.0, -1.0)
    ax = jnp.abs(x)
    t = pl.reciprocal(1.0 + p * ax, approx=True)
    poly = ((((a5 * t + a4) * t + a3) * t + a2) * t + a1) * t
    return sign * (1.0 - poly * jnp.exp(-ax * ax))


def _gelu_f32(x):
    return 0.5 * x * (1.0 + _erf_f32(x * _SQRT1_2))


def _row_tile(m, cap=256):
    # Whole-array block when small (legal: block == full dim); otherwise a
    # 256-row tile (multiple of 8) so BlockSpec double-buffering pipelines HBM
    # traffic and multiple blocks exist for megacore sharding.
    return m if m <= cap else cap


def _col_tile(n, cap=512):
    # Whole-array block when small; otherwise a 128-multiple tile that divides N
    # so the (8,128) BlockSpec constraint holds and large weights are streamed.
    if n <= cap:
        return n
    for t in (512, 384, 256, 128):
        if n % t == 0:
            return t
    return n


def _vmem_params(semantics, blocks):
    """CompilerParams with an explicit scoped-VMEM limit from the block footprint."""
    total = 0
    for shape, dtype in blocks:
        sz = 1
        for s in shape:
            sz *= int(s)
        total += sz * jnp.dtype(dtype).itemsize
    # 2x for double-buffering + margin; clamp to [32 MiB, 64 MiB] (v7x physical).
    vmem = int(min(64 << 20, max(32 << 20, 2 * total + (4 << 20))))
    return pltpu.CompilerParams(dimension_semantics=semantics,
                                vmem_limit_bytes=vmem)


# ----------------------------------------------------------------------------
# Pallas kernels
# ----------------------------------------------------------------------------

def _ln_linear_kernel(x_ref, g_ref, b_ref, w_ref, bias_ref, o_ref, *, gelu):
    # y = LayerNorm(x) @ W + bias   (optionally GELU(y)), all on the VMEM tile.
    x = x_ref[...].astype(jnp.float32)
    mean = jnp.mean(x, axis=-1, keepdims=True)
    var = jnp.mean((x - mean) ** 2, axis=-1, keepdims=True)
    inv = jax.lax.rsqrt(var + 1e-5)
    xn = (x - mean) * inv * g_ref[...] + b_ref[...]
    acc = jnp.dot(xn.astype(jnp.bfloat16), w_ref[...],          # w is bf16 already
                  preferred_element_type=jnp.float32)
    acc = acc + bias_ref[...]
    if gelu:
        acc = _gelu_f32(acc)
    o_ref[...] = acc.astype(o_ref.dtype)


def pallas_ln_linear(x, gamma, beta, w, bias=None, gelu=False, out_dtype=None):
    """LayerNorm(x) @ w (+ bias) (+ GELU).  x: (M, K), w: (K, N) bf16."""
    M, K = x.shape
    N = w.shape[1]
    out_dtype = out_dtype if out_dtype is not None else x.dtype
    w = w.astype(jnp.bfloat16)                    # no-op when already bf16
    if bias is None:
        bias = jnp.zeros((N,), jnp.float32)
    bias = bias.astype(jnp.float32).reshape(1, N)
    gamma = gamma.astype(jnp.float32).reshape(1, K)
    beta = beta.astype(jnp.float32).reshape(1, K)
    tm, tn = _row_tile(M), _col_tile(N)
    kernel = functools.partial(_ln_linear_kernel, gelu=gelu)
    params = _vmem_params(("parallel", "parallel"), [
        ((tm, K), x.dtype), ((1, K), jnp.float32), ((1, K), jnp.float32),
        ((K, tn), jnp.bfloat16), ((1, tn), jnp.float32), ((tm, tn), out_dtype)])
    return pl.pallas_call(
        kernel,
        out_shape=jax.ShapeDtypeStruct((M, N), out_dtype),
        grid=(pl.cdiv(M, tm), pl.cdiv(N, tn)),
        in_specs=[
            pl.BlockSpec((tm, K), lambda i, j: (i, 0)),
            pl.BlockSpec((1, K), lambda i, j: (0, 0)),
            pl.BlockSpec((1, K), lambda i, j: (0, 0)),
            pl.BlockSpec((K, tn), lambda i, j: (0, j)),
            pl.BlockSpec((1, tn), lambda i, j: (0, j)),
        ],
        out_specs=pl.BlockSpec((tm, tn), lambda i, j: (i, j)),
        compiler_params=params,
    )(x, gamma, beta, w, bias)


def _linear_kernel(x_ref, w_ref, bias_ref, o_ref):
    acc = jnp.dot(x_ref[...].astype(jnp.bfloat16), w_ref[...],
                  preferred_element_type=jnp.float32)
    o_ref[...] = (acc + bias_ref[...]).astype(o_ref.dtype)


def pallas_linear(x, w, b, out_dtype=None):
    """x: (M, K), w: (K, N) bf16, b: (N,) -> (M, N)."""
    M, K = x.shape
    N = w.shape[1]
    out_dtype = out_dtype if out_dtype is not None else x.dtype
    w = w.astype(jnp.bfloat16)
    b = b.astype(jnp.float32).reshape(1, N)
    tm, tn = _row_tile(M), _col_tile(N)
    params = _vmem_params(("parallel", "parallel"), [
        ((tm, K), x.dtype), ((K, tn), jnp.bfloat16), ((1, tn), jnp.float32),
        ((tm, tn), out_dtype)])
    return pl.pallas_call(
        _linear_kernel,
        out_shape=jax.ShapeDtypeStruct((M, N), out_dtype),
        grid=(pl.cdiv(M, tm), pl.cdiv(N, tn)),
        in_specs=[
            pl.BlockSpec((tm, K), lambda i, j: (i, 0)),
            pl.BlockSpec((K, tn), lambda i, j: (0, j)),
            pl.BlockSpec((1, tn), lambda i, j: (0, j)),
        ],
        out_specs=pl.BlockSpec((tm, tn), lambda i, j: (i, j)),
        compiler_params=params,
    )(x, w, b)


def _linear_residual_kernel(x_ref, w_ref, bias_ref, r_ref, o_ref):
    # y = x @ W + bias + residual   (projection / FF2 with fused residual add).
    acc = jnp.dot(x_ref[...].astype(jnp.bfloat16), w_ref[...],
                  preferred_element_type=jnp.float32)
    o_ref[...] = (acc + bias_ref[...] + r_ref[...].astype(jnp.float32)).astype(o_ref.dtype)


def pallas_linear_residual(x, w, b, res):
    """x: (M, K), w: (K, N) bf16, b: (N,), res: (M, N) -> x @ w + b + res."""
    M, K = x.shape
    N = w.shape[1]
    w = w.astype(jnp.bfloat16)
    b = b.astype(jnp.float32).reshape(1, N)
    tm, tn = _row_tile(M), _col_tile(N)
    params = _vmem_params(("parallel", "parallel"), [
        ((tm, K), x.dtype), ((K, tn), jnp.bfloat16), ((1, tn), jnp.float32),
        ((tm, tn), res.dtype), ((tm, tn), res.dtype)])
    return pl.pallas_call(
        _linear_residual_kernel,
        out_shape=jax.ShapeDtypeStruct((M, N), res.dtype),
        grid=(pl.cdiv(M, tm), pl.cdiv(N, tn)),
        in_specs=[
            pl.BlockSpec((tm, K), lambda i, j: (i, 0)),
            pl.BlockSpec((K, tn), lambda i, j: (0, j)),
            pl.BlockSpec((1, tn), lambda i, j: (0, j)),
            pl.BlockSpec((tm, tn), lambda i, j: (i, j)),
        ],
        out_specs=pl.BlockSpec((tm, tn), lambda i, j: (i, j)),
        # residual buffer is dead after this op -> reuse it for the output.
        input_output_aliases={3: 0},
        compiler_params=params,
    )(x, w, b, res)


def _layernorm_kernel(x_ref, g_ref, b_ref, o_ref):
    # PyTorch nn.LayerNorm semantics: biased variance over last dim, eps=1e-5.
    x = x_ref[...].astype(jnp.float32)
    mean = jnp.mean(x, axis=-1, keepdims=True)
    var = jnp.mean((x - mean) ** 2, axis=-1, keepdims=True)
    inv = jax.lax.rsqrt(var + 1e-5)
    o_ref[...] = ((x - mean) * inv * g_ref[...] + b_ref[...]).astype(o_ref.dtype)


def pallas_layernorm(x2d, gamma, beta):
    """Standalone LayerNorm (used on the transformers' cls rows only)."""
    M, D = x2d.shape
    tm = _row_tile(M)
    params = _vmem_params(("parallel",), [
        ((tm, D), x2d.dtype), ((1, D), jnp.float32), ((1, D), jnp.float32),
        ((tm, D), x2d.dtype)])
    return pl.pallas_call(
        _layernorm_kernel,
        out_shape=jax.ShapeDtypeStruct((M, D), x2d.dtype),
        grid=(pl.cdiv(M, tm),),
        in_specs=[
            pl.BlockSpec((tm, D), lambda i: (i, 0)),
            pl.BlockSpec((1, D), lambda i: (0, 0)),
            pl.BlockSpec((1, D), lambda i: (0, 0)),
        ],
        out_specs=pl.BlockSpec((tm, D), lambda i: (i, 0)),
        compiler_params=params,
    )(x2d, gamma.astype(jnp.float32).reshape(1, D), beta.astype(jnp.float32).reshape(1, D))


def _attention_kernel(qkv_ref, o_ref, *, heads, dim_head, scale):
    # One batch element per grid step; per-head q/k/v sliced straight from the
    # bf16 ref (no full-tile f32 materialization), per-head slice stores (no
    # lane-axis concat).  qkv block: (1, N, 3*inner), inner = heads*dim_head.
    inner = heads * dim_head
    for h in range(heads):
        q = qkv_ref[0, :, h * dim_head:(h + 1) * dim_head]
        k = qkv_ref[0, :, inner + h * dim_head: inner + (h + 1) * dim_head]
        v = qkv_ref[0, :, 2 * inner + h * dim_head: 2 * inner + (h + 1) * dim_head]
        dots = jax.lax.dot_general(
            q, k, (((1,), (1,)), ((), ())),
            preferred_element_type=jnp.float32) * scale
        m = jnp.max(dots, axis=-1, keepdims=True)
        e = jnp.exp(dots - m)
        denom = jnp.sum(e, axis=-1, keepdims=True)
        attn = e * pl.reciprocal(denom, approx=True)           # EUP, off the VALU path
        out_h = jnp.dot(attn.astype(jnp.bfloat16), v,
                        preferred_element_type=jnp.float32)
        o_ref[0, :, h * dim_head:(h + 1) * dim_head] = out_h.astype(o_ref.dtype)


def pallas_attention(qkv, heads, dim_head, scale):
    """qkv: (B, N, 3*inner) bf16 -> (B, N, inner) multi-head softmax attention."""
    B, N, three_inner = qkv.shape
    inner = heads * dim_head
    kernel = functools.partial(_attention_kernel, heads=heads, dim_head=dim_head, scale=scale)
    params = _vmem_params(("parallel",), [
        ((1, N, three_inner), qkv.dtype), ((1, N, inner), qkv.dtype),
        ((N, N), jnp.float32)])
    # TODO(synk): add a (B, heads) grid with per-head-contiguous QKV columns once
    # 3*dim_head is guaranteed to be a 128-multiple (needs padded weight layout).
    return pl.pallas_call(
        kernel,
        out_shape=jax.ShapeDtypeStruct((B, N, inner), qkv.dtype),
        grid=(B,),
        in_specs=[pl.BlockSpec((1, N, three_inner), lambda i: (i, 0, 0))],
        out_specs=pl.BlockSpec((1, N, inner), lambda i: (i, 0, 0)),
        compiler_params=params,
    )(qkv)


# ----------------------------------------------------------------------------
# Model (glue in plain JAX, compute in the Pallas kernels above)
# ----------------------------------------------------------------------------

def attention_block(x, p, heads, dim_head):
    """PreNorm(Attention) + residual.  x: (B, N, D) f32."""
    B, N, D = x.shape
    inner = heads * dim_head
    scale = dim_head ** (-0.5)
    x2d = x.reshape(B * N, D)
    # fused: LayerNorm -> to_qkv (bias=False); QKV emitted bf16 (HBM round trip)
    qkv = pallas_ln_linear(x2d, p['attn_ln_g'], p['attn_ln_b'], p['w_qkv'],
                           out_dtype=jnp.bfloat16)
    o = pallas_attention(qkv.reshape(B, N, 3 * inner), heads, dim_head, scale)
    # fused: output projection + bias + residual  (Dropout(p=0) is identity)
    out = pallas_linear_residual(o.reshape(B * N, inner), p['w_out'], p['b_out'], x2d)
    return out.reshape(B, N, D)


def feedforward_block(x, p):
    """PreNorm(FeedForward) + residual.  x: (B, N, D) f32."""
    B, N, D = x.shape
    x2d = x.reshape(B * N, D)
    # fused: LayerNorm -> Linear -> GELU; hidden emitted bf16 (HBM round trip)
    h = pallas_ln_linear(x2d, p['ff_ln_g'], p['ff_ln_b'], p['w1'], p['b1'],
                         gelu=True, out_dtype=jnp.bfloat16)
    # fused: Linear + bias + residual
    out = pallas_linear_residual(h, p['w2'], p['b2'], x2d)
    return out.reshape(B, N, D)


def transformer_layers(x, tp, heads, dim_head):
    """Runs depth x (attn + ff) blocks; returns the PRE-final-norm sequence."""
    for p in tp['layers']:
        x = attention_block(x, p, heads, dim_head)
        x = feedforward_block(x, p)
    return x


def vivit_forward(x, params, cfg):
    b, t, c, H, W = x.shape
    ps = cfg['patch_size']
    dim = cfg['dim']
    heads, dim_head = cfg['heads'], cfg['dim_head']
    hh, ww = H // ps, W // ps
    n = hh * ww

    # rearrange 'b t c (h p1) (w p2) -> b t (h w) (p1 p2 c)'  (plain-JAX glue)
    xp = x.reshape(b, t, c, hh, ps, ww, ps)
    xp = xp.transpose(0, 1, 3, 5, 4, 6, 2)            # (b, t, h, w, p1, p2, c)
    xp = xp.reshape(b, t, n, ps * ps * c)

    # patch embedding (Linear patch_dim -> dim)
    xe = pallas_linear(xp.reshape(b * t * n, -1), params['patch_w'], params['patch_b'])
    xe = xe.reshape(b, t, n, dim)

    # prepend space cls token, add positional embedding (emb dropout p=0 -> identity)
    cls_space = jnp.broadcast_to(params['space_token'].reshape(1, 1, 1, dim), (b, t, 1, dim))
    xc = jnp.concatenate([cls_space, xe], axis=2)
    xc = xc + params['pos_embedding'][:, :, : n + 1]

    # spatial transformer over (b*t) sequences
    xs = xc.reshape(b * t, n + 1, dim)
    xs = transformer_layers(xs, params['space_tr'], heads, dim_head)
    # final LN of the spatial transformer applied only to the cls rows consumed
    # downstream (row-wise LN => identical to norming all tokens then slicing).
    xcls = pallas_layernorm(xs[:, 0], params['space_tr']['norm_g'],
                            params['space_tr']['norm_b'])
    xcls = xcls.reshape(b, t, dim)

    # temporal transformer
    cls_temp = jnp.broadcast_to(params['temporal_token'].reshape(1, 1, dim), (b, 1, dim))
    xt = jnp.concatenate([cls_temp, xcls], axis=1)
    xt = transformer_layers(xt, params['temporal_tr'], heads, dim_head)

    if cfg.get('pool', 'cls') == 'cls':
        pooled = pallas_layernorm(xt[:, 0], params['temporal_tr']['norm_g'],
                                  params['temporal_tr']['norm_b'])
    else:  # 'mean' pooling needs the full normalized sequence
        xt_n = pallas_layernorm(xt.reshape(-1, dim), params['temporal_tr']['norm_g'],
                                params['temporal_tr']['norm_b']).reshape(b, -1, dim)
        pooled = jnp.mean(xt_n, axis=1)

    # mlp_head: LayerNorm -> Linear  (fused in one kernel)
    logits = pallas_ln_linear(pooled, params['head_ln_g'], params['head_ln_b'],
                              params['head_w'], params['head_b'], out_dtype=jnp.float32)
    return logits


# ----------------------------------------------------------------------------
# Deterministic parameter init (shapes follow the PyTorch module __init__).
# Weight matrices are stored bf16 (f32 master not needed for inference);
# LN params, biases, tokens, positional embeddings stay f32.
# ----------------------------------------------------------------------------

def init_vivit_params(key, cfg):
    num_patches = (cfg['image_size'] // cfg['patch_size']) ** 2
    patch_dim = cfg['in_channels'] * cfg['patch_size'] ** 2
    dim, heads, dim_head = cfg['dim'], cfg['heads'], cfg['dim_head']
    mlp_dim = dim * cfg['scale_dim']
    inner = heads * dim_head

    keys = iter(jax.random.split(key, 4096))

    def wmat(shape, scale=0.02):
        return (scale * jax.random.normal(next(keys), shape, dtype=jnp.float32)
                ).astype(jnp.bfloat16)

    def nrm(shape, scale=1.0):
        return scale * jax.random.normal(next(keys), shape, dtype=jnp.float32)

    def init_tr(depth):
        layers = []
        for _ in range(depth):
            layers.append(dict(
                attn_ln_g=jnp.ones((dim,), jnp.float32),
                attn_ln_b=jnp.zeros((dim,), jnp.float32),
                w_qkv=wmat((dim, inner * 3)),                        # to_qkv, bias=False
                w_out=wmat((inner, dim)),
                b_out=jnp.zeros((dim,), jnp.float32),
                ff_ln_g=jnp.ones((dim,), jnp.float32),
                ff_ln_b=jnp.zeros((dim,), jnp.float32),
                w1=wmat((dim, mlp_dim)), b1=jnp.zeros((mlp_dim,), jnp.float32),
                w2=wmat((mlp_dim, dim)), b2=jnp.zeros((dim,), jnp.float32),
            ))
        return dict(layers=layers,
                    norm_g=jnp.ones((dim,), jnp.float32),
                    norm_b=jnp.zeros((dim,), jnp.float32))

    return dict(
        patch_w=wmat((patch_dim, dim)),
        patch_b=jnp.zeros((dim,), jnp.float32),
        pos_embedding=nrm((1, cfg['num_frames'], num_patches + 1, dim)),
        space_token=nrm((1, 1, dim)),
        temporal_token=nrm((1, 1, dim)),
        space_tr=init_tr(cfg['depth']),
        temporal_tr=init_tr(cfg['depth']),
        head_ln_g=jnp.ones((dim,), jnp.float32),
        head_ln_b=jnp.zeros((dim,), jnp.float32),
        head_w=wmat((dim, cfg['num_classes'])),
        head_b=jnp.zeros((cfg['num_classes'],), jnp.float32),
    )


if __name__ == "__main__":
    # Small but lane-friendly demo shapes: dim / inner are 128-multiples so the
    # feature (lane) axis is dense; sequence lengths stay tiny (full blocks).
    cfg = dict(
        image_size=16, patch_size=8, num_classes=10, num_frames=2,
        dim=128, depth=2, heads=2, dim_head=64, in_channels=3,
        pool='cls', scale_dim=4,
    )
    key = jax.random.PRNGKey(0)
    kp, kx = jax.random.split(key)
    params = init_vivit_params(kp, cfg)
    # input video: (batch=2, frames=2, channels=3, 16, 16)
    x = jax.random.normal(
        kx,
        (2, cfg['num_frames'], cfg['in_channels'], cfg['image_size'], cfg['image_size']),
        dtype=jnp.float32,
    )
    fwd = jax.jit(lambda v, p: vivit_forward(v, p, cfg))
    out = jax.block_until_ready(fwd(x, params))
    assert out.shape == (2, cfg['num_classes'])
    print("KERNEL_OK")
</pallas_src>

<mosaic_0001>
module attributes {stable_mosaic.version = 11 : i64} {
  func.func @_linear_kernel(%arg0: i32, %arg1: i32, %arg2: memref<16x192xf32, #tpu.memory_space<vmem>>, %arg3: memref<192x128xbf16, #tpu.memory_space<vmem>>, %arg4: memref<1x128xf32, #tpu.memory_space<vmem>>, %arg5: memref<16x128xf32, #tpu.memory_space<vmem>>) attributes {dimension_semantics = [#tpu.dimension_semantics<parallel>, #tpu.dimension_semantics<parallel>], iteration_bounds = array<i64: 1, 1>, scalar_prefetch = 0 : i64, scratch_operands = 0 : i64, tpu.core_type = #tpu.core_type<tc>, window_params = [{transform_indices = @transform_0, window_bounds = array<i64: 16, 192>}, {transform_indices = @transform_1, window_bounds = array<i64: 192, 128>}, {transform_indices = @transform_2, window_bounds = array<i64: 1, 128>}, {transform_indices = @transform_3, window_bounds = array<i64: 16, 128>}]} {
    %c0 = arith.constant 0 : index
    %c0_0 = arith.constant 0 : index
    %0 = vector.load %arg2[%c0, %c0_0] : memref<16x192xf32, #tpu.memory_space<vmem>>, vector<16x192xf32>
    %1 = arith.truncf %0 : vector<16x192xf32> to vector<16x192xbf16>
    %c0_1 = arith.constant 0 : index
    %c0_2 = arith.constant 0 : index
    %2 = vector.load %arg3[%c0_1, %c0_2] : memref<192x128xbf16, #tpu.memory_space<vmem>>, vector<192x128xbf16>
    %cst = arith.constant dense<0.000000e+00> : vector<16x128xf32>
    %3 = tpu.matmul %1, %2, %cst {dimension_numbers = #tpu.dot_dimension_numbers<[1], [0], [0], [1], [0, 0, 1, 1], [], []>} : vector<16x192xbf16>, vector<192x128xbf16>, vector<16x128xf32> -> vector<16x128xf32>
    %c0_3 = arith.constant 0 : index
    %c0_4 = arith.constant 0 : index
    %4 = vector.load %arg4[%c0_3, %c0_4] : memref<1x128xf32, #tpu.memory_space<vmem>>, vector<1x128xf32>
    %5 = vector.broadcast %4 : vector<1x128xf32> to vector<16x128xf32>
    %6 = arith.addf %3, %5 : vector<16x128xf32>
    %c0_5 = arith.constant 0 : index
    %c0_6 = arith.constant 0 : index
    %7 = vector.load %arg5[%c0_5, %c0_6] : memref<16x128xf32, #tpu.memory_space<vmem>>, vector<16x128xf32>
    tpu.vector_store %arg5[%c0_5, %c0_6], %6 {strides = array<i32>} : memref<16x128xf32, #tpu.memory_space<vmem>>, vector<16x128xf32>,
    return
  }
  func.func @transform_0(%arg0: i32, %arg1: i32) -> (i32, i32) {
    %c0_i32 = arith.constant 0 : i32
    %c0_i32_0 = arith.constant 0 : i32
    return %arg0, %c0_i32 : i32, i32
  }
  func.func @transform_1(%arg0: i32, %arg1: i32) -> (i32, i32) {
    %c0_i32 = arith.constant 0 : i32
    %c0_i32_0 = arith.constant 0 : i32
    return %c0_i32, %arg1 : i32, i32
  }
  func.func @transform_2(%arg0: i32, %arg1: i32) -> (i32, i32) {
    %c0_i32 = arith.constant 0 : i32
    %c0_i32_0 = arith.constant 0 : i32
    return %c0_i32, %arg1 : i32, i32
  }
  func.func @transform_3(%arg0: i32, %arg1: i32) -> (i32, i32) {
    %c0_i32 = arith.constant 0 : i32
    return %arg0, %arg1 : i32, i32
  }
}

module attributes {stable_mosaic.version = 11 : i64} {
  func.func @_ln_linear_kernel(%arg0: i32, %arg1: i32, %arg2: memref<20x128xf32, #tpu.memory_space<vmem>>, %arg3: memref<1x128xf32, #tpu.memory_space<vmem>>, %arg4: memref<1x128xf32, #tpu.memory_space<vmem>>, %arg5: memref<128x384xbf16, #tpu.memory_space<vmem>>, %arg6: memref<1x384xf32, #tpu.memory_space<vmem>>, %arg7: memref<20x384xbf16, #tpu.memory_space<vmem>>) attributes {dimension_semantics = [#tpu.dimension_semantics<parallel>, #tpu.dimension_semantics<parallel>], iteration_bounds = array<i64: 1, 1>, scalar_prefetch = 0 : i64, scratch_operands = 0 : i64, tpu.core_type = #tpu.core_type<tc>, window_params = [{transform_indices = @transform_0, window_bounds = array<i64: 20, 128>}, {pipeline_mode = #tpu.pipeline_mode<synchronous>, transform_indices = @transform_1, window_bounds = array<i64: 1, 128>}, {pipeline_mode = #tpu.pipeline_mode<synchronous>, transform_indices = @transform_2, window_bounds = array<i64: 1, 128>}, {transform_indices = @transform_3, window_bounds = array<i64: 128, 384>}, {transform_indices = @transform_4, window_bounds = array<i64: 1, 384>}, {transform_indices = @transform_5, window_bounds = array<i64: 20, 384>}]} {
    %c0 = arith.constant 0 : index
    %c0_0 = arith.constant 0 : index
    %0 = vector.load %arg2[%c0, %c0_0] : memref<20x128xf32, #tpu.memory_space<vmem>>, vector<20x128xf32>
    %cst = arith.constant dense<0.000000e+00> : vector<20xf32>
    %1 = vector.multi_reduction <add>, %0, %cst [1] : vector<20x128xf32> to vector<20xf32>
    %2 = vector.shape_cast %1 : vector<20xf32> to vector<20x1xf32>
    %cst_1 = arith.constant 1.280000e+02 : f32
    %3 = vector.broadcast %cst_1 : f32 to vector<20x1xf32>
    %4 = arith.divf %2, %3 : vector<20x1xf32>
    %5 = vector.broadcast %4 : vector<20x1xf32> to vector<20x128xf32>
    %6 = arith.subf %0, %5 : vector<20x128xf32>
    %7 = arith.mulf %6, %6 : vector<20x128xf32>
    %cst_2 = arith.constant dense<0.000000e+00> : vector<20xf32>
    %8 = vector.multi_reduction <add>, %7, %cst_2 [1] : vector<20x128xf32> to vector<20xf32>
    %9 = vector.shape_cast %8 : vector<20xf32> to vector<20x1xf32>
    %cst_3 = arith.constant 1.280000e+02 : f32
    %10 = vector.broadcast %cst_3 : f32 to vector<20x1xf32>
    %11 = arith.divf %9, %10 : vector<20x1xf32>
    %cst_4 = arith.constant 9.99999974E-6 : f32
    %12 = vector.broadcast %cst_4 : f32 to vector<20x1xf32>
    %13 = arith.addf %11, %12 : vector<20x1xf32>
    %14 = math.rsqrt %13 : vector<20x1xf32>
    %15 = vector.broadcast %4 : vector<20x1xf32> to vector<20x128xf32>
    %16 = arith.subf %0, %15 : vector<20x128xf32>
    %17 = vector.broadcast %14 : vector<20x1xf32> to vector<20x128xf32>
    %18 = arith.mulf %16, %17 : vector<20x128xf32>
    %c0_5 = arith.constant 0 : index
    %c0_6 = arith.constant 0 : index
    %19 = vector.load %arg3[%c0_5, %c0_6] : memref<1x128xf32, #tpu.memory_space<vmem>>, vector<1x128xf32>
    %20 = vector.broadcast %19 : vector<1x128xf32> to vector<20x128xf32>
    %21 = arith.mulf %18, %20 : vector<20x128xf32>
    %c0_7 = arith.constant 0 : index
    %c0_8 = arith.constant 0 : index
    %22 = vector.load %arg4[%c0_7, %c0_8] : memref<1x128xf32, #tpu.memory_space<vmem>>, vector<1x128xf32>
    %23 = vector.broadcast %22 : vector<1x128xf32> to vector<20x128xf32>
    %24 = arith.addf %21, %23 : vector<20x128xf32>
    %25 = arith.truncf %24 : vector<20x128xf32> to vector<20x128xbf16>
    %c0_9 = arith.constant 0 : index
    %c0_10 = arith.constant 0 : index
    %26 = vector.load %arg5[%c0_9, %c0_10] : memref<128x384xbf16, #tpu.memory_space<vmem>>, vector<128x384xbf16>
    %cst_11 = arith.constant dense<0.000000e+00> : vector<20x384xf32>
    %27 = tpu.matmul %25, %26, %cst_11 {dimension_numbers = #tpu.dot_dimension_numbers<[1], [0], [0], [1], [0, 0, 1, 1], [], []>} : vector<20x128xbf16>, vector<128x384xbf16>, vector<20x384xf32> -> vector<20x384xf32>
    %c0_12 = arith.constant 0 : index
    %c0_13 = arith.constant 0 : index
    %28 = vector.load %arg6[%c0_12, %c0_13] : memref<1x384xf32, #tpu.memory_space<vmem>>, vector<1x384xf32>
    %29 = vector.broadcast %28 : vector<1x384xf32> to vector<20x384xf32>
    %30 = arith.addf %27, %29 : vector<20x384xf32>
    %31 = arith.truncf %30 : vector<20x384xf32> to vector<20x384xbf16>
    %c0_14 = arith.constant 0 : index
    %c0_15 = arith.constant 0 : index
    %32 = vector.load %arg7[%c0_14, %c0_15] : memref<20x384xbf16, #tpu.memory_space<vmem>>, vector<20x384xbf16>
    tpu.vector_store %arg7[%c0_14, %c0_15], %31 {strides = array<i32>} : memref<20x384xbf16, #tpu.memory_space<vmem>>, vector<20x384xbf16>,
    return
  }
  func.func @transform_0(%arg0: i32, %arg1: i32) -> (i32, i32) {
    %c0_i32 = arith.constant 0 : i32
    %c0_i32_0 = arith.constant 0 : i32
    return %arg0, %c0_i32 : i32, i32
  }
  func.func @transform_1(%arg0: i32, %arg1: i32) -> (i32, i32) {
    %c0_i32 = arith.constant 0 : i32
    %c0_i32_0 = arith.constant 0 : i32
    %c0_i32_1 = arith.constant 0 : i32
    return %c0_i32, %c0_i32_0 : i32, i32
  }
  func.func @transform_2(%arg0: i32, %arg1: i32) -> (i32, i32) {
    %c0_i32 = arith.constant 0 : i32
    %c0_i32_0 = arith.constant 0 : i32
    %c0_i32_1 = arith.constant 0 : i32
    return %c0_i32, %c0_i32_0 : i32, i32
  }
  func.func @transform_3(%arg0: i32, %arg1: i32) -> (i32, i32) {
    %c0_i32 = arith.constant 0 : i32
    %c0_i32_0 = arith.constant 0 : i32
    return %c0_i32, %arg1 : i32, i32
  }
  func.func @transform_4(%arg0: i32, %arg1: i32) -> (i32, i32) {
    %c0_i32 = arith.constant 0 : i32
    %c0_i32_0 = arith.constant 0 : i32
    return %c0_i32, %arg1 : i32, i32
  }
  func.func @transform_5(%arg0: i32, %arg1: i32) -> (i32, i32) {
    %c0_i32 = arith.constant 0 : i32
    return %arg0, %arg1 : i32, i32
  }
}

module attributes {stable_mosaic.version = 11 : i64} {
  func.func @_attention_kernel(%arg0: i32, %arg1: memref<1x5x384xbf16, #tpu.memory_space<vmem>>, %arg2: memref<1x5x128xbf16, #tpu.memory_space<vmem>>) attributes {dimension_semantics = [#tpu.dimension_semantics<parallel>], iteration_bounds = array<i64: 4>, scalar_prefetch = 0 : i64, scratch_operands = 0 : i64, tpu.core_type = #tpu.core_type<tc>, window_params = [{transform_indices = @transform_0, window_bounds = array<i64: 1, 5, 384>}, {transform_indices = @transform_1, window_bounds = array<i64: 1, 5, 128>}]} {
    %c0 = arith.constant 0 : index
    %c0_0 = arith.constant 0 : index
    %c0_1 = arith.constant 0 : index
    %0 = vector.load %arg1[%c0, %c0_0, %c0_1] : memref<1x5x384xbf16, #tpu.memory_space<vmem>>, vector<1x5x64xbf16>
    %1 = vector.shape_cast %0 : vector<1x5x64xbf16> to vector<5x64xbf16>
    %c0_2 = arith.constant 0 : index
    %c0_3 = arith.constant 0 : index
    %c128 = arith.constant 128 : index
    %2 = vector.load %arg1[%c0_2, %c0_3, %c128] : memref<1x5x384xbf16, #tpu.memory_space<vmem>>, vector<1x5x64xbf16>
    %3 = vector.shape_cast %2 : vector<1x5x64xbf16> to vector<5x64xbf16>
    %c0_4 = arith.constant 0 : index
    %c0_5 = arith.constant 0 : index
    %c256 = arith.constant 256 : index
    %4 = vector.load %arg1[%c0_4, %c0_5, %c256] : memref<1x5x384xbf16, #tpu.memory_space<vmem>>, vector<1x5x64xbf16>
    %5 = vector.shape_cast %4 : vector<1x5x64xbf16> to vector<5x64xbf16>
    %cst = arith.constant dense<0.000000e+00> : vector<5x5xf32>
    %6 = tpu.matmul %1, %3, %cst {dimension_numbers = #tpu.dot_dimension_numbers<[1], [1], [0], [0], [0, 0, 1, 0], [], []>} : vector<5x64xbf16>, vector<5x64xbf16>, vector<5x5xf32> -> vector<5x5xf32>
    %cst_6 = arith.constant 1.250000e-01 : f32
    %7 = vector.broadcast %cst_6 : f32 to vector<5x5xf32>
    %8 = arith.mulf %6, %7 : vector<5x5xf32>
    %cst_7 = arith.constant dense<0xFF800000> : vector<5xf32>
    %9 = vector.multi_reduction <maximumf>, %8, %cst_7 [1] : vector<5x5xf32> to vector<5xf32>
    %10 = vector.shape_cast %9 : vector<5xf32> to vector<5x1xf32>
    %11 = vector.broadcast %10 : vector<5x1xf32> to vector<5x5xf32>
    %12 = arith.subf %8, %11 : vector<5x5xf32>
    %13 = math.exp %12 : vector<5x5xf32>
    %cst_8 = arith.constant dense<0.000000e+00> : vector<5xf32>
    %14 = vector.multi_reduction <add>, %13, %cst_8 [1] : vector<5x5xf32> to vector<5xf32>
    %15 = vector.shape_cast %14 : vector<5xf32> to vector<5x1xf32>
    %16 = tpu.reciprocal %15 {approx = true} : vector<5x1xf32> -> vector<5x1xf32>
    %17 = vector.broadcast %16 : vector<5x1xf32> to vector<5x5xf32>
    %18 = arith.mulf %13, %17 : vector<5x5xf32>
    %19 = arith.truncf %18 : vector<5x5xf32> to vector<5x5xbf16>
    %cst_9 = arith.constant dense<0.000000e+00> : vector<5x64xf32>
    %20 = tpu.matmul %19, %5, %cst_9 {dimension_numbers = #tpu.dot_dimension_numbers<[1], [0], [0], [1], [0, 0, 1, 1], [], []>} : vector<5x5xbf16>, vector<5x64xbf16>, vector<5x64xf32> -> vector<5x64xf32>
    %21 = arith.truncf %20 : vector<5x64xf32> to vector<5x64xbf16>
    %c0_10 = arith.constant 0 : index
    %c0_11 = arith.constant 0 : index
    %c0_12 = arith.constant 0 : index
    %22 = vector.load %arg2[%c0_10, %c0_11, %c0_12] : memref<1x5x128xbf16, #tpu.memory_space<vmem>>, vector<1x5x64xbf16>
    %23 = vector.shape_cast %22 : vector<1x5x64xbf16> to vector<5x64xbf16>
    %24 = vector.shape_cast %21 : vector<5x64xbf16> to vector<1x5x64xbf16>
    tpu.vector_store %arg2[%c0_10, %c0_11, %c0_12], %24 {strides = array<i32>} : memref<1x5x128xbf16, #tpu.memory_space<vmem>>, vector<1x5x64xbf16>,
    %c0_13 = arith.constant 0 : index
    %c0_14 = arith.constant 0 : index
    %c64 = arith.constant 64 : index
    %25 = vector.load %arg1[%c0_13, %c0_14, %c64] : memref<1x5x384xbf16, #tpu.memory_space<vmem>>, vector<1x5x64xbf16>
    %26 = vector.shape_cast %25 : vector<1x5x64xbf16> to vector<5x64xbf16>
    %c0_15 = arith.constant 0 : index
    %c0_16 = arith.constant 0 : index
    %c192 = arith.constant 192 : index
    %27 = vector.load %arg1[%c0_15, %c0_16, %c192] : memref<1x5x384xbf16, #tpu.memory_space<vmem>>, vector<1x5x64xbf16>
    %28 = vector.shape_cast %27 : vector<1x5x64xbf16> to vector<5x64xbf16>
    %c0_17 = arith.constant 0 : index
    %c0_18 = arith.constant 0 : index
    %c320 = arith.constant 320 : index
    %29 = vector.load %arg1[%c0_17, %c0_18, %c320] : memref<1x5x384xbf16, #tpu.memory_space<vmem>>, vector<1x5x64xbf16>
    %30 = vector.shape_cast %29 : vector<1x5x64xbf16> to vector<5x64xbf16>
    %cst_19 = arith.constant dense<0.000000e+00> : vector<5x5xf32>
    %31 = tpu.matmul %26, %28, %cst_19 {dimension_numbers = #tpu.dot_dimension_numbers<[1], [1], [0], [0], [0, 0, 1, 0], [], []>} : vector<5x64xbf16>, vector<5x64xbf16>, vector<5x5xf32> -> vector<5x5xf32>
    %cst_20 = arith.constant 1.250000e-01 : f32
    %32 = vector.broadcast %cst_20 : f32 to vector<5x5xf32>
    %33 = arith.mulf %31, %32 : vector<5x5xf32>
    %cst_21 = arith.constant dense<0xFF800000> : vector<5xf32>
    %34 = vector.multi_reduction <maximumf>, %33, %cst_21 [1] : vector<5x5xf32> to vector<5xf32>
    %35 = vector.shape_cast %34 : vector<5xf32> to vector<5x1xf32>
    %36 = vector.broadcast %35 : vector<5x1xf32> to vector<5x5xf32>
    %37 = arith.subf %33, %36 : vector<5x5xf32>
    %38 = math.exp %37 : vector<5x5xf32>
    %cst_22 = arith.constant dense<0.000000e+00> : vector<5xf32>
    %39 = vector.multi_reduction <add>, %38, %cst_22 [1] : vector<5x5xf32> to vector<5xf32>
    %40 = vector.shape_cast %39 : vector<5xf32> to vector<5x1xf32>
    %41 = tpu.reciprocal %40 {approx = true} : vector<5x1xf32> -> vector<5x1xf32>
    %42 = vector.broadcast %41 : vector<5x1xf32> to vector<5x5xf32>
    %43 = arith.mulf %38, %42 : vector<5x5xf32>
    %44 = arith.truncf %43 : vector<5x5xf32> to vector<5x5xbf16>
    %cst_23 = arith.constant dense<0.000000e+00> : vector<5x64xf32>
    %45 = tpu.matmul %44, %30, %cst_23 {dimension_numbers = #tpu.dot_dimension_numbers<[1], [0], [0], [1], [0, 0, 1, 1], [], []>} : vector<5x5xbf16>, vector<5x64xbf16>, vector<5x64xf32> -> vector<5x64xf32>
    %46 = arith.truncf %45 : vector<5x64xf32> to vector<5x64xbf16>
    %c0_24 = arith.constant 0 : index
    %c0_25 = arith.constant 0 : index
    %c64_26 = arith.constant 64 : index
    %47 = vector.load %arg2[%c0_24, %c0_25, %c64_26] : memref<1x5x128xbf16, #tpu.memory_space<vmem>>, vector<1x5x64xbf16>
    %48 = vector.shape_cast %47 : vector<1x5x64xbf16> to vector<5x64xbf16>
    %49 = vector.shape_cast %46 : vector<5x64xbf16> to vector<1x5x64xbf16>
    tpu.vector_store %arg2[%c0_24, %c0_25, %c64_26], %49 {strides = array<i32>} : memref<1x5x128xbf16, #tpu.memory_space<vmem>>, vector<1x5x64xbf16>,
    return
  }
  func.func @transform_0(%arg0: i32) -> (i32, i32, i32) {
    %c0_i32 = arith.constant 0 : i32
    %c0_i32_0 = arith.constant 0 : i32
    %c0_i32_1 = arith.constant 0 : i32
    return %arg0, %c0_i32, %c0_i32_0 : i32, i32, i32
  }
  func.func @transform_1(%arg0: i32) -> (i32, i32, i32) {
    %c0_i32 = arith.constant 0 : i32
    %c0_i32_0 = arith.constant 0 : i32
    %c0_i32_1 = arith.constant 0 : i32
    return %arg0, %c0_i32, %c0_i32_0 : i32, i32, i32
  }
}

module attributes {stable_mosaic.version = 11 : i64} {
  func.func @_linear_residual_kernel(%arg0: i32, %arg1: i32, %arg2: memref<20x128xbf16, #tpu.memory_space<vmem>>, %arg3: memref<128x128xbf16, #tpu.memory_space<vmem>>, %arg4: memref<1x128xf32, #tpu.memory_space<vmem>>, %arg5: memref<20x128xf32, #tpu.memory_space<vmem>>, %arg6: memref<20x128xf32, #tpu.memory_space<vmem>>) attributes {dimension_semantics = [#tpu.dimension_semantics<parallel>, #tpu.dimension_semantics<parallel>], iteration_bounds = array<i64: 1, 1>, scalar_prefetch = 0 : i64, scratch_operands = 0 : i64, tpu.core_type = #tpu.core_type<tc>, window_params = [{transform_indices = @transform_0, window_bounds = array<i64: 20, 128>}, {transform_indices = @transform_1, window_bounds = array<i64: 128, 128>}, {transform_indices = @transform_2, window_bounds = array<i64: 1, 128>}, {transform_indices = @transform_3, window_bounds = array<i64: 20, 128>}, {transform_indices = @transform_4, window_bounds = array<i64: 20, 128>}]} {
    %c0 = arith.constant 0 : index
    %c0_0 = arith.constant 0 : index
    %0 = vector.load %arg2[%c0, %c0_0] : memref<20x128xbf16, #tpu.memory_space<vmem>>, vector<20x128xbf16>
    %c0_1 = arith.constant 0 : index
    %c0_2 = arith.constant 0 : index
    %1 = vector.load %arg3[%c0_1, %c0_2] : memref<128x128xbf16, #tpu.memory_space<vmem>>, vector<128x128xbf16>
    %cst = arith.constant dense<0.000000e+00> : vector<20x128xf32>
    %2 = tpu.matmul %0, %1, %cst {dimension_numbers = #tpu.dot_dimension_numbers<[1], [0], [0], [1], [0, 0, 1, 1], [], []>} : vector<20x128xbf16>, vector<128x128xbf16>, vector<20x128xf32> -> vector<20x128xf32>
    %c0_3 = arith.constant 0 : index
    %c0_4 = arith.constant 0 : index
    %3 = vector.load %arg4[%c0_3, %c0_4] : memref<1x128xf32, #tpu.memory_space<vmem>>, vector<1x128xf32>
    %4 = vector.broadcast %3 : vector<1x128xf32> to vector<20x128xf32>
    %5 = arith.addf %2, %4 : vector<20x128xf32>
    %c0_5 = arith.constant 0 : index
    %c0_6 = arith.constant 0 : index
    %6 = vector.load %arg5[%c0_5, %c0_6] : memref<20x128xf32, #tpu.memory_space<vmem>>, vector<20x128xf32>
    %7 = arith.addf %5, %6 : vector<20x128xf32>
    %c0_7 = arith.constant 0 : index
    %c0_8 = arith.constant 0 : index
    %8 = vector.load %arg6[%c0_7, %c0_8] : memref<20x128xf32, #tpu.memory_space<vmem>>, vector<20x128xf32>
    tpu.vector_store %arg6[%c0_7, %c0_8], %7 {strides = array<i32>} : memref<20x128xf32, #tpu.memory_space<vmem>>, vector<20x128xf32>,
    return
  }
  func.func @transform_0(%arg0: i32, %arg1: i32) -> (i32, i32) {
    %c0_i32 = arith.constant 0 : i32
    %c0_i32_0 = arith.constant 0 : i32
    return %arg0, %c0_i32 : i32, i32
  }
  func.func @transform_1(%arg0: i32, %arg1: i32) -> (i32, i32) {
    %c0_i32 = arith.constant 0 : i32
    %c0_i32_0 = arith.constant 0 : i32
    return %c0_i32, %arg1 : i32, i32
  }
  func.func @transform_2(%arg0: i32, %arg1: i32) -> (i32, i32) {
    %c0_i32 = arith.constant 0 : i32
    %c0_i32_0 = arith.constant 0 : i32
    return %c0_i32, %arg1 : i32, i32
  }
  func.func @transform_3(%arg0: i32, %arg1: i32) -> (i32, i32) {
    %c0_i32 = arith.constant 0 : i32
    return %arg0, %arg1 : i32, i32
  }
  func.func @transform_4(%arg0: i32, %arg1: i32) -> (i32, i32) {
    %c0_i32 = arith.constant 0 : i32
    return %arg0, %arg1 : i32, i32
  }
}

module attributes {stable_mosaic.version = 11 : i64} {
  func.func @_ln_linear_kernel(%arg0: i32, %arg1: i32, %arg2: memref<20x128xf32, #tpu.memory_space<vmem>>, %arg3: memref<1x128xf32, #tpu.memory_space<vmem>>, %arg4: memref<1x128xf32, #tpu.memory_space<vmem>>, %arg5: memref<128x512xbf16, #tpu.memory_space<vmem>>, %arg6: memref<1x512xf32, #tpu.memory_space<vmem>>, %arg7: memref<20x512xbf16, #tpu.memory_space<vmem>>) attributes {dimension_semantics = [#tpu.dimension_semantics<parallel>, #tpu.dimension_semantics<parallel>], iteration_bounds = array<i64: 1, 1>, scalar_prefetch = 0 : i64, scratch_operands = 0 : i64, tpu.core_type = #tpu.core_type<tc>, window_params = [{transform_indices = @transform_0, window_bounds = array<i64: 20, 128>}, {pipeline_mode = #tpu.pipeline_mode<synchronous>, transform_indices = @transform_1, window_bounds = array<i64: 1, 128>}, {pipeline_mode = #tpu.pipeline_mode<synchronous>, transform_indices = @transform_2, window_bounds = array<i64: 1, 128>}, {transform_indices = @transform_3, window_bounds = array<i64: 128, 512>}, {transform_indices = @transform_4, window_bounds = array<i64: 1, 512>}, {transform_indices = @transform_5, window_bounds = array<i64: 20, 512>}]} {
    %c0 = arith.constant 0 : index
    %c0_0 = arith.constant 0 : index
    %0 = vector.load %arg2[%c0, %c0_0] : memref<20x128xf32, #tpu.memory_space<vmem>>, vector<20x128xf32>
    %cst = arith.constant dense<0.000000e+00> : vector<20xf32>
    %1 = vector.multi_reduction <add>, %0, %cst [1] : vector<20x128xf32> to vector<20xf32>
    %2 = vector.shape_cast %1 : vector<20xf32> to vector<20x1xf32>
    %cst_1 = arith.constant 1.280000e+02 : f32
    %3 = vector.broadcast %cst_1 : f32 to vector<20x1xf32>
    %4 = arith.divf %2, %3 : vector<20x1xf32>
    %5 = vector.broadcast %4 : vector<20x1xf32> to vector<20x128xf32>
    %6 = arith.subf %0, %5 : vector<20x128xf32>
    %7 = arith.mulf %6, %6 : vector<20x128xf32>
    %cst_2 = arith.constant dense<0.000000e+00> : vector<20xf32>
    %8 = vector.multi_reduction <add>, %7, %cst_2 [1] : vector<20x128xf32> to vector<20xf32>
    %9 = vector.shape_cast %8 : vector<20xf32> to vector<20x1xf32>
    %cst_3 = arith.constant 1.280000e+02 : f32
    %10 = vector.broadcast %cst_3 : f32 to vector<20x1xf32>
    %11 = arith.divf %9, %10 : vector<20x1xf32>
    %cst_4 = arith.constant 9.99999974E-6 : f32
    %12 = vector.broadcast %cst_4 : f32 to vector<20x1xf32>
    %13 = arith.addf %11, %12 : vector<20x1xf32>
    %14 = math.rsqrt %13 : vector<20x1xf32>
    %15 = vector.broadcast %4 : vector<20x1xf32> to vector<20x128xf32>
    %16 = arith.subf %0, %15 : vector<20x128xf32>
    %17 = vector.broadcast %14 : vector<20x1xf32> to vector<20x128xf32>
    %18 = arith.mulf %16, %17 : vector<20x128xf32>
    %c0_5 = arith.constant 0 : index
    %c0_6 = arith.constant 0 : index
    %19 = vector.load %arg3[%c0_5, %c0_6] : memref<1x128xf32, #tpu.memory_space<vmem>>, vector<1x128xf32>
    %20 = vector.broadcast %19 : vector<1x128xf32> to vector<20x128xf32>
    %21 = arith.mulf %18, %20 : vector<20x128xf32>
    %c0_7 = arith.constant 0 : index
    %c0_8 = arith.constant 0 : index
    %22 = vector.load %arg4[%c0_7, %c0_8] : memref<1x128xf32, #tpu.memory_space<vmem>>, vector<1x128xf32>
    %23 = vector.broadcast %22 : vector<1x128xf32> to vector<20x128xf32>
    %24 = arith.addf %21, %23 : vector<20x128xf32>
    %25 = arith.truncf %24 : vector<20x128xf32> to vector<20x128xbf16>
    %c0_9 = arith.constant 0 : index
    %c0_10 = arith.constant 0 : index
    %26 = vector.load %arg5[%c0_9, %c0_10] : memref<128x512xbf16, #tpu.memory_space<vmem>>, vector<128x512xbf16>
    %cst_11 = arith.constant dense<0.000000e+00> : vector<20x512xf32>
    %27 = tpu.matmul %25, %26, %cst_11 {dimension_numbers = #tpu.dot_dimension_numbers<[1], [0], [0], [1], [0, 0, 1, 1], [], []>} : vector<20x128xbf16>, vector<128x512xbf16>, vector<20x512xf32> -> vector<20x512xf32>
    %c0_12 = arith.constant 0 : index
    %c0_13 = arith.constant 0 : index
    %28 = vector.load %arg6[%c0_12, %c0_13] : memref<1x512xf32, #tpu.memory_space<vmem>>, vector<1x512xf32>
    %29 = vector.broadcast %28 : vector<1x512xf32> to vector<20x512xf32>
    %30 = arith.addf %27, %29 : vector<20x512xf32>
    %cst_14 = arith.constant 5.000000e-01 : f32
    %31 = vector.broadcast %cst_14 : f32 to vector<20x512xf32>
    %32 = arith.mulf %31, %30 : vector<20x512xf32>
    %cst_15 = arith.constant 0.707106769 : f32
    %33 = vector.broadcast %cst_15 : f32 to vector<20x512xf32>
    %34 = arith.mulf %30, %33 : vector<20x512xf32>
    %cst_16 = arith.constant 0.000000e+00 : f32
    %35 = vector.broadcast %cst_16 : f32 to vector<20x512xf32>
    %36 = arith.cmpf oge, %34, %35 : vector<20x512xf32>
    %cst_17 = arith.constant 1.000000e+00 : f32
    %cst_18 = arith.constant -1.000000e+00 : f32
    %37 = vector.broadcast %cst_17 : f32 to vector<20x512xf32>
    %38 = vector.broadcast %cst_18 : f32 to vector<20x512xf32>
    %39 = arith.select %36, %37, %38 : vector<20x512xi1>, vector<20x512xf32>
    %40 = math.absf %34 : vector<20x512xf32>
    %cst_19 = arith.constant 0.327591091 : f32
    %41 = vector.broadcast %cst_19 : f32 to vector<20x512xf32>
    %42 = arith.mulf %41, %40 : vector<20x512xf32>
    %cst_20 = arith.constant 1.000000e+00 : f32
    %43 = vector.broadcast %cst_20 : f32 to vector<20x512xf32>
    %44 = arith.addf %43, %42 : vector<20x512xf32>
    %45 = tpu.reciprocal %44 {approx = true} : vector<20x512xf32> -> vector<20x512xf32>
    %cst_21 = arith.constant 1.06140542 : f32
    %46 = vector.broadcast %cst_21 : f32 to vector<20x512xf32>
    %47 = arith.mulf %46, %45 : vector<20x512xf32>
    %cst_22 = arith.constant -1.45315206 : f32
    %48 = vector.broadcast %cst_22 : f32 to vector<20x512xf32>
    %49 = arith.addf %47, %48 : vector<20x512xf32>
    %50 = arith.mulf %49, %45 : vector<20x512xf32>
    %cst_23 = arith.constant 1.42141378 : f32
    %51 = vector.broadcast %cst_23 : f32 to vector<20x512xf32>
    %52 = arith.addf %50, %51 : vector<20x512xf32>
    %53 = arith.mulf %52, %45 : vector<20x512xf32>
    %cst_24 = arith.constant -0.284496725 : f32
    %54 = vector.broadcast %cst_24 : f32 to vector<20x512xf32>
    %55 = arith.addf %53, %54 : vector<20x512xf32>
    %56 = arith.mulf %55, %45 : vector<20x512xf32>
    %cst_25 = arith.constant 0.254829586 : f32
    %57 = vector.broadcast %cst_25 : f32 to vector<20x512xf32>
    %58 = arith.addf %56, %57 : vector<20x512xf32>
    %59 = arith.mulf %58, %45 : vector<20x512xf32>
    %cst_26 = arith.constant 0.000000e+00 : f32
    %60 = vector.broadcast %cst_26 : f32 to vector<20x512xf32>
    %61 = arith.subf %60, %40 : vector<20x512xf32>
    %62 = arith.mulf %61, %40 : vector<20x512xf32>
    %63 = math.exp %62 : vector<20x512xf32>
    %64 = arith.mulf %59, %63 : vector<20x512xf32>
    %cst_27 = arith.constant 1.000000e+00 : f32
    %65 = vector.broadcast %cst_27 : f32 to vector<20x512xf32>
    %66 = arith.subf %65, %64 : vector<20x512xf32>
    %67 = arith.mulf %39, %66 : vector<20x512xf32>
    %cst_28 = arith.constant 1.000000e+00 : f32
    %68 = vector.broadcast %cst_28 : f32 to vector<20x512xf32>
    %69 = arith.addf %68, %67 : vector<20x512xf32>
    %70 = arith.mulf %32, %69 : vector<20x512xf32>
    %71 = arith.truncf %70 : vector<20x512xf32> to vector<20x512xbf16>
    %c0_29 = arith.constant 0 : index
    %c0_30 = arith.constant 0 : index
    %72 = vector.load %arg7[%c0_29, %c0_30] : memref<20x512xbf16, #tpu.memory_space<vmem>>, vector<20x512xbf16>
    tpu.vector_store %arg7[%c0_29, %c0_30], %71 {strides = array<i32>} : memref<20x512xbf16, #tpu.memory_space<vmem>>, vector<20x512xbf16>,
    return
  }
  func.func @transform_0(%arg0: i32, %arg1: i32) -> (i32, i32) {
    %c0_i32 = arith.constant 0 : i32
    %c0_i32_0 = arith.constant 0 : i32
    return %arg0, %c0_i32 : i32, i32
  }
  func.func @transform_1(%arg0: i32, %arg1: i32) -> (i32, i32) {
    %c0_i32 = arith.constant 0 : i32
    %c0_i32_0 = arith.constant 0 : i32
    %c0_i32_1 = arith.constant 0 : i32
    return %c0_i32, %c0_i32_0 : i32, i32
  }
  func.func @transform_2(%arg0: i32, %arg1: i32) -> (i32, i32) {
    %c0_i32 = arith.constant 0 : i32
    %c0_i32_0 = arith.constant 0 : i32
    %c0_i32_1 = arith.constant 0 : i32
    return %c0_i32, %c0_i32_0 : i32, i32
  }
  func.func @transform_3(%arg0: i32, %arg1: i32) -> (i32, i32) {
    %c0_i32 = arith.constant 0 : i32
    %c0_i32_0 = arith.constant 0 : i32
    return %c0_i32, %arg1 : i32, i32
  }
  func.func @transform_4(%arg0: i32, %arg1: i32) -> (i32, i32) {
    %c0_i32 = arith.constant 0 : i32
    %c0_i32_0 = arith.constant 0 : i32
    return %c0_i32, %arg1 : i32, i32
  }
  func.func @transform_5(%arg0: i32, %arg1: i32) -> (i32, i32) {
    %c0_i32 = arith.constant 0 : i32
    return %arg0, %arg1 : i32, i32
  }
}

module attributes {stable_mosaic.version = 11 : i64} {
  func.func @_linear_residual_kernel(%arg0: i32, %arg1: i32, %arg2: memref<20x512xbf16, #tpu.memory_space<vmem>>, %arg3: memref<512x128xbf16, #tpu.memory_space<vmem>>, %arg4: memref<1x128xf32, #tpu.memory_space<vmem>>, %arg5: memref<20x128xf32, #tpu.memory_space<vmem>>, %arg6: memref<20x128xf32, #tpu.memory_space<vmem>>) attributes {dimension_semantics = [#tpu.dimension_semantics<parallel>, #tpu.dimension_semantics<parallel>], iteration_bounds = array<i64: 1, 1>, scalar_prefetch = 0 : i64, scratch_operands = 0 : i64, tpu.core_type = #tpu.core_type<tc>, window_params = [{transform_indices = @transform_0, window_bounds = array<i64: 20, 512>}, {transform_indices = @transform_1, window_bounds = array<i64: 512, 128>}, {transform_indices = @transform_2, window_bounds = array<i64: 1, 128>}, {transform_indices = @transform_3, window_bounds = array<i64: 20, 128>}, {transform_indices = @transform_4, window_bounds = array<i64: 20, 128>}]} {
    %c0 = arith.constant 0 : index
    %c0_0 = arith.constant 0 : index
    %0 = vector.load %arg2[%c0, %c0_0] : memref<20x512xbf16, #tpu.memory_space<vmem>>, vector<20x512xbf16>
    %c0_1 = arith.constant 0 : index
    %c0_2 = arith.constant 0 : index
    %1 = vector.load %arg3[%c0_1, %c0_2] : memref<512x128xbf16, #tpu.memory_space<vmem>>, vector<512x128xbf16>
    %cst = arith.constant dense<0.000000e+00> : vector<20x128xf32>
    %2 = tpu.matmul %0, %1, %cst {dimension_numbers = #tpu.dot_dimension_numbers<[1], [0], [0], [1], [0, 0, 1, 1], [], []>} : vector<20x512xbf16>, vector<512x128xbf16>, vector<20x128xf32> -> vector<20x128xf32>
    %c0_3 = arith.constant 0 : index
    %c0_4 = arith.constant 0 : index
    %3 = vector.load %arg4[%c0_3, %c0_4] : memref<1x128xf32, #tpu.memory_space<vmem>>, vector<1x128xf32>
    %4 = vector.broadcast %3 : vector<1x128xf32> to vector<20x128xf32>
    %5 = arith.addf %2, %4 : vector<20x128xf32>
    %c0_5 = arith.constant 0 : index
    %c0_6 = arith.constant 0 : index
    %6 = vector.load %arg5[%c0_5, %c0_6] : memref<20x128xf32, #tpu.memory_space<vmem>>, vector<20x128xf32>
    %7 = arith.addf %5, %6 : vector<20x128xf32>
    %c0_7 = arith.constant 0 : index
    %c0_8 = arith.constant 0 : index
    %8 = vector.load %arg6[%c0_7, %c0_8] : memref<20x128xf32, #tpu.memory_space<vmem>>, vector<20x128xf32>
    tpu.vector_store %arg6[%c0_7, %c0_8], %7 {strides = array<i32>} : memref<20x128xf32, #tpu.memory_space<vmem>>, vector<20x128xf32>,
    return
  }
  func.func @transform_0(%arg0: i32, %arg1: i32) -> (i32, i32) {
    %c0_i32 = arith.constant 0 : i32
    %c0_i32_0 = arith.constant 0 : i32
    return %arg0, %c0_i32 : i32, i32
  }
  func.func @transform_1(%arg0: i32, %arg1: i32) -> (i32, i32) {
    %c0_i32 = arith.constant 0 : i32
    %c0_i32_0 = arith.constant 0 : i32
    return %c0_i32, %arg1 : i32, i32
  }
  func.func @transform_2(%arg0: i32, %arg1: i32) -> (i32, i32) {
    %c0_i32 = arith.constant 0 : i32
    %c0_i32_0 = arith.constant 0 : i32
    return %c0_i32, %arg1 : i32, i32
  }
  func.func @transform_3(%arg0: i32, %arg1: i32) -> (i32, i32) {
    %c0_i32 = arith.constant 0 : i32
    return %arg0, %arg1 : i32, i32
  }
  func.func @transform_4(%arg0: i32, %arg1: i32) -> (i32, i32) {
    %c0_i32 = arith.constant 0 : i32
    return %arg0, %arg1 : i32, i32
  }
}

module attributes {stable_mosaic.version = 11 : i64} {
  func.func @_layernorm_kernel(%arg0: i32, %arg1: memref<4x128xf32, #tpu.memory_space<vmem>>, %arg2: memref<1x128xf32, #tpu.memory_space<vmem>>, %arg3: memref<1x128xf32, #tpu.memory_space<vmem>>, %arg4: memref<4x128xf32, #tpu.memory_space<vmem>>) attributes {dimension_semantics = [#tpu.dimension_semantics<parallel>], iteration_bounds = array<i64: 1>, scalar_prefetch = 0 : i64, scratch_operands = 0 : i64, tpu.core_type = #tpu.core_type<tc>, window_params = [{transform_indices = @transform_0, window_bounds = array<i64: 4, 128>}, {pipeline_mode = #tpu.pipeline_mode<synchronous>, transform_indices = @transform_1, window_bounds = array<i64: 1, 128>}, {pipeline_mode = #tpu.pipeline_mode<synchronous>, transform_indices = @transform_2, window_bounds = array<i64: 1, 128>}, {transform_indices = @transform_3, window_bounds = array<i64: 4, 128>}]} {
    %c0 = arith.constant 0 : index
    %c0_0 = arith.constant 0 : index
    %0 = vector.load %arg1[%c0, %c0_0] : memref<4x128xf32, #tpu.memory_space<vmem>>, vector<4x128xf32>
    %cst = arith.constant dense<0.000000e+00> : vector<4xf32>
    %1 = vector.multi_reduction <add>, %0, %cst [1] : vector<4x128xf32> to vector<4xf32>
    %2 = vector.shape_cast %1 : vector<4xf32> to vector<4x1xf32>
    %cst_1 = arith.constant 1.280000e+02 : f32
    %3 = vector.broadcast %cst_1 : f32 to vector<4x1xf32>
    %4 = arith.divf %2, %3 : vector<4x1xf32>
    %5 = vector.broadcast %4 : vector<4x1xf32> to vector<4x128xf32>
    %6 = arith.subf %0, %5 : vector<4x128xf32>
    %7 = arith.mulf %6, %6 : vector<4x128xf32>
    %cst_2 = arith.constant dense<0.000000e+00> : vector<4xf32>
    %8 = vector.multi_reduction <add>, %7, %cst_2 [1] : vector<4x128xf32> to vector<4xf32>
    %9 = vector.shape_cast %8 : vector<4xf32> to vector<4x1xf32>
    %cst_3 = arith.constant 1.280000e+02 : f32
    %10 = vector.broadcast %cst_3 : f32 to vector<4x1xf32>
    %11 = arith.divf %9, %10 : vector<4x1xf32>
    %cst_4 = arith.constant 9.99999974E-6 : f32
    %12 = vector.broadcast %cst_4 : f32 to vector<4x1xf32>
    %13 = arith.addf %11, %12 : vector<4x1xf32>
    %14 = math.rsqrt %13 : vector<4x1xf32>
    %15 = vector.broadcast %4 : vector<4x1xf32> to vector<4x128xf32>
    %16 = arith.subf %0, %15 : vector<4x128xf32>
    %17 = vector.broadcast %14 : vector<4x1xf32> to vector<4x128xf32>
    %18 = arith.mulf %16, %17 : vector<4x128xf32>
    %c0_5 = arith.constant 0 : index
    %c0_6 = arith.constant 0 : index
    %19 = vector.load %arg2[%c0_5, %c0_6] : memref<1x128xf32, #tpu.memory_space<vmem>>, vector<1x128xf32>
    %20 = vector.broadcast %19 : vector<1x128xf32> to vector<4x128xf32>
    %21 = arith.mulf %18, %20 : vector<4x128xf32>
    %c0_7 = arith.constant 0 : index
    %c0_8 = arith.constant 0 : index
    %22 = vector.load %arg3[%c0_7, %c0_8] : memref<1x128xf32, #tpu.memory_space<vmem>>, vector<1x128xf32>
    %23 = vector.broadcast %22 : vector<1x128xf32> to vector<4x128xf32>
    %24 = arith.addf %21, %23 : vector<4x128xf32>
    %c0_9 = arith.constant 0 : index
    %c0_10 = arith.constant 0 : index
    %25 = vector.load %arg4[%c0_9, %c0_10] : memref<4x128xf32, #tpu.memory_space<vmem>>, vector<4x128xf32>
    tpu.vector_store %arg4[%c0_9, %c0_10], %24 {strides = array<i32>} : memref<4x128xf32, #tpu.memory_space<vmem>>, vector<4x128xf32>,
    return
  }
  func.func @transform_0(%arg0: i32) -> (i32, i32) {
    %c0_i32 = arith.constant 0 : i32
    %c0_i32_0 = arith.constant 0 : i32
    return %arg0, %c0_i32 : i32, i32
  }
  func.func @transform_1(%arg0: i32) -> (i32, i32) {
    %c0_i32 = arith.constant 0 : i32
    %c0_i32_0 = arith.constant 0 : i32
    %c0_i32_1 = arith.constant 0 : i32
    return %c0_i32, %c0_i32_0 : i32, i32
  }
  func.func @transform_2(%arg0: i32) -> (i32, i32) {
    %c0_i32 = arith.constant 0 : i32
    %c0_i32_0 = arith.constant 0 : i32
    %c0_i32_1 = arith.constant 0 : i32
    return %c0_i32, %c0_i32_0 : i32, i32
  }
  func.func @transform_3(%arg0: i32) -> (i32, i32) {
    %c0_i32 = arith.constant 0 : i32
    %c0_i32_0 = arith.constant 0 : i32
    return %arg0, %c0_i32 : i32, i32
  }
}

module attributes {stable_mosaic.version = 11 : i64} {
  func.func @_ln_linear_kernel(%arg0: i32, %arg1: i32, %arg2: memref<6x128xf32, #tpu.memory_space<vmem>>, %arg3: memref<1x128xf32, #tpu.memory_space<vmem>>, %arg4: memref<1x128xf32, #tpu.memory_space<vmem>>, %arg5: memref<128x384xbf16, #tpu.memory_space<vmem>>, %arg6: memref<1x384xf32, #tpu.memory_space<vmem>>, %arg7: memref<6x384xbf16, #tpu.memory_space<vmem>>) attributes {dimension_semantics = [#tpu.dimension_semantics<parallel>, #tpu.dimension_semantics<parallel>], iteration_bounds = array<i64: 1, 1>, scalar_prefetch = 0 : i64, scratch_operands = 0 : i64, tpu.core_type = #tpu.core_type<tc>, window_params = [{transform_indices = @transform_0, window_bounds = array<i64: 6, 128>}, {pipeline_mode = #tpu.pipeline_mode<synchronous>, transform_indices = @transform_1, window_bounds = array<i64: 1, 128>}, {pipeline_mode = #tpu.pipeline_mode<synchronous>, transform_indices = @transform_2, window_bounds = array<i64: 1, 128>}, {transform_indices = @transform_3, window_bounds = array<i64: 128, 384>}, {transform_indices = @transform_4, window_bounds = array<i64: 1, 384>}, {transform_indices = @transform_5, window_bounds = array<i64: 6, 384>}]} {
    %c0 = arith.constant 0 : index
    %c0_0 = arith.constant 0 : index
    %0 = vector.load %arg2[%c0, %c0_0] : memref<6x128xf32, #tpu.memory_space<vmem>>, vector<6x128xf32>
    %cst = arith.constant dense<0.000000e+00> : vector<6xf32>
    %1 = vector.multi_reduction <add>, %0, %cst [1] : vector<6x128xf32> to vector<6xf32>
    %2 = vector.shape_cast %1 : vector<6xf32> to vector<6x1xf32>
    %cst_1 = arith.constant 1.280000e+02 : f32
    %3 = vector.broadcast %cst_1 : f32 to vector<6x1xf32>
    %4 = arith.divf %2, %3 : vector<6x1xf32>
    %5 = vector.broadcast %4 : vector<6x1xf32> to vector<6x128xf32>
    %6 = arith.subf %0, %5 : vector<6x128xf32>
    %7 = arith.mulf %6, %6 : vector<6x128xf32>
    %cst_2 = arith.constant dense<0.000000e+00> : vector<6xf32>
    %8 = vector.multi_reduction <add>, %7, %cst_2 [1] : vector<6x128xf32> to vector<6xf32>
    %9 = vector.shape_cast %8 : vector<6xf32> to vector<6x1xf32>
    %cst_3 = arith.constant 1.280000e+02 : f32
    %10 = vector.broadcast %cst_3 : f32 to vector<6x1xf32>
    %11 = arith.divf %9, %10 : vector<6x1xf32>
    %cst_4 = arith.constant 9.99999974E-6 : f32
    %12 = vector.broadcast %cst_4 : f32 to vector<6x1xf32>
    %13 = arith.addf %11, %12 : vector<6x1xf32>
    %14 = math.rsqrt %13 : vector<6x1xf32>
    %15 = vector.broadcast %4 : vector<6x1xf32> to vector<6x128xf32>
    %16 = arith.subf %0, %15 : vector<6x128xf32>
    %17 = vector.broadcast %14 : vector<6x1xf32> to vector<6x128xf32>
    %18 = arith.mulf %16, %17 : vector<6x128xf32>
    %c0_5 = arith.constant 0 : index
    %c0_6 = arith.constant 0 : index
    %19 = vector.load %arg3[%c0_5, %c0_6] : memref<1x128xf32, #tpu.memory_space<vmem>>, vector<1x128xf32>
    %20 = vector.broadcast %19 : vector<1x128xf32> to vector<6x128xf32>
    %21 = arith.mulf %18, %20 : vector<6x128xf32>
    %c0_7 = arith.constant 0 : index
    %c0_8 = arith.constant 0 : index
    %22 = vector.load %arg4[%c0_7, %c0_8] : memref<1x128xf32, #tpu.memory_space<vmem>>, vector<1x128xf32>
    %23 = vector.broadcast %22 : vector<1x128xf32> to vector<6x128xf32>
    %24 = arith.addf %21, %23 : vector<6x128xf32>
    %25 = arith.truncf %24 : vector<6x128xf32> to vector<6x128xbf16>
    %c0_9 = arith.constant 0 : index
    %c0_10 = arith.constant 0 : index
    %26 = vector.load %arg5[%c0_9, %c0_10] : memref<128x384xbf16, #tpu.memory_space<vmem>>, vector<128x384xbf16>
    %cst_11 = arith.constant dense<0.000000e+00> : vector<6x384xf32>
    %27 = tpu.matmul %25, %26, %cst_11 {dimension_numbers = #tpu.dot_dimension_numbers<[1], [0], [0], [1], [0, 0, 1, 1], [], []>} : vector<6x128xbf16>, vector<128x384xbf16>, vector<6x384xf32> -> vector<6x384xf32>
    %c0_12 = arith.constant 0 : index
    %c0_13 = arith.constant 0 : index
    %28 = vector.load %arg6[%c0_12, %c0_13] : memref<1x384xf32, #tpu.memory_space<vmem>>, vector<1x384xf32>
    %29 = vector.broadcast %28 : vector<1x384xf32> to vector<6x384xf32>
    %30 = arith.addf %27, %29 : vector<6x384xf32>
    %31 = arith.truncf %30 : vector<6x384xf32> to vector<6x384xbf16>
    %c0_14 = arith.constant 0 : index
    %c0_15 = arith.constant 0 : index
    %32 = vector.load %arg7[%c0_14, %c0_15] : memref<6x384xbf16, #tpu.memory_space<vmem>>, vector<6x384xbf16>
    tpu.vector_store %arg7[%c0_14, %c0_15], %31 {strides = array<i32>} : memref<6x384xbf16, #tpu.memory_space<vmem>>, vector<6x384xbf16>,
    return
  }
  func.func @transform_0(%arg0: i32, %arg1: i32) -> (i32, i32) {
    %c0_i32 = arith.constant 0 : i32
    %c0_i32_0 = arith.constant 0 : i32
    return %arg0, %c0_i32 : i32, i32
  }
  func.func @transform_1(%arg0: i32, %arg1: i32) -> (i32, i32) {
    %c0_i32 = arith.constant 0 : i32
    %c0_i32_0 = arith.constant 0 : i32
    %c0_i32_1 = arith.constant 0 : i32
    return %c0_i32, %c0_i32_0 : i32, i32
  }
  func.func @transform_2(%arg0: i32, %arg1: i32) -> (i32, i32) {
    %c0_i32 = arith.constant 0 : i32
    %c0_i32_0 = arith.constant 0 : i32
    %c0_i32_1 = arith.constant 0 : i32
    return %c0_i32, %c0_i32_0 : i32, i32
  }
  func.func @transform_3(%arg0: i32, %arg1: i32) -> (i32, i32) {
    %c0_i32 = arith.constant 0 : i32
    %c0_i32_0 = arith.constant 0 : i32
    return %c0_i32, %arg1 : i32, i32
  }
  func.func @transform_4(%arg0: i32, %arg1: i32) -> (i32, i32) {
    %c0_i32 = arith.constant 0 : i32
    %c0_i32_0 = arith.constant 0 : i32
    return %c0_i32, %arg1 : i32, i32
  }
  func.func @transform_5(%arg0: i32, %arg1: i32) -> (i32, i32) {
    %c0_i32 = arith.constant 0 : i32
    return %arg0, %arg1 : i32, i32
  }
}

module attributes {stable_mosaic.version = 11 : i64} {
  func.func @_linear_residual_kernel(%arg0: i32, %arg1: i32, %arg2: memref<6x128xbf16, #tpu.memory_space<vmem>>, %arg3: memref<128x128xbf16, #tpu.memory_space<vmem>>, %arg4: memref<1x128xf32, #tpu.memory_space<vmem>>, %arg5: memref<6x128xf32, #tpu.memory_space<vmem>>, %arg6: memref<6x128xf32, #tpu.memory_space<vmem>>) attributes {dimension_semantics = [#tpu.dimension_semantics<parallel>, #tpu.dimension_semantics<parallel>], iteration_bounds = array<i64: 1, 1>, scalar_prefetch = 0 : i64, scratch_operands = 0 : i64, tpu.core_type = #tpu.core_type<tc>, window_params = [{transform_indices = @transform_0, window_bounds = array<i64: 6, 128>}, {transform_indices = @transform_1, window_bounds = array<i64: 128, 128>}, {transform_indices = @transform_2, window_bounds = array<i64: 1, 128>}, {transform_indices = @transform_3, window_bounds = array<i64: 6, 128>}, {transform_indices = @transform_4, window_bounds = array<i64: 6, 128>}]} {
    %c0 = arith.constant 0 : index
    %c0_0 = arith.constant 0 : index
    %0 = vector.load %arg2[%c0, %c0_0] : memref<6x128xbf16, #tpu.memory_space<vmem>>, vector<6x128xbf16>
    %c0_1 = arith.constant 0 : index
    %c0_2 = arith.constant 0 : index
    %1 = vector.load %arg3[%c0_1, %c0_2] : memref<128x128xbf16, #tpu.memory_space<vmem>>, vector<128x128xbf16>
    %cst = arith.constant dense<0.000000e+00> : vector<6x128xf32>
    %2 = tpu.matmul %0, %1, %cst {dimension_numbers = #tpu.dot_dimension_numbers<[1], [0], [0], [1], [0, 0, 1, 1], [], []>} : vector<6x128xbf16>, vector<128x128xbf16>, vector<6x128xf32> -> vector<6x128xf32>
    %c0_3 = arith.constant 0 : index
    %c0_4 = arith.constant 0 : index
    %3 = vector.load %arg4[%c0_3, %c0_4] : memref<1x128xf32, #tpu.memory_space<vmem>>, vector<1x128xf32>
    %4 = vector.broadcast %3 : vector<1x128xf32> to vector<6x128xf32>
    %5 = arith.addf %2, %4 : vector<6x128xf32>
    %c0_5 = arith.constant 0 : index
    %c0_6 = arith.constant 0 : index
    %6 = vector.load %arg5[%c0_5, %c0_6] : memref<6x128xf32, #tpu.memory_space<vmem>>, vector<6x128xf32>
    %7 = arith.addf %5, %6 : vector<6x128xf32>
    %c0_7 = arith.constant 0 : index
    %c0_8 = arith.constant 0 : index
    %8 = vector.load %arg6[%c0_7, %c0_8] : memref<6x128xf32, #tpu.memory_space<vmem>>, vector<6x128xf32>
    tpu.vector_store %arg6[%c0_7, %c0_8], %7 {strides = array<i32>} : memref<6x128xf32, #tpu.memory_space<vmem>>, vector<6x128xf32>,
    return
  }
  func.func @transform_0(%arg0: i32, %arg1: i32) -> (i32, i32) {
    %c0_i32 = arith.constant 0 : i32
    %c0_i32_0 = arith.constant 0 : i32
    return %arg0, %c0_i32 : i32, i32
  }
  func.func @transform_1(%arg0: i32, %arg1: i32) -> (i32, i32) {
    %c0_i32 = arith.constant 0 : i32
    %c0_i32_0 = arith.constant 0 : i32
    return %c0_i32, %arg1 : i32, i32
  }
  func.func @transform_2(%arg0: i32, %arg1: i32) -> (i32, i32) {
    %c0_i32 = arith.constant 0 : i32
    %c0_i32_0 = arith.constant 0 : i32
    return %c0_i32, %arg1 : i32, i32
  }
  func.func @transform_3(%arg0: i32, %arg1: i32) -> (i32, i32) {
    %c0_i32 = arith.constant 0 : i32
    return %arg0, %arg1 : i32, i32
  }
  func.func @transform_4(%arg0: i32, %arg1: i32) -> (i32, i32) {
    %c0_i32 = arith.constant 0 : i32
    return %arg0, %arg1 : i32, i32
  }
}

module attributes {stable_mosaic.version = 11 : i64} {
  func.func @_attention_kernel(%arg0: i32, %arg1: memref<1x3x384xbf16, #tpu.memory_space<vmem>>, %arg2: memref<1x3x128xbf16, #tpu.memory_space<vmem>>) attributes {dimension_semantics = [#tpu.dimension_semantics<parallel>], iteration_bounds = array<i64: 2>, scalar_prefetch = 0 : i64, scratch_operands = 0 : i64, tpu.core_type = #tpu.core_type<tc>, window_params = [{transform_indices = @transform_0, window_bounds = array<i64: 1, 3, 384>}, {transform_indices = @transform_1, window_bounds = array<i64: 1, 3, 128>}]} {
    %c0 = arith.constant 0 : index
    %c0_0 = arith.constant 0 : index
    %c0_1 = arith.constant 0 : index
    %0 = vector.load %arg1[%c0, %c0_0, %c0_1] : memref<1x3x384xbf16, #tpu.memory_space<vmem>>, vector<1x3x64xbf16>
    %1 = vector.shape_cast %0 : vector<1x3x64xbf16> to vector<3x64xbf16>
    %c0_2 = arith.constant 0 : index
    %c0_3 = arith.constant 0 : index
    %c128 = arith.constant 128 : index
    %2 = vector.load %arg1[%c0_2, %c0_3, %c128] : memref<1x3x384xbf16, #tpu.memory_space<vmem>>, vector<1x3x64xbf16>
    %3 = vector.shape_cast %2 : vector<1x3x64xbf16> to vector<3x64xbf16>
    %c0_4 = arith.constant 0 : index
    %c0_5 = arith.constant 0 : index
    %c256 = arith.constant 256 : index
    %4 = vector.load %arg1[%c0_4, %c0_5, %c256] : memref<1x3x384xbf16, #tpu.memory_space<vmem>>, vector<1x3x64xbf16>
    %5 = vector.shape_cast %4 : vector<1x3x64xbf16> to vector<3x64xbf16>
    %cst = arith.constant dense<0.000000e+00> : vector<3x3xf32>
    %6 = tpu.matmul %1, %3, %cst {dimension_numbers = #tpu.dot_dimension_numbers<[1], [1], [0], [0], [0, 0, 1, 0], [], []>} : vector<3x64xbf16>, vector<3x64xbf16>, vector<3x3xf32> -> vector<3x3xf32>
    %cst_6 = arith.constant 1.250000e-01 : f32
    %7 = vector.broadcast %cst_6 : f32 to vector<3x3xf32>
    %8 = arith.mulf %6, %7 : vector<3x3xf32>
    %cst_7 = arith.constant dense<0xFF800000> : vector<3xf32>
    %9 = vector.multi_reduction <maximumf>, %8, %cst_7 [1] : vector<3x3xf32> to vector<3xf32>
    %10 = vector.shape_cast %9 : vector<3xf32> to vector<3x1xf32>
    %11 = vector.broadcast %10 : vector<3x1xf32> to vector<3x3xf32>
    %12 = arith.subf %8, %11 : vector<3x3xf32>
    %13 = math.exp %12 : vector<3x3xf32>
    %cst_8 = arith.constant dense<0.000000e+00> : vector<3xf32>
    %14 = vector.multi_reduction <add>, %13, %cst_8 [1] : vector<3x3xf32> to vector<3xf32>
    %15 = vector.shape_cast %14 : vector<3xf32> to vector<3x1xf32>
    %16 = tpu.reciprocal %15 {approx = true} : vector<3x1xf32> -> vector<3x1xf32>
    %17 = vector.broadcast %16 : vector<3x1xf32> to vector<3x3xf32>
    %18 = arith.mulf %13, %17 : vector<3x3xf32>
    %19 = arith.truncf %18 : vector<3x3xf32> to vector<3x3xbf16>
    %cst_9 = arith.constant dense<0.000000e+00> : vector<3x64xf32>
    %20 = tpu.matmul %19, %5, %cst_9 {dimension_numbers = #tpu.dot_dimension_numbers<[1], [0], [0], [1], [0, 0, 1, 1], [], []>} : vector<3x3xbf16>, vector<3x64xbf16>, vector<3x64xf32> -> vector<3x64xf32>
    %21 = arith.truncf %20 : vector<3x64xf32> to vector<3x64xbf16>
    %c0_10 = arith.constant 0 : index
    %c0_11 = arith.constant 0 : index
    %c0_12 = arith.constant 0 : index
    %22 = vector.load %arg2[%c0_10, %c0_11, %c0_12] : memref<1x3x128xbf16, #tpu.memory_space<vmem>>, vector<1x3x64xbf16>
    %23 = vector.shape_cast %22 : vector<1x3x64xbf16> to vector<3x64xbf16>
    %24 = vector.shape_cast %21 : vector<3x64xbf16> to vector<1x3x64xbf16>
    tpu.vector_store %arg2[%c0_10, %c0_11, %c0_12], %24 {strides = array<i32>} : memref<1x3x128xbf16, #tpu.memory_space<vmem>>, vector<1x3x64xbf16>,
    %c0_13 = arith.constant 0 : index
    %c0_14 = arith.constant 0 : index
    %c64 = arith.constant 64 : index
    %25 = vector.load %arg1[%c0_13, %c0_14, %c64] : memref<1x3x384xbf16, #tpu.memory_space<vmem>>, vector<1x3x64xbf16>
    %26 = vector.shape_cast %25 : vector<1x3x64xbf16> to vector<3x64xbf16>
    %c0_15 = arith.constant 0 : index
    %c0_16 = arith.constant 0 : index
    %c192 = arith.constant 192 : index
    %27 = vector.load %arg1[%c0_15, %c0_16, %c192] : memref<1x3x384xbf16, #tpu.memory_space<vmem>>, vector<1x3x64xbf16>
    %28 = vector.shape_cast %27 : vector<1x3x64xbf16> to vector<3x64xbf16>
    %c0_17 = arith.constant 0 : index
    %c0_18 = arith.constant 0 : index
    %c320 = arith.constant 320 : index
    %29 = vector.load %arg1[%c0_17, %c0_18, %c320] : memref<1x3x384xbf16, #tpu.memory_space<vmem>>, vector<1x3x64xbf16>
    %30 = vector.shape_cast %29 : vector<1x3x64xbf16> to vector<3x64xbf16>
    %cst_19 = arith.constant dense<0.000000e+00> : vector<3x3xf32>
    %31 = tpu.matmul %26, %28, %cst_19 {dimension_numbers = #tpu.dot_dimension_numbers<[1], [1], [0], [0], [0, 0, 1, 0], [], []>} : vector<3x64xbf16>, vector<3x64xbf16>, vector<3x3xf32> -> vector<3x3xf32>
    %cst_20 = arith.constant 1.250000e-01 : f32
    %32 = vector.broadcast %cst_20 : f32 to vector<3x3xf32>
    %33 = arith.mulf %31, %32 : vector<3x3xf32>
    %cst_21 = arith.constant dense<0xFF800000> : vector<3xf32>
    %34 = vector.multi_reduction <maximumf>, %33, %cst_21 [1] : vector<3x3xf32> to vector<3xf32>
    %35 = vector.shape_cast %34 : vector<3xf32> to vector<3x1xf32>
    %36 = vector.broadcast %35 : vector<3x1xf32> to vector<3x3xf32>
    %37 = arith.subf %33, %36 : vector<3x3xf32>
    %38 = math.exp %37 : vector<3x3xf32>
    %cst_22 = arith.constant dense<0.000000e+00> : vector<3xf32>
    %39 = vector.multi_reduction <add>, %38, %cst_22 [1] : vector<3x3xf32> to vector<3xf32>
    %40 = vector.shape_cast %39 : vector<3xf32> to vector<3x1xf32>
    %41 = tpu.reciprocal %40 {approx = true} : vector<3x1xf32> -> vector<3x1xf32>
    %42 = vector.broadcast %41 : vector<3x1xf32> to vector<3x3xf32>
    %43 = arith.mulf %38, %42 : vector<3x3xf32>
    %44 = arith.truncf %43 : vector<3x3xf32> to vector<3x3xbf16>
    %cst_23 = arith.constant dense<0.000000e+00> : vector<3x64xf32>
    %45 = tpu.matmul %44, %30, %cst_23 {dimension_numbers = #tpu.dot_dimension_numbers<[1], [0], [0], [1], [0, 0, 1, 1], [], []>} : vector<3x3xbf16>, vector<3x64xbf16>, vector<3x64xf32> -> vector<3x64xf32>
    %46 = arith.truncf %45 : vector<3x64xf32> to vector<3x64xbf16>
    %c0_24 = arith.constant 0 : index
    %c0_25 = arith.constant 0 : index
    %c64_26 = arith.constant 64 : index
    %47 = vector.load %arg2[%c0_24, %c0_25, %c64_26] : memref<1x3x128xbf16, #tpu.memory_space<vmem>>, vector<1x3x64xbf16>
    %48 = vector.shape_cast %47 : vector<1x3x64xbf16> to vector<3x64xbf16>
    %49 = vector.shape_cast %46 : vector<3x64xbf16> to vector<1x3x64xbf16>
    tpu.vector_store %arg2[%c0_24, %c0_25, %c64_26], %49 {strides = array<i32>} : memref<1x3x128xbf16, #tpu.memory_space<vmem>>, vector<1x3x64xbf16>,
    return
  }
  func.func @transform_0(%arg0: i32) -> (i32, i32, i32) {
    %c0_i32 = arith.constant 0 : i32
    %c0_i32_0 = arith.constant 0 : i32
    %c0_i32_1 = arith.constant 0 : i32
    return %arg0, %c0_i32, %c0_i32_0 : i32, i32, i32
  }
  func.func @transform_1(%arg0: i32) -> (i32, i32, i32) {
    %c0_i32 = arith.constant 0 : i32
    %c0_i32_0 = arith.constant 0 : i32
    %c0_i32_1 = arith.constant 0 : i32
    return %arg0, %c0_i32, %c0_i32_0 : i32, i32, i32
  }
}

module attributes {stable_mosaic.version = 11 : i64} {
  func.func @_linear_residual_kernel(%arg0: i32, %arg1: i32, %arg2: memref<6x512xbf16, #tpu.memory_space<vmem>>, %arg3: memref<512x128xbf16, #tpu.memory_space<vmem>>, %arg4: memref<1x128xf32, #tpu.memory_space<vmem>>, %arg5: memref<6x128xf32, #tpu.memory_space<vmem>>, %arg6: memref<6x128xf32, #tpu.memory_space<vmem>>) attributes {dimension_semantics = [#tpu.dimension_semantics<parallel>, #tpu.dimension_semantics<parallel>], iteration_bounds = array<i64: 1, 1>, scalar_prefetch = 0 : i64, scratch_operands = 0 : i64, tpu.core_type = #tpu.core_type<tc>, window_params = [{transform_indices = @transform_0, window_bounds = array<i64: 6, 512>}, {transform_indices = @transform_1, window_bounds = array<i64: 512, 128>}, {transform_indices = @transform_2, window_bounds = array<i64: 1, 128>}, {transform_indices = @transform_3, window_bounds = array<i64: 6, 128>}, {transform_indices = @transform_4, window_bounds = array<i64: 6, 128>}]} {
    %c0 = arith.constant 0 : index
    %c0_0 = arith.constant 0 : index
    %0 = vector.load %arg2[%c0, %c0_0] : memref<6x512xbf16, #tpu.memory_space<vmem>>, vector<6x512xbf16>
    %c0_1 = arith.constant 0 : index
    %c0_2 = arith.constant 0 : index
    %1 = vector.load %arg3[%c0_1, %c0_2] : memref<512x128xbf16, #tpu.memory_space<vmem>>, vector<512x128xbf16>
    %cst = arith.constant dense<0.000000e+00> : vector<6x128xf32>
    %2 = tpu.matmul %0, %1, %cst {dimension_numbers = #tpu.dot_dimension_numbers<[1], [0], [0], [1], [0, 0, 1, 1], [], []>} : vector<6x512xbf16>, vector<512x128xbf16>, vector<6x128xf32> -> vector<6x128xf32>
    %c0_3 = arith.constant 0 : index
    %c0_4 = arith.constant 0 : index
    %3 = vector.load %arg4[%c0_3, %c0_4] : memref<1x128xf32, #tpu.memory_space<vmem>>, vector<1x128xf32>
    %4 = vector.broadcast %3 : vector<1x128xf32> to vector<6x128xf32>
    %5 = arith.addf %2, %4 : vector<6x128xf32>
    %c0_5 = arith.constant 0 : index
    %c0_6 = arith.constant 0 : index
    %6 = vector.load %arg5[%c0_5, %c0_6] : memref<6x128xf32, #tpu.memory_space<vmem>>, vector<6x128xf32>
    %7 = arith.addf %5, %6 : vector<6x128xf32>
    %c0_7 = arith.constant 0 : index
    %c0_8 = arith.constant 0 : index
    %8 = vector.load %arg6[%c0_7, %c0_8] : memref<6x128xf32, #tpu.memory_space<vmem>>, vector<6x128xf32>
    tpu.vector_store %arg6[%c0_7, %c0_8], %7 {strides = array<i32>} : memref<6x128xf32, #tpu.memory_space<vmem>>, vector<6x128xf32>,
    return
  }
  func.func @transform_0(%arg0: i32, %arg1: i32) -> (i32, i32) {
    %c0_i32 = arith.constant 0 : i32
    %c0_i32_0 = arith.constant 0 : i32
    return %arg0, %c0_i32 : i32, i32
  }
  func.func @transform_1(%arg0: i32, %arg1: i32) -> (i32, i32) {
    %c0_i32 = arith.constant 0 : i32
    %c0_i32_0 = arith.constant 0 : i32
    return %c0_i32, %arg1 : i32, i32
  }
  func.func @transform_2(%arg0: i32, %arg1: i32) -> (i32, i32) {
    %c0_i32 = arith.constant 0 : i32
    %c0_i32_0 = arith.constant 0 : i32
    return %c0_i32, %arg1 : i32, i32
  }
  func.func @transform_3(%arg0: i32, %arg1: i32) -> (i32, i32) {
    %c0_i32 = arith.constant 0 : i32
    return %arg0, %arg1 : i32, i32
  }
  func.func @transform_4(%arg0: i32, %arg1: i32) -> (i32, i32) {
    %c0_i32 = arith.constant 0 : i32
    return %arg0, %arg1 : i32, i32
  }
}

module attributes {stable_mosaic.version = 11 : i64} {
  func.func @_ln_linear_kernel(%arg0: i32, %arg1: i32, %arg2: memref<6x128xf32, #tpu.memory_space<vmem>>, %arg3: memref<1x128xf32, #tpu.memory_space<vmem>>, %arg4: memref<1x128xf32, #tpu.memory_space<vmem>>, %arg5: memref<128x512xbf16, #tpu.memory_space<vmem>>, %arg6: memref<1x512xf32, #tpu.memory_space<vmem>>, %arg7: memref<6x512xbf16, #tpu.memory_space<vmem>>) attributes {dimension_semantics = [#tpu.dimension_semantics<parallel>, #tpu.dimension_semantics<parallel>], iteration_bounds = array<i64: 1, 1>, scalar_prefetch = 0 : i64, scratch_operands = 0 : i64, tpu.core_type = #tpu.core_type<tc>, window_params = [{transform_indices = @transform_0, window_bounds = array<i64: 6, 128>}, {pipeline_mode = #tpu.pipeline_mode<synchronous>, transform_indices = @transform_1, window_bounds = array<i64: 1, 128>}, {pipeline_mode = #tpu.pipeline_mode<synchronous>, transform_indices = @transform_2, window_bounds = array<i64: 1, 128>}, {transform_indices = @transform_3, window_bounds = array<i64: 128, 512>}, {transform_indices = @transform_4, window_bounds = array<i64: 1, 512>}, {transform_indices = @transform_5, window_bounds = array<i64: 6, 512>}]} {
    %c0 = arith.constant 0 : index
    %c0_0 = arith.constant 0 : index
    %0 = vector.load %arg2[%c0, %c0_0] : memref<6x128xf32, #tpu.memory_space<vmem>>, vector<6x128xf32>
    %cst = arith.constant dense<0.000000e+00> : vector<6xf32>
    %1 = vector.multi_reduction <add>, %0, %cst [1] : vector<6x128xf32> to vector<6xf32>
    %2 = vector.shape_cast %1 : vector<6xf32> to vector<6x1xf32>
    %cst_1 = arith.constant 1.280000e+02 : f32
    %3 = vector.broadcast %cst_1 : f32 to vector<6x1xf32>
    %4 = arith.divf %2, %3 : vector<6x1xf32>
    %5 = vector.broadcast %4 : vector<6x1xf32> to vector<6x128xf32>
    %6 = arith.subf %0, %5 : vector<6x128xf32>
    %7 = arith.mulf %6, %6 : vector<6x128xf32>
    %cst_2 = arith.constant dense<0.000000e+00> : vector<6xf32>
    %8 = vector.multi_reduction <add>, %7, %cst_2 [1] : vector<6x128xf32> to vector<6xf32>
    %9 = vector.shape_cast %8 : vector<6xf32> to vector<6x1xf32>
    %cst_3 = arith.constant 1.280000e+02 : f32
    %10 = vector.broadcast %cst_3 : f32 to vector<6x1xf32>
    %11 = arith.divf %9, %10 : vector<6x1xf32>
    %cst_4 = arith.constant 9.99999974E-6 : f32
    %12 = vector.broadcast %cst_4 : f32 to vector<6x1xf32>
    %13 = arith.addf %11, %12 : vector<6x1xf32>
    %14 = math.rsqrt %13 : vector<6x1xf32>
    %15 = vector.broadcast %4 : vector<6x1xf32> to vector<6x128xf32>
    %16 = arith.subf %0, %15 : vector<6x128xf32>
    %17 = vector.broadcast %14 : vector<6x1xf32> to vector<6x128xf32>
    %18 = arith.mulf %16, %17 : vector<6x128xf32>
    %c0_5 = arith.constant 0 : index
    %c0_6 = arith.constant 0 : index
    %19 = vector.load %arg3[%c0_5, %c0_6] : memref<1x128xf32, #tpu.memory_space<vmem>>, vector<1x128xf32>
    %20 = vector.broadcast %19 : vector<1x128xf32> to vector<6x128xf32>
    %21 = arith.mulf %18, %20 : vector<6x128xf32>
    %c0_7 = arith.constant 0 : index
    %c0_8 = arith.constant 0 : index
    %22 = vector.load %arg4[%c0_7, %c0_8] : memref<1x128xf32, #tpu.memory_space<vmem>>, vector<1x128xf32>
    %23 = vector.broadcast %22 : vector<1x128xf32> to vector<6x128xf32>
    %24 = arith.addf %21, %23 : vector<6x128xf32>
    %25 = arith.truncf %24 : vector<6x128xf32> to vector<6x128xbf16>
    %c0_9 = arith.constant 0 : index
    %c0_10 = arith.constant 0 : index
    %26 = vector.load %arg5[%c0_9, %c0_10] : memref<128x512xbf16, #tpu.memory_space<vmem>>, vector<128x512xbf16>
    %cst_11 = arith.constant dense<0.000000e+00> : vector<6x512xf32>
    %27 = tpu.matmul %25, %26, %cst_11 {dimension_numbers = #tpu.dot_dimension_numbers<[1], [0], [0], [1], [0, 0, 1, 1], [], []>} : vector<6x128xbf16>, vector<128x512xbf16>, vector<6x512xf32> -> vector<6x512xf32>
    %c0_12 = arith.constant 0 : index
    %c0_13 = arith.constant 0 : index
    %28 = vector.load %arg6[%c0_12, %c0_13] : memref<1x512xf32, #tpu.memory_space<vmem>>, vector<1x512xf32>
    %29 = vector.broadcast %28 : vector<1x512xf32> to vector<6x512xf32>
    %30 = arith.addf %27, %29 : vector<6x512xf32>
    %cst_14 = arith.constant 5.000000e-01 : f32
    %31 = vector.broadcast %cst_14 : f32 to vector<6x512xf32>
    %32 = arith.mulf %31, %30 : vector<6x512xf32>
    %cst_15 = arith.constant 0.707106769 : f32
    %33 = vector.broadcast %cst_15 : f32 to vector<6x512xf32>
    %34 = arith.mulf %30, %33 : vector<6x512xf32>
    %cst_16 = arith.constant 0.000000e+00 : f32
    %35 = vector.broadcast %cst_16 : f32 to vector<6x512xf32>
    %36 = arith.cmpf oge, %34, %35 : vector<6x512xf32>
    %cst_17 = arith.constant 1.000000e+00 : f32
    %cst_18 = arith.constant -1.000000e+00 : f32
    %37 = vector.broadcast %cst_17 : f32 to vector<6x512xf32>
    %38 = vector.broadcast %cst_18 : f32 to vector<6x512xf32>
    %39 = arith.select %36, %37, %38 : vector<6x512xi1>, vector<6x512xf32>
    %40 = math.absf %34 : vector<6x512xf32>
    %cst_19 = arith.constant 0.327591091 : f32
    %41 = vector.broadcast %cst_19 : f32 to vector<6x512xf32>
    %42 = arith.mulf %41, %40 : vector<6x512xf32>
    %cst_20 = arith.constant 1.000000e+00 : f32
    %43 = vector.broadcast %cst_20 : f32 to vector<6x512xf32>
    %44 = arith.addf %43, %42 : vector<6x512xf32>
    %45 = tpu.reciprocal %44 {approx = true} : vector<6x512xf32> -> vector<6x512xf32>
    %cst_21 = arith.constant 1.06140542 : f32
    %46 = vector.broadcast %cst_21 : f32 to vector<6x512xf32>
    %47 = arith.mulf %46, %45 : vector<6x512xf32>
    %cst_22 = arith.constant -1.45315206 : f32
    %48 = vector.broadcast %cst_22 : f32 to vector<6x512xf32>
    %49 = arith.addf %47, %48 : vector<6x512xf32>
    %50 = arith.mulf %49, %45 : vector<6x512xf32>
    %cst_23 = arith.constant 1.42141378 : f32
    %51 = vector.broadcast %cst_23 : f32 to vector<6x512xf32>
    %52 = arith.addf %50, %51 : vector<6x512xf32>
    %53 = arith.mulf %52, %45 : vector<6x512xf32>
    %cst_24 = arith.constant -0.284496725 : f32
    %54 = vector.broadcast %cst_24 : f32 to vector<6x512xf32>
    %55 = arith.addf %53, %54 : vector<6x512xf32>
    %56 = arith.mulf %55, %45 : vector<6x512xf32>
    %cst_25 = arith.constant 0.254829586 : f32
    %57 = vector.broadcast %cst_25 : f32 to vector<6x512xf32>
    %58 = arith.addf %56, %57 : vector<6x512xf32>
    %59 = arith.mulf %58, %45 : vector<6x512xf32>
    %cst_26 = arith.constant 0.000000e+00 : f32
    %60 = vector.broadcast %cst_26 : f32 to vector<6x512xf32>
    %61 = arith.subf %60, %40 : vector<6x512xf32>
    %62 = arith.mulf %61, %40 : vector<6x512xf32>
    %63 = math.exp %62 : vector<6x512xf32>
    %64 = arith.mulf %59, %63 : vector<6x512xf32>
    %cst_27 = arith.constant 1.000000e+00 : f32
    %65 = vector.broadcast %cst_27 : f32 to vector<6x512xf32>
    %66 = arith.subf %65, %64 : vector<6x512xf32>
    %67 = arith.mulf %39, %66 : vector<6x512xf32>
    %cst_28 = arith.constant 1.000000e+00 : f32
    %68 = vector.broadcast %cst_28 : f32 to vector<6x512xf32>
    %69 = arith.addf %68, %67 : vector<6x512xf32>
    %70 = arith.mulf %32, %69 : vector<6x512xf32>
    %71 = arith.truncf %70 : vector<6x512xf32> to vector<6x512xbf16>
    %c0_29 = arith.constant 0 : index
    %c0_30 = arith.constant 0 : index
    %72 = vector.load %arg7[%c0_29, %c0_30] : memref<6x512xbf16, #tpu.memory_space<vmem>>, vector<6x512xbf16>
    tpu.vector_store %arg7[%c0_29, %c0_30], %71 {strides = array<i32>} : memref<6x512xbf16, #tpu.memory_space<vmem>>, vector<6x512xbf16>,
    return
  }
  func.func @transform_0(%arg0: i32, %arg1: i32) -> (i32, i32) {
    %c0_i32 = arith.constant 0 : i32
    %c0_i32_0 = arith.constant 0 : i32
    return %arg0, %c0_i32 : i32, i32
  }
  func.func @transform_1(%arg0: i32, %arg1: i32) -> (i32, i32) {
    %c0_i32 = arith.constant 0 : i32
    %c0_i32_0 = arith.constant 0 : i32
    %c0_i32_1 = arith.constant 0 : i32
    return %c0_i32, %c0_i32_0 : i32, i32
  }
  func.func @transform_2(%arg0: i32, %arg1: i32) -> (i32, i32) {
    %c0_i32 = arith.constant 0 : i32
    %c0_i32_0 = arith.constant 0 : i32
    %c0_i32_1 = arith.constant 0 : i32
    return %c0_i32, %c0_i32_0 : i32, i32
  }
  func.func @transform_3(%arg0: i32, %arg1: i32) -> (i32, i32) {
    %c0_i32 = arith.constant 0 : i32
    %c0_i32_0 = arith.constant 0 : i32
    return %c0_i32, %arg1 : i32, i32
  }
  func.func @transform_4(%arg0: i32, %arg1: i32) -> (i32, i32) {
    %c0_i32 = arith.constant 0 : i32
    %c0_i32_0 = arith.constant 0 : i32
    return %c0_i32, %arg1 : i32, i32
  }
  func.func @transform_5(%arg0: i32, %arg1: i32) -> (i32, i32) {
    %c0_i32 = arith.constant 0 : i32
    return %arg0, %arg1 : i32, i32
  }
}

module attributes {stable_mosaic.version = 11 : i64} {
  func.func @_layernorm_kernel(%arg0: i32, %arg1: memref<2x128xf32, #tpu.memory_space<vmem>>, %arg2: memref<1x128xf32, #tpu.memory_space<vmem>>, %arg3: memref<1x128xf32, #tpu.memory_space<vmem>>, %arg4: memref<2x128xf32, #tpu.memory_space<vmem>>) attributes {dimension_semantics = [#tpu.dimension_semantics<parallel>], iteration_bounds = array<i64: 1>, scalar_prefetch = 0 : i64, scratch_operands = 0 : i64, tpu.core_type = #tpu.core_type<tc>, window_params = [{transform_indices = @transform_0, window_bounds = array<i64: 2, 128>}, {pipeline_mode = #tpu.pipeline_mode<synchronous>, transform_indices = @transform_1, window_bounds = array<i64: 1, 128>}, {pipeline_mode = #tpu.pipeline_mode<synchronous>, transform_indices = @transform_2, window_bounds = array<i64: 1, 128>}, {transform_indices = @transform_3, window_bounds = array<i64: 2, 128>}]} {
    %c0 = arith.constant 0 : index
    %c0_0 = arith.constant 0 : index
    %0 = vector.load %arg1[%c0, %c0_0] : memref<2x128xf32, #tpu.memory_space<vmem>>, vector<2x128xf32>
    %cst = arith.constant dense<0.000000e+00> : vector<2xf32>
    %1 = vector.multi_reduction <add>, %0, %cst [1] : vector<2x128xf32> to vector<2xf32>
    %2 = vector.shape_cast %1 : vector<2xf32> to vector<2x1xf32>
    %cst_1 = arith.constant 1.280000e+02 : f32
    %3 = vector.broadcast %cst_1 : f32 to vector<2x1xf32>
    %4 = arith.divf %2, %3 : vector<2x1xf32>
    %5 = vector.broadcast %4 : vector<2x1xf32> to vector<2x128xf32>
    %6 = arith.subf %0, %5 : vector<2x128xf32>
    %7 = arith.mulf %6, %6 : vector<2x128xf32>
    %cst_2 = arith.constant dense<0.000000e+00> : vector<2xf32>
    %8 = vector.multi_reduction <add>, %7, %cst_2 [1] : vector<2x128xf32> to vector<2xf32>
    %9 = vector.shape_cast %8 : vector<2xf32> to vector<2x1xf32>
    %cst_3 = arith.constant 1.280000e+02 : f32
    %10 = vector.broadcast %cst_3 : f32 to vector<2x1xf32>
    %11 = arith.divf %9, %10 : vector<2x1xf32>
    %cst_4 = arith.constant 9.99999974E-6 : f32
    %12 = vector.broadcast %cst_4 : f32 to vector<2x1xf32>
    %13 = arith.addf %11, %12 : vector<2x1xf32>
    %14 = math.rsqrt %13 : vector<2x1xf32>
    %15 = vector.broadcast %4 : vector<2x1xf32> to vector<2x128xf32>
    %16 = arith.subf %0, %15 : vector<2x128xf32>
    %17 = vector.broadcast %14 : vector<2x1xf32> to vector<2x128xf32>
    %18 = arith.mulf %16, %17 : vector<2x128xf32>
    %c0_5 = arith.constant 0 : index
    %c0_6 = arith.constant 0 : index
    %19 = vector.load %arg2[%c0_5, %c0_6] : memref<1x128xf32, #tpu.memory_space<vmem>>, vector<1x128xf32>
    %20 = vector.broadcast %19 : vector<1x128xf32> to vector<2x128xf32>
    %21 = arith.mulf %18, %20 : vector<2x128xf32>
    %c0_7 = arith.constant 0 : index
    %c0_8 = arith.constant 0 : index
    %22 = vector.load %arg3[%c0_7, %c0_8] : memref<1x128xf32, #tpu.memory_space<vmem>>, vector<1x128xf32>
    %23 = vector.broadcast %22 : vector<1x128xf32> to vector<2x128xf32>
    %24 = arith.addf %21, %23 : vector<2x128xf32>
    %c0_9 = arith.constant 0 : index
    %c0_10 = arith.constant 0 : index
    %25 = vector.load %arg4[%c0_9, %c0_10] : memref<2x128xf32, #tpu.memory_space<vmem>>, vector<2x128xf32>
    tpu.vector_store %arg4[%c0_9, %c0_10], %24 {strides = array<i32>} : memref<2x128xf32, #tpu.memory_space<vmem>>, vector<2x128xf32>,
    return
  }
  func.func @transform_0(%arg0: i32) -> (i32, i32) {
    %c0_i32 = arith.constant 0 : i32
    %c0_i32_0 = arith.constant 0 : i32
    return %arg0, %c0_i32 : i32, i32
  }
  func.func @transform_1(%arg0: i32) -> (i32, i32) {
    %c0_i32 = arith.constant 0 : i32
    %c0_i32_0 = arith.constant 0 : i32
    %c0_i32_1 = arith.constant 0 : i32
    return %c0_i32, %c0_i32_0 : i32, i32
  }
  func.func @transform_2(%arg0: i32) -> (i32, i32) {
    %c0_i32 = arith.constant 0 : i32
    %c0_i32_0 = arith.constant 0 : i32
    %c0_i32_1 = arith.constant 0 : i32
    return %c0_i32, %c0_i32_0 : i32, i32
  }
  func.func @transform_3(%arg0: i32) -> (i32, i32) {
    %c0_i32 = arith.constant 0 : i32
    %c0_i32_0 = arith.constant 0 : i32
    return %arg0, %c0_i32 : i32, i32
  }
}

module attributes {stable_mosaic.version = 11 : i64} {
  func.func @_ln_linear_kernel(%arg0: i32, %arg1: i32, %arg2: memref<2x128xf32, #tpu.memory_space<vmem>>, %arg3: memref<1x128xf32, #tpu.memory_space<vmem>>, %arg4: memref<1x128xf32, #tpu.memory_space<vmem>>, %arg5: memref<128x10xbf16, #tpu.memory_space<vmem>>, %arg6: memref<1x10xf32, #tpu.memory_space<vmem>>, %arg7: memref<2x10xf32, #tpu.memory_space<vmem>>) attributes {dimension_semantics = [#tpu.dimension_semantics<parallel>, #tpu.dimension_semantics<parallel>], iteration_bounds = array<i64: 1, 1>, scalar_prefetch = 0 : i64, scratch_operands = 0 : i64, tpu.core_type = #tpu.core_type<tc>, window_params = [{transform_indices = @transform_0, window_bounds = array<i64: 2, 128>}, {pipeline_mode = #tpu.pipeline_mode<synchronous>, transform_indices = @transform_1, window_bounds = array<i64: 1, 128>}, {pipeline_mode = #tpu.pipeline_mode<synchronous>, transform_indices = @transform_2, window_bounds = array<i64: 1, 128>}, {transform_indices = @transform_3, window_bounds = array<i64: 128, 10>}, {transform_indices = @transform_4, window_bounds = array<i64: 1, 10>}, {transform_indices = @transform_5, window_bounds = array<i64: 2, 10>}]} {
    %c0 = arith.constant 0 : index
    %c0_0 = arith.constant 0 : index
    %0 = vector.load %arg2[%c0, %c0_0] : memref<2x128xf32, #tpu.memory_space<vmem>>, vector<2x128xf32>
    %cst = arith.constant dense<0.000000e+00> : vector<2xf32>
    %1 = vector.multi_reduction <add>, %0, %cst [1] : vector<2x128xf32> to vector<2xf32>
    %2 = vector.shape_cast %1 : vector<2xf32> to vector<2x1xf32>
    %cst_1 = arith.constant 1.280000e+02 : f32
    %3 = vector.broadcast %cst_1 : f32 to vector<2x1xf32>
    %4 = arith.divf %2, %3 : vector<2x1xf32>
    %5 = vector.broadcast %4 : vector<2x1xf32> to vector<2x128xf32>
    %6 = arith.subf %0, %5 : vector<2x128xf32>
    %7 = arith.mulf %6, %6 : vector<2x128xf32>
    %cst_2 = arith.constant dense<0.000000e+00> : vector<2xf32>
    %8 = vector.multi_reduction <add>, %7, %cst_2 [1] : vector<2x128xf32> to vector<2xf32>
    %9 = vector.shape_cast %8 : vector<2xf32> to vector<2x1xf32>
    %cst_3 = arith.constant 1.280000e+02 : f32
    %10 = vector.broadcast %cst_3 : f32 to vector<2x1xf32>
    %11 = arith.divf %9, %10 : vector<2x1xf32>
    %cst_4 = arith.constant 9.99999974E-6 : f32
    %12 = vector.broadcast %cst_4 : f32 to vector<2x1xf32>
    %13 = arith.addf %11, %12 : vector<2x1xf32>
    %14 = math.rsqrt %13 : vector<2x1xf32>
    %15 = vector.broadcast %4 : vector<2x1xf32> to vector<2x128xf32>
    %16 = arith.subf %0, %15 : vector<2x128xf32>
    %17 = vector.broadcast %14 : vector<2x1xf32> to vector<2x128xf32>
    %18 = arith.mulf %16, %17 : vector<2x128xf32>
    %c0_5 = arith.constant 0 : index
    %c0_6 = arith.constant 0 : index
    %19 = vector.load %arg3[%c0_5, %c0_6] : memref<1x128xf32, #tpu.memory_space<vmem>>, vector<1x128xf32>
    %20 = vector.broadcast %19 : vector<1x128xf32> to vector<2x128xf32>
    %21 = arith.mulf %18, %20 : vector<2x128xf32>
    %c0_7 = arith.constant 0 : index
    %c0_8 = arith.constant 0 : index
    %22 = vector.load %arg4[%c0_7, %c0_8] : memref<1x128xf32, #tpu.memory_space<vmem>>, vector<1x128xf32>
    %23 = vector.broadcast %22 : vector<1x128xf32> to vector<2x128xf32>
    %24 = arith.addf %21, %23 : vector<2x128xf32>
    %25 = arith.truncf %24 : vector<2x128xf32> to vector<2x128xbf16>
    %c0_9 = arith.constant 0 : index
    %c0_10 = arith.constant 0 : index
    %26 = vector.load %arg5[%c0_9, %c0_10] : memref<128x10xbf16, #tpu.memory_space<vmem>>, vector<128x10xbf16>
    %cst_11 = arith.constant dense<0.000000e+00> : vector<2x10xf32>
    %27 = tpu.matmul %25, %26, %cst_11 {dimension_numbers = #tpu.dot_dimension_numbers<[1], [0], [0], [1], [0, 0, 1, 1], [], []>} : vector<2x128xbf16>, vector<128x10xbf16>, vector<2x10xf32> -> vector<2x10xf32>
    %c0_12 = arith.constant 0 : index
    %c0_13 = arith.constant 0 : index
    %28 = vector.load %arg6[%c0_12, %c0_13] : memref<1x10xf32, #tpu.memory_space<vmem>>, vector<1x10xf32>
    %29 = vector.broadcast %28 : vector<1x10xf32> to vector<2x10xf32>
    %30 = arith.addf %27, %29 : vector<2x10xf32>
    %c0_14 = arith.constant 0 : index
    %c0_15 = arith.constant 0 : index
    %31 = vector.load %arg7[%c0_14, %c0_15] : memref<2x10xf32, #tpu.memory_space<vmem>>, vector<2x10xf32>
    tpu.vector_store %arg7[%c0_14, %c0_15], %30 {strides = array<i32>} : memref<2x10xf32, #tpu.memory_space<vmem>>, vector<2x10xf32>,
    return
  }
  func.func @transform_0(%arg0: i32, %arg1: i32) -> (i32, i32) {
    %c0_i32 = arith.constant 0 : i32
    %c0_i32_0 = arith.constant 0 : i32
    return %arg0, %c0_i32 : i32, i32
  }
  func.func @transform_1(%arg0: i32, %arg1: i32) -> (i32, i32) {
    %c0_i32 = arith.constant 0 : i32
    %c0_i32_0 = arith.constant 0 : i32
    %c0_i32_1 = arith.constant 0 : i32
    return %c0_i32, %c0_i32_0 : i32, i32
  }
  func.func @transform_2(%arg0: i32, %arg1: i32) -> (i32, i32) {
    %c0_i32 = arith.constant 0 : i32
    %c0_i32_0 = arith.constant 0 : i32
    %c0_i32_1 = arith.constant 0 : i32
    return %c0_i32, %c0_i32_0 : i32, i32
  }
  func.func @transform_3(%arg0: i32, %arg1: i32) -> (i32, i32) {
    %c0_i32 = arith.constant 0 : i32
    %c0_i32_0 = arith.constant 0 : i32
    return %c0_i32, %arg1 : i32, i32
  }
  func.func @transform_4(%arg0: i32, %arg1: i32) -> (i32, i32) {
    %c0_i32 = arith.constant 0 : i32
    %c0_i32_0 = arith.constant 0 : i32
    return %c0_i32, %arg1 : i32, i32
  }
  func.func @transform_5(%arg0: i32, %arg1: i32) -> (i32, i32) {
    %c0_i32 = arith.constant 0 : i32
    return %arg0, %arg1 : i32, i32
  }
}

</mosaic_0001>

<bundles_post_ra>
// kernel: _lambda_.24
= control target key start
LH: loop header
LB: loop body
LE: loop exit
PB: predicated region body
PF: predicated region fallthrough
CT: control target
= control target key end

     0   :  { %v202_v0 = vmov 0   ;;  %vm124_vm0 = vcmask 523264   ;;  %s280_s1 = inlined_call_operand.vmem [shape: bf16[192,128], index: 1, kind: input, shape index: {}]   ;;  %s281_s0 = inlined_call_operand.vmem [shape: f32[16,192], index: 0, kind: input, shape index: {}]   ;;  %s282_s2 = inlined_call_operand.vmem [shape: f32[1,128], index: 2, kind: input, shape index: {}]   ;;  %s283_s3 = inlined_call_operand.vmem [shape: f32[16,128], index: 3, kind: output, shape index: {}]  }
   0x1   :  { %128 = vmatprep.subr.bf16.mxu0 %v202_v0  ;;  %v190_v1 = vld [vmem:[%s280_s1] sm:$0xff]   ;;  %v191_v2 = vld [vmem:[%s280_s1 + $0x8] sm:$0xff]   ;;  %v192_v3 = vld [vmem:[%s280_s1 + $0x10] sm:$0xff]  }
   0x2   :  { %129 = vmatpush1.bf16.msra.mxu0 %v190_v1  ;;  %v193_v4 = vld [vmem:[%s280_s1 + $0x18] sm:$0xff]   ;;  %v16_v5 = vld [vmem:[%s281_s0 + $0x8] sm:$0xff]  ;;  %v194_v8 = vld [vmem:[%s280_s1 + $0x20] sm:$0xff]  }
   0x3   :  { %130 = vmatprep.subr.bf16.mxu0 %v202_v0  ;;  %v18_v6 = vld [vmem:[%s281_s0 + $0x18] sm:$0xff]  ;;  %v195_v9 = vld [vmem:[%s280_s1 + $0x28] sm:$0xff]   ;;  %v196_v10 = vld [vmem:[%s280_s1 + $0x30] sm:$0xff]  }
   0x4   :  { %v20_v7 = vpack.c.bf16 %v18_v6, %v16_v5  ;;  %v197_v11 = vld [vmem:[%s280_s1 + $0x38] sm:$0xff]   ;;  %v198_v12 = vld [vmem:[%s280_s1 + $0x40] sm:$0xff]   ;;  %v199_v13 = vld [vmem:[%s280_s1 + $0x48] sm:$0xff]  }
   0x5   :  { %v200_v14 = vld [vmem:[%s280_s1 + $0x50] sm:$0xff]   ;;  %v201_v15 = vld [vmem:[%s280_s1 + $0x58] sm:$0xff]   ;;  %v15_v16 = vld [vmem:[%s281_s0] sm:$0xff] }
   0x6   :  { %131 = vmatpush1.bf16.msra.mxu0 %v191_v2  ;;  %188 = vmatprep.mubr.msk.bf16.mxu0 %vm124_vm0, %v20_v7  ;;  %v17_v17 = vld [vmem:[%s281_s0 + $0x10] sm:$0xff]  ;;  %v175_v19 = vld [vmem:[%s282_s2] ss:$0 sm:$0xff] }
   0x7   :  { %132 = vmatprep.subr.bf16.mxu0 %v202_v0  ;;  %v19_v18 = vpack.c.bf16 %v17_v17, %v15_v16 }
   0xa   :  { %133 = vmatpush1.bf16.msra.mxu0 %v192_v3 }
   0xb   :  { %134 = vmatprep.subr.bf16.mxu0 %v202_v0 }
   0xe   :  { %135 = vmatpush1.bf16.msra.mxu0 %v193_v4 }
   0xf   :  { %136 = vmatprep.subr.bf16.mxu0 %v202_v0 }
  0x12   :  { %137 = vmatpush1.bf16.msra.mxu0 %v194_v8 }
  0x13   :  { %138 = vmatprep.subr.bf16.mxu0 %v202_v0 }
  0x16   :  { %139 = vmatpush1.bf16.msra.mxu0 %v195_v9 }
  0x17   :  { %140 = vmatprep.subr.bf16.mxu0 %v202_v0 }
  0x1a   :  { %141 = vmatpush1.bf16.msra.mxu0 %v196_v10 }
  0x1b   :  { %142 = vmatprep.subr.bf16.mxu0 %v202_v0 }
  0x1e   :  { %143 = vmatpush1.bf16.msra.mxu0 %v197_v11 }
  0x1f   :  { %144 = vmatprep.subr.bf16.mxu0 %v202_v0 }
  0x22   :  { %145 = vmatpush1.bf16.msra.mxu0 %v198_v12 }
  0x23   :  { %146 = vmatprep.subr.bf16.mxu0 %v202_v0 }
  0x26   :  { %147 = vmatpush1.bf16.msra.mxu0 %v199_v13 }
  0x27   :  { %148 = vmatprep.subr.bf16.mxu0 %v202_v0 }
  0x2a   :  { %149 = vmatpush1.bf16.msra.mxu0 %v200_v14 }
  0x2b   :  { %150 = vmatprep.subr.bf16.mxu0 %v202_v0 }
  0x2e   :  { %151 = vmatpush1.bf16.msra.mxu0 %v201_v15 }
  0x31   :  { %161 = vmatmul.mubr.bf16.vlgmr.msra.gmra.mrb[0].mxu0 %v19_v18 }
 0x104   :  { %v162_v20 = vpop.f32.mrb[0].mxu0 }
 0x105   :  { %v163_v21 = vadd.f32 %v175_v19, %v162_v20  ;;  %v164_v22 = vpop.f32.mrb[1].mxu0 }
 0x106   :  { %v165_v23 = vpop.f32.mrb[2].mxu0 }
 0x107   :  { %169 = vst [vmem:[%s283_s3] sm:$0xff] %v163_v21  ;;  %v166_v24 = vadd.f32 %v175_v19, %v165_v23  ;;  %v167_v25 = vpop.f32.mrb[3].mxu0 }
 0x109   :  { %170 = vst [vmem:[%s283_s3 + $0x8] sm:$0xff] %v166_v24 }

// kernel: _lambda_.25
= control target key start
LH: loop header
LB: loop body
LE: loop exit
PB: predicated region body
PF: predicated region fallthrough
CT: control target
= control target key end

     0   :  { %vm28_vm0 = vcmask 1043456   ;;  %v509_v37 = vmov 0   ;;  %s665_s0 = inlined_call_operand.vmem [shape: f32[20,128], index: 0, kind: input, shape index: {}]   ;;  %s666_s3 = inlined_call_operand.vmem [shape: bf16[128,384], index: 3, kind: input, shape index: {}]   ;;  %s667_s1 = inlined_call_operand.vmem [shape: f32[1,128], index: 1, kind: input, shape index: {}]   ;;  %s668_s2 = inlined_call_operand.vmem [shape: f32[1,128], index: 2, kind: input, shape index: {}]   ;;  %s669_s4 = inlined_call_operand.vmem [shape: f32[1,384], index: 4, kind: input, shape index: {}]   ;;  %s670_s5 = inlined_call_operand.vmem [shape: bf16[20,384], index: 5, kind: output, shape index: {}]  }
   0x1   :  { %v21_v0 = vld [vmem:[%s665_s0] sm:$0xff]  ;;  %v23_v1 = vld [vmem:[%s665_s0 + $0x10] sm:$0xf]  ;;  %v22_v3 = vld [vmem:[%s665_s0 + $0x8] sm:$0xff]  ;;  %292 = vmatprep.mubr.bf16.mxu0 %v509_v37 }
   0x2   :  { %24 = vadd.xlane.f32.xlu0 %v21_v0  ;;  %v29_v2 = vsel %vm28_vm0, %v23_v1, 0.0  ;;  %v471_v4 = vld [vmem:[%s666_s3 + $0x4] ss:$12 sps:$4 sm:$0xff]   ;;  %v473_v5 = vld [vmem:[%s666_s3] ss:$12 sps:$4 sm:$0xff]  }
   0x3   :  { %30 = vadd.xlane.f32.xlu1 %v29_v2  ;;  %260 = vmatprep.subr.bf16.mxu0 %v471_v4  ;;  %v474_v6 = vld [vmem:[%s666_s3 + $0x8] ss:$12 sps:$4 sm:$0xff]   ;;  %v477_v21 = vld [vmem:[%s666_s3 + $0x18] ss:$12 sps:$4 sm:$0xff]   ;;  %v478_v22 = vld [vmem:[%s666_s3 + $0x20] ss:$12 sps:$4 sm:$0xff]  }
   0x4   :  { %261 = vmatpush1.bf16.msra.mxu0 %v473_v5  ;;  %v475_v7 = vld [vmem:[%s666_s3 + $0x1c] ss:$12 sps:$4 sm:$0xff]   ;;  %450 = vmatprep.subr.bf16.mxu1 %v474_v6  ;;  %v479_v23 = vld [vmem:[%s666_s3 + $0x34] ss:$12 sps:$4 sm:$0xff]   ;;  %v482_v25 = vld [vmem:[%s666_s3 + $0x38] ss:$12 sps:$4 sm:$0xff]  }
   0x5   :  { %451 = vmatpush3.bf16.msra.mxu1 %v474_v6  ;;  %262 = vmatprep.subr.bf16.mxu0 %v475_v7  ;;  %v481_v24 = vld [vmem:[%s666_s3 + $0x30] ss:$12 sps:$4 sm:$0xff]   ;;  %v483_v26 = vld [vmem:[%s666_s3 + $0x4c] ss:$12 sps:$4 sm:$0xff]   ;;  %v485_v27 = vld [vmem:[%s666_s3 + $0x48] ss:$12 sps:$4 sm:$0xff]  }
   0x6   :  { %26 = vadd.xlane.f32.xlu0 %v22_v3  ;;  %452 = vmatprep.subr.bf16.mxu1 %v478_v22  ;;  %v486_v28 = vld [vmem:[%s666_s3 + $0x50] ss:$12 sps:$4 sm:$0xff]   ;;  %v489_v30 = vld [vmem:[%s666_s3 + $0x60] ss:$12 sps:$4 sm:$0xff]   ;;  %v490_v31 = vld [vmem:[%s666_s3 + $0x68] ss:$12 sps:$4 sm:$0xff]  }
   0x7   :  { %v487_v29 = vld [vmem:[%s666_s3 + $0x64] ss:$12 sps:$4 sm:$0xff]   ;;  %v491_v32 = vld [vmem:[%s666_s3 + $0x7c] ss:$12 sps:$4 sm:$0xff]   ;;  %v494_v33 = vld [vmem:[%s666_s3 + $0x80] ss:$12 sps:$4 sm:$0xff]  }
   0x8   :  { %263 = vmatpush1.bf16.msra.mxu0 %v477_v21  ;;  %v493_v34 = vld [vmem:[%s666_s3 + $0x78] ss:$12 sps:$4 sm:$0xff]   ;;  %v495_v35 = vld [vmem:[%s666_s3 + $0x94] ss:$12 sps:$4 sm:$0xff]   ;;  %v497_v38 = vld [vmem:[%s666_s3 + $0x90] ss:$12 sps:$4 sm:$0xff]  }
   0x9   :  { %453 = vmatpush3.bf16.msra.mxu1 %v478_v22  ;;  %264 = vmatprep.subr.bf16.mxu0 %v479_v23  ;;  %v498_v36 = vld [vmem:[%s666_s3 + $0x98] ss:$12 sps:$4 sm:$0xff]   ;;  %v502_v40 = vld [vmem:[%s666_s3 + $0xb0] ss:$12 sps:$4 sm:$0xff]   ;;  %v501_v41 = vld [vmem:[%s666_s3 + $0xa8] ss:$12 sps:$4 sm:$0xff]  }
   0xa   :  { %454 = vmatprep.subr.bf16.mxu1 %v482_v25  ;;  %v499_v39 = vld [vmem:[%s666_s3 + $0xac] ss:$12 sps:$4 sm:$0xff]   ;;  %v402_v53 = vld [vmem:[%s667_s1] ss:$0 sm:$0xff] }
   0xb   :  { %v403_v59 = vld [vmem:[%s668_s2] ss:$0 sm:$0xff] }
   0xc   :  { %265 = vmatpush1.bf16.msra.mxu0 %v481_v24  ;;  %v115_v6 = vld [vmem:[%s669_s4] sm:$0x7] }
   0xd   :  { %455 = vmatpush3.bf16.msra.mxu1 %v482_v25  ;;  %266 = vmatprep.subr.bf16.mxu0 %v483_v26 }
   0xe   :  { %456 = vmatprep.subr.bf16.mxu1 %v486_v28 }
  0x10   :  { %267 = vmatpush1.bf16.msra.mxu0 %v485_v27 }
  0x11   :  { %457 = vmatpush3.bf16.msra.mxu1 %v486_v28  ;;  %268 = vmatprep.subr.bf16.mxu0 %v487_v29 }
  0x12   :  { %458 = vmatprep.subr.bf16.mxu1 %v490_v31 }
  0x14   :  { %269 = vmatpush1.bf16.msra.mxu0 %v489_v30 }
  0x15   :  { %459 = vmatpush3.bf16.msra.mxu1 %v490_v31  ;;  %270 = vmatprep.subr.bf16.mxu0 %v491_v32 }
  0x16   :  { %460 = vmatprep.subr.bf16.mxu1 %v494_v33 }
  0x18   :  { %271 = vmatpush1.bf16.msra.mxu0 %v493_v34 }
  0x19   :  { %461 = vmatpush3.bf16.msra.mxu1 %v494_v33  ;;  %272 = vmatprep.subr.bf16.mxu0 %v495_v35 }
  0x1a   :  { %462 = vmatprep.subr.bf16.mxu1 %v498_v36 }
  0x1c   :  { %273 = vmatpush1.bf16.msra.mxu0 %v497_v38 }
  0x1d   :  { %463 = vmatpush3.bf16.msra.mxu1 %v498_v36  ;;  %274 = vmatprep.subr.bf16.mxu0 %v499_v39 }
  0x1e   :  { %464 = vmatprep.subr.bf16.mxu1 %v502_v40 }
  0x20   :  { %275 = vmatpush1.bf16.msra.mxu0 %v501_v41 }
  0x21   :  { %465 = vmatpush3.bf16.msra.mxu1 %v502_v40 }
  0x8f   :  { %v25_v8 = vpop.xlane.xlu0 %24 }
  0x90   :  { %v33_v9 = vmul.f32 0.0078125, %v25_v8  ;;  %v31_v10 = vpop.xlane.xlu1 %30 }
  0x91   :  { %v35_v11 = vmul.f32 0.0078125, %v31_v10 }
  0x92   :  { %v562_v12 = vsub.f32 %v21_v0, %v33_v9 }
  0x93   :  { %v564_v13 = vsub.f32 %v23_v1, %v35_v11  ;;  %v27_v14 = vpop.xlane.xlu0 %26 }
  0x94   :  { %v34_v15 = vmul.f32 0.0078125, %v27_v14  ;;  %v39_v16 = vmul.f32 %v562_v12, %v562_v12 }
  0x95   :  { %v41_v17 = vmul.f32 %v564_v13, %v564_v13 }
  0x96   :  { %v570_v18 = vsub.f32 %v22_v3, %v34_v15  ;;  %42 = vadd.xlane.f32.xlu1 %v39_v16  ;;  %v117_v3 = vlaneseq }
  0x97   :  { %v46_v19 = vsel %vm28_vm0, %v41_v17, 0.0 }
  0x98   :  { %v40_v20 = vmul.f32 %v570_v18, %v570_v18  ;;  %v118_v4 = vshrl.u32 %v117_v3, 7 }
  0x9a   :  { %47 = vadd.xlane.f32.xlu1 %v46_v19  ;;  %44 = vadd.xlane.f32.xlu0 %v40_v20  ;;  %v119_v5 = vsub.s32 0, %v118_v4  ;;  %v123_v7 = vsub.s32 1, %v118_v4  ;;  %v127_v8 = vsub.s32 2, %v118_v4 }
  0x9c   :  { %v120_v9 = vrot.slane %v115_v6, %v119_v5  ;;  %v124_v10 = vrot.slane %v115_v6, %v123_v7  ;;  %v128_v11 = vrot.slane %v115_v6, %v127_v8 }
 0x123   :  { %v43_v42 = vpop.xlane.xlu1 %42 }
 0x124   :  { %v49_v43 = vmul.f32 0.0078125, %v43_v42 }
 0x126   :  { %v52_v44 = vadd.f32 1e-05, %v49_v43 }
 0x127   :  { %v48_v45 = vpop.xlane.xlu1 %47  ;;  %v45_v46 = vpop.xlane.xlu0 %44 }
 0x128   :  { %503 = vrsqrt.f32 %v52_v44  ;;  %v51_v47 = vmul.f32 0.0078125, %v48_v45  ;;  %v50_v48 = vmul.f32 0.0078125, %v45_v46 }
 0x12a   :  { %v54_v49 = vadd.f32 1e-05, %v51_v47  ;;  %v53_v50 = vadd.f32 1e-05, %v50_v48 }
 0x12c   :  { %505 = vrsqrt.f32 %v54_v49 }
 0x12d   :  { %507 = vrsqrt.f32 %v53_v50 }
 0x132   :  { %v504_v51 = vpop.eup %503 }
 0x133   :  { %v58_v52 = vmul.f32 %v504_v51, %v562_v12 }
 0x135   :  { %v68_v58 = vmul.f32 %v402_v53, %v58_v52 }
 0x136   :  { %v506_v54 = vpop.eup %505 }
 0x137   :  { %v508_v55 = vpop.eup %507  ;;  %v60_v56 = vmul.f32 %v506_v54, %v564_v13  ;;  %v78_v63 = vadd.f32 %v403_v59, %v68_v58 }
 0x138   :  { %v59_v57 = vmul.f32 %v508_v55, %v570_v18 }
 0x139   :  { %v70_v60 = vmul.f32 %v402_v53, %v60_v56 }
 0x13a   :  { %v69_v61 = vmul.f32 %v402_v53, %v59_v57 }
 0x13b   :  { %v80_v62 = vadd.f32 %v403_v59, %v70_v60 }
 0x13c   :  { %v79_v0 = vadd.f32 %v403_v59, %v69_v61 }
 0x13d   :  { %v82_v1 = vpack.c.bf16 %v80_v62, %v80_v62 }
 0x13e   :  { %v81_v2 = vpack.c.bf16 %v79_v0, %v78_v63 }
 0x140   :  { %293 = vmatmul.mubr.bf16.vlgmr.msra.gmra.mrb[0].mxu0 %v81_v2  ;;  %466 = vmatprep.mubr.bf16.mxu1 %v81_v2 }
 0x141   :  { %467 = vmatmul.mubr.bf16.vlgmr.msra.gmra.mrb[0].mxu1 %v82_v1  ;;  %302 = vmatprep.mubr.bf16.mxu0 %v509_v37 }
 0x148   :  { %303 = vmatmul.mubr.bf16.gmra.mrb[4].mxu0 %v82_v1 }
 0x213   :  { %v294_v12 = vpop.f32.mrb[0].mxu0 }
 0x214   :  { %v295_v13 = vadd.f32 %v294_v12, %v120_v9  ;;  %v296_v14 = vpop.f32.mrb[1].mxu0  ;;  %v468_v15 = vpop.f32.mrb[0].mxu1 }
 0x215   :  { %v297_v16 = vadd.f32 %v296_v14, %v124_v10  ;;  %v354_v17 = vadd.f32 %v468_v15, %v128_v11  ;;  %v298_v18 = vpop.f32.mrb[2].mxu0  ;;  %v345_v19 = vpop.f32.mrb[1].mxu1 }
 0x216   :  { %v299_v20 = vadd.f32 %v298_v18, %v120_v9  ;;  %v346_v21 = vadd.f32 %v345_v19, %v128_v11  ;;  %v300_v22 = vpop.f32.mrb[3].mxu0  ;;  %v469_v23 = vpop.f32.mrb[2].mxu1 }
 0x217   :  { %v434_v24 = vpack.c.bf16 %v297_v16, %v295_v13  ;;  %v439_v25 = vpack.c.bf16 %v354_v17, %v354_v17  ;;  %v301_v26 = vadd.f32 %v300_v22, %v124_v10  ;;  %v348_v27 = vpop.f32.mrb[3].mxu1 }
 0x218   :  { %v435_v28 = vpack.c.bf16 %v346_v21, %v346_v21  ;;  %v349_v29 = vadd.f32 %v348_v27, %v128_v11 }
 0x219   :  { %392 = vst [vmem:[%s670_s5] sm:$0xff] %v434_v24  ;;  %397 = vst [vmem:[%s670_s5 + $0x20] sm:$0x3] %v439_v25  ;;  %v436_v30 = vpack.c.bf16 %v301_v26, %v299_v20 }
 0x21a   :  { %393 = vst [vmem:[%s670_s5 + $0x8] sm:$0xf] %v435_v28  ;;  %v437_v31 = vpack.c.bf16 %v349_v29, %v349_v29 }
 0x21b   :  { %394 = vst [vmem:[%s670_s5 + $0xc] sm:$0xff] %v436_v30  ;;  %v304_v32 = vpop.f32.mrb[4].mxu0 }
 0x21c   :  { %395 = vst [vmem:[%s670_s5 + $0x14] sm:$0xf] %v437_v31  ;;  %v305_v33 = vadd.f32 %v304_v32, %v120_v9  ;;  %v306_v34 = vpop.f32.mrb[5].mxu0 }
 0x21d   :  { %v307_v35 = vadd.f32 %v306_v34, %v124_v10  ;;  %v308_v36 = vpop.f32.mrb[6].mxu0 }
 0x21e   :  { %v309_v37 = vpop.f32.mrb[7].mxu0 }
 0x21f   :  { %v438_v38 = vpack.c.bf16 %v307_v35, %v305_v33 }
 0x221   :  { %396 = vst [vmem:[%s670_s5 + $0x18] sm:$0x33] %v438_v38 }

// kernel: _lambda_.26
= control target key start
LH: loop header
LB: loop body
LE: loop exit
PB: predicated region body
PF: predicated region fallthrough
CT: control target
= control target key end

     0   :  { %s522_s6 = smov 0   ;;  %s577_s0 = inlined_call_operand.vmem [shape: bf16[4,5,384], index: 0, kind: input, shape index: {}]   ;;  %s578_s1 = inlined_call_operand.vmem [shape: bf16[4,5,128], index: 1, kind: output, shape index: {}]  }
   0x1 LB: > { %s426_s7 = sadd.s32 4294967295, %s506_s6   ;;  %p430_p0 = scmp.ge.s32.totalorder %s506_s6, 1  ;;  %s506_s6 = sphi %s522_s6, %s11_s6  }
   0x2   : > { %p87_p1 = scmp.lt.s32.totalorder %s506_s6, 5 }
   0x4   : > { %p88_p2 = pnand %p430_p0, %p87_p1 }
   0x5   : > { %p106_p3 = scmp.lt.s32.totalorder (!%p88_p2), %s426_s7, 3  ;;  %v508_v0 = vmov (!%p88_p2), 0.0   ;;  %vm509_vm0 = vmmov (!%p88_p2), 0   ;;  %vm119_vm1 = vcmask (!%p88_p2), 523264   ;;  %vm167_vm2 = vcmask (!%p88_p2), 36864   ;;  %s510_s12 = smov (!%p88_p2), 64  }
   0x6   : > { %91 = sbr.rel (%p88_p2) target bundleno = 1425 (0x591), region = 24  ;;  %452 = vmatprep.subr.bf16.mxu0 (!%p88_p2), %v508_v0  ;;  %454 = vmatprep.mubr.msk.bf16.mxu0 (!%p88_p2), %vm509_vm0, %v508_v0  ;;  %vm184_vm3 = vcmask (!%p88_p2), 1041408   ;;  %vm185_vm4 = vcmask (!%p88_p2), 1042432   ;;  %v511_v18 = vmov (!%p88_p2), 65535   ;;  %vm180_vm5 = vcmask (!%p88_p2), 39936  }
   0x7   : > { %458 = vmatprep.subr.bf16.mxu1 (!%p88_p2), %v508_v0  ;;  %460 = vmatprep.mubr.msk.bf16.mxu1 (!%p88_p2), %vm509_vm0, %v508_v0  ;;  %v186_v19 = vsel (!%p88_p2), %vm184_vm3, 4294967295, %v511_v18  ;;  %vm232_vm6 = vcmask (!%p88_p2), 518144   ;;  %vm233_vm7 = vsmask.f32 (!%p88_p2), 2304  ;;  %vm368_vm9 = vcmask (!%p88_p2), 1042944  }
   0x8   : > { %v187_v20 = vsel (!%p88_p2), %vm185_vm4, %v186_v19, 0  ;;  %vm234_vm8 = vmand (!%p88_p2), %vm232_vm6, %vm233_vm7 }
   0x9   : > { %vm369_vm10 = vmand (!%p88_p2), %vm368_vm9, %vm233_vm7 }
   0xd   : > { %s580_s7 = smov (!%p106_p3, %s426_s7), 3 }
   0xe   : > { %s476_s8 = smul.u32 12, %s580_s7  ;;  %s432_s13 = sshll.u32 %s580_s7, 2 }
   0xf   : > { %s560_s16 = scalar_lea.vmem %s578_s1, %s432_s13 }
  0x10   : > { %s538_s11 = scalar_lea.vmem %s577_s0, %s476_s8  ;;  %v235_v30 = vld [vmem:[%s560_s16] sm:$0x7] }
  0x11   : > { %v117_v1 = vld [vmem:[%s538_s11 + $0x4] sm:$0x7]  ;;  %v116_v3 = vld [vmem:[%s538_s11] sm:$0x7]  ;;  %v118_v17 = vld [vmem:[%s538_s11 + $0x8] sm:$0x7] }
  0x12   : > { %v124_v2 = vsel %vm119_vm1, %v117_v1, 0  ;;  %v489_v10 = vld [vmem:[%s538_s11 + $0x4] ss:$0 sps:$4 sm:$0x77]   ;;  %v189_v21 = vand.u32 %v187_v20, %v118_v17 }
  0x13   : > { %453 = vmatpush3.bf16.xpose.msra.mxu0 %v124_v2  ;;  %249 = vrot.lane.b32.xlu1 %v489_v10, %s510_s12  ;;  %v490_v11 = vld [vmem:[%s538_s11] ss:$0 sps:$4 sm:$0x77]   ;;  %v491_v42 = vld [vmem:[%s538_s11 + $0x8] ss:$0 sps:$4 sm:$0x77]  }
  0x14   : > { %470 = vmatprep.subr.bf16.mxu0 %v508_v0  ;;  %459 = vmatpush3.bf16.msra.mxu1 %v189_v21 }
  0x15   : > { %464 = vmatprep.subr.bf16.mxu1 %v508_v0 }
  0x17   : > { %244 = vrot.lane.b32.xlu1 %v490_v11, %s510_s12 }
  0x1a   : > { %455 = vmatmul.mubr.msk.bf16.vlgmr.msra.gmra.mrb[0].mxu0 %vm119_vm1, %v116_v3 }
  0x1b   : > { %472 = vmatprep.mubr.msk.bf16.mxu0 %vm509_vm0, %v508_v0 }
  0x85   : > { %v250_v24 = vpop.permute.xlu1 %249 }
  0x86   : > { %v255_v26 = vsel %vm119_vm1, %v250_v24, 0 }
  0x89   : > { %v245_v28 = vpop.permute.xlu1 %244 }
  0xed   : > { %v160_v4 = vpop.f32.mrb[0].mxu0 }
  0xee   : > { %v166_v5 = vmul.f32 0.125, %v160_v4  ;;  %v456_v6 = vpop.f32.mrb[1].mxu0 }
  0xef   : > { %v163_v7 = vpop.f32.mrb[2].mxu0 }
  0xf0   : > { %v457_v8 = vpop.f32.mrb[3].mxu0  ;;  %v168_v9 = vsel %vm167_vm2, %v166_v5, -inf }
  0xf1   : > { %169 = vmax.xlane.f32.xlu0 %v168_v9 }
 0x17e   : > { %v170_v12 = vpop.xlane.xlu0 %169 }
 0x17f   : > { %v171_v13 = vsub.f32 %v166_v5, %v170_v12 }
 0x181   : > { %v172_v14 = vmul.f32 1.442695, %v171_v13 }
 0x183   : > { %492 = vpow2.f32 %v172_v14 }
 0x18d   : > { %v493_v15 = vpop.eup %492 }
 0x18e   : > { %v174_v16 = vsel %vm167_vm2, %v493_v15, 0.0 }
 0x18f   : > { %175 = vadd.xlane.f32.xlu0 %v174_v16 }
 0x21c   : > { %v176_v22 = vpop.xlane.xlu0 %175 }
 0x21d   : > { %494 = vrcp.f32 %v176_v22 }
 0x227   : > { %v495_v23 = vpop.eup %494 }
 0x228   : > { %v178_v25 = vmul.f32 %v495_v23, %v493_v15 }
 0x22a   : > { %v179_v27 = vpack.c.bf16 %v178_v25, %v178_v25 }
 0x22c   : > { %461 = vmatmul.mubr.msk.bf16.vlgmr.msra.gmra.mrb[0].mxu1 %vm180_vm5, %v179_v27 }
 0x22d   : > { %465 = vmatpush3.bf16.xpose.msra.mxu1 %v255_v26  ;;  %466 = vmatprep.mubr.msk.bf16.mxu1 %vm509_vm0, %v508_v0 }
 0x234   : > { %467 = vmatmul.mubr.msk.bf16.vlgmr.msra.gmra.mrb[4].mxu1 %vm119_vm1, %v245_v28 }
 0x2ff   : > { %v225_v29 = vpop.f32.mrb[0].mxu1 }
 0x300   : > { %v231_v31 = vpack.c.bf16 %v225_v29, %v225_v29  ;;  %v462_v32 = vpop.f32.mrb[1].mxu1 }
 0x301   : > { %v228_v33 = vpop.f32.mrb[2].mxu1 }
 0x302   : > { %v236_v34 = vsel %vm234_vm8, %v231_v31, %v235_v30  ;;  %v463_v35 = vpop.f32.mrb[3].mxu1 }
 0x303   : > { %237 = vst [vmem:[%s560_s16] sm:$0x7] %v236_v34 }
 0x307   : > { %v291_v36 = vpop.f32.mrb[4].mxu1 }
 0x308   : > { %v297_v37 = vmul.f32 0.125, %v291_v36  ;;  %v468_v38 = vpop.f32.mrb[5].mxu1 }
 0x309   : > { %v294_v39 = vpop.f32.mrb[6].mxu1 }
 0x30a   : > { %v469_v40 = vpop.f32.mrb[7].mxu1  ;;  %v298_v41 = vsel %vm167_vm2, %v297_v37, -inf  ;;  %v370_v59 = vld [vmem:[%s560_s16] sm:$0x7] }
 0x30b   : > { %299 = vmax.xlane.f32.xlu0 %v298_v41 }
 0x321   : > { %313 = vrot.lane.b32.xlu0 %v491_v42, %s510_s12 }
 0x398   : > { %v300_v43 = vpop.xlane.xlu0 %299 }
 0x399   : > { %v301_v44 = vsub.f32 %v297_v37, %v300_v43 }
 0x39b   : > { %v302_v45 = vmul.f32 1.442695, %v301_v44 }
 0x39c   : > { %v314_v48 = vpop.permute.xlu0 %313 }
 0x39d   : > { %496 = vpow2.f32 %v302_v45  ;;  %v319_v49 = vand.u32 %v314_v48, %v187_v20 }
 0x39f   : > { %471 = vmatpush3.bf16.msra.mxu0 %v319_v49 }
 0x3a7   : > { %v497_v46 = vpop.eup %496 }
 0x3a8   : > { %v304_v47 = vsel %vm167_vm2, %v497_v46, 0.0 }
 0x3a9   : > { %305 = vadd.xlane.f32.xlu1 %v304_v47 }
 0x436   : > { %v306_v50 = vpop.xlane.xlu1 %305 }
 0x437   : > { %498 = vrcp.f32 %v306_v50 }
 0x441   : > { %v499_v51 = vpop.eup %498 }
 0x442   : > { %v308_v52 = vmul.f32 %v499_v51, %v497_v46 }
 0x444   : > { %v309_v53 = vpack.c.bf16 %v308_v52, %v308_v52 }
 0x446   : > { %473 = vmatmul.mubr.msk.bf16.vlgmr.msra.gmra.mrb[4].mxu0 %vm180_vm5, %v309_v53 }
 0x519   : > { %v355_v54 = vpop.f32.mrb[4].mxu0 }
 0x51a   : > { %v443_v55 = vpack.c.bf16 %v355_v54, %v355_v54  ;;  %v474_v56 = vpop.f32.mrb[5].mxu0 }
 0x51b   : > { %v358_v57 = vpop.f32.mrb[6].mxu0 }
 0x51c   : > { %365 = vrot.lane.b32.xlu0 %v443_v55, %s510_s12  ;;  %v475_v58 = vpop.f32.mrb[7].mxu0 }
 0x58e   : > { %v366_v60 = vpop.permute.xlu0 %365 }
 0x58f   : > { %v371_v61 = vsel %vm369_vm10, %v366_v60, %v370_v59 }
 0x590   : > { %372 = vst [vmem:[%s560_s16] sm:$0x7] %v371_v61 }
 0x591 PF: > { %s11_s6 = sadd.s32 1, %s506_s6  }
 0x592   : > { %p8_p4 = scmp.ge.s32.totalorder %s11_s6, 6  }
 0x594   :  { %10 = sbr.rel (!%p8_p4) target bundleno = 1 (0x1), region = 54 }

// kernel: _lambda_.27
= control target key start
LH: loop header
LB: loop body
LE: loop exit
PB: predicated region body
PF: predicated region fallthrough
CT: control target
= control target key end

     0   :  { %s290_s1 = inlined_call_operand.vmem [shape: bf16[128,128], index: 1, kind: input, shape index: {}]   ;;  %s291_s0 = inlined_call_operand.vmem [shape: bf16[20,128], index: 0, kind: input, shape index: {}]   ;;  %s292_s2 = inlined_call_operand.vmem [shape: f32[1,128], index: 2, kind: input, shape index: {}]   ;;  %s293_s3 = inlined_call_operand.vmem [shape: f32[20,128], index: 3, kind: input, shape index: {}, may-alias: {3,4}]   ;;  %s294_s4 = inlined_call_operand.vmem [shape: f32[20,128], index: 4, kind: output, shape index: {}, may-alias: {3,4}]  }
   0x1   :  { %v204_v0 = vld [vmem:[%s290_s1] sm:$0xff]   ;;  %v205_v1 = vld [vmem:[%s290_s1 + $0x8] sm:$0xff]   ;;  %v206_v2 = vld [vmem:[%s290_s1 + $0x10] sm:$0xff]  }
   0x2   :  { %184 = vmatprep.subr.bf16.mxu0 %v204_v0  ;;  %v207_v3 = vld [vmem:[%s290_s1 + $0x18] sm:$0xff]   ;;  %v212_v4 = vld [vmem:[%s291_s0] sm:$0xff]   ;;  %v209_v6 = vld [vmem:[%s290_s1 + $0x28] sm:$0xff]  }
   0x3   :  { %185 = vmatpush3.bf16.msra.mxu0 %v204_v0  ;;  %200 = vmatprep.mubr.bf16.mxu0 %v212_v4  ;;  %v208_v5 = vld [vmem:[%s290_s1 + $0x20] sm:$0xff]   ;;  %v210_v7 = vld [vmem:[%s290_s1 + $0x30] sm:$0xff]   ;;  %v211_v8 = vld [vmem:[%s290_s1 + $0x38] sm:$0xff]  }
   0x4   :  { %186 = vmatprep.subr.bf16.mxu0 %v205_v1  ;;  %v213_v9 = vld [vmem:[%s291_s0 + $0x8] ss:$0 sps:$4 sm:$0x33]   ;;  %v163_v10 = vld [vmem:[%s292_s2] ss:$0 sm:$0xff] }
   0x5   :  { %v152_v12 = vld [vmem:[%s293_s3 + $0x10] sm:$0xf]  ;;  %v150_v15 = vld [vmem:[%s293_s3] sm:$0xff]  ;;  %v151_v20 = vld [vmem:[%s293_s3 + $0x8] sm:$0xff] }
   0x7   :  { %187 = vmatpush3.bf16.msra.mxu0 %v205_v1 }
   0x8   :  { %188 = vmatprep.subr.bf16.mxu0 %v206_v2 }
   0xb   :  { %189 = vmatpush3.bf16.msra.mxu0 %v206_v2 }
   0xc   :  { %190 = vmatprep.subr.bf16.mxu0 %v207_v3 }
   0xf   :  { %191 = vmatpush3.bf16.msra.mxu0 %v207_v3 }
  0x10   :  { %192 = vmatprep.subr.bf16.mxu0 %v208_v5 }
  0x13   :  { %193 = vmatpush3.bf16.msra.mxu0 %v208_v5 }
  0x14   :  { %194 = vmatprep.subr.bf16.mxu0 %v209_v6 }
  0x17   :  { %195 = vmatpush3.bf16.msra.mxu0 %v209_v6 }
  0x18   :  { %196 = vmatprep.subr.bf16.mxu0 %v210_v7 }
  0x1b   :  { %197 = vmatpush3.bf16.msra.mxu0 %v210_v7 }
  0x1c   :  { %198 = vmatprep.subr.bf16.mxu0 %v211_v8 }
  0x1f   :  { %199 = vmatpush3.bf16.msra.mxu0 %v211_v8 }
  0x22   :  { %201 = vmatmul.mubr.bf16.vlgmr.msra.gmra.mrb[0].mxu0 %v213_v9 }
  0xf5   :  { %v202_v11 = vpop.f32.mrb[0].mxu0 }
  0xf6   :  { %v145_v13 = vadd.f32 %v202_v11, %v163_v10  ;;  %v136_v14 = vpop.f32.mrb[1].mxu0 }
  0xf7   :  { %v137_v16 = vadd.f32 %v163_v10, %v136_v14  ;;  %v203_v17 = vpop.f32.mrb[2].mxu0 }
  0xf8   :  { %v155_v18 = vadd.f32 %v152_v12, %v145_v13  ;;  %v139_v19 = vpop.f32.mrb[3].mxu0 }
  0xf9   :  { %v153_v21 = vadd.f32 %v150_v15, %v137_v16  ;;  %v140_v22 = vadd.f32 %v163_v10, %v139_v19 }
  0xfa   :  { %158 = vst [vmem:[%s294_s4 + $0x10] sm:$0xf] %v155_v18 }
  0xfb   :  { %156 = vst [vmem:[%s294_s4] sm:$0xff] %v153_v21  ;;  %v154_v23 = vadd.f32 %v151_v20, %v140_v22 }
  0xfd   :  { %157 = vst [vmem:[%s294_s4 + $0x8] sm:$0xff] %v154_v23 }

// kernel: _lambda_.35
= control target key start
LH: loop header
LB: loop body
LE: loop exit
PB: predicated region body
PF: predicated region fallthrough
CT: control target
= control target key end

     0   :  { %vm15_vm0 = vcmask 1043456   ;;  %s87_s0 = inlined_call_operand.vmem [shape: f32[4,128], index: 0, kind: input, shape index: {}]   ;;  %s88_s1 = inlined_call_operand.vmem [shape: f32[1,128], index: 1, kind: input, shape index: {}]   ;;  %s89_s2 = inlined_call_operand.vmem [shape: f32[1,128], index: 2, kind: input, shape index: {}]   ;;  %s90_s3 = inlined_call_operand.vmem [shape: f32[4,128], index: 3, kind: output, shape index: {}]  }
   0x1   :  { %v14_v0 = vld [vmem:[%s87_s0] sm:$0xf] }
   0x2   :  { %v16_v1 = vsel %vm15_vm0, %v14_v0, 0.0  ;;  %v51_v11 = vld [vmem:[%s88_s1] ss:$0 sm:$0xff] }
   0x3   :  { %17 = vadd.xlane.f32.xlu0 %v16_v1  ;;  %v52_v13 = vld [vmem:[%s89_s2] ss:$0 sm:$0xff] }
  0x90   :  { %v18_v2 = vpop.xlane.xlu0 %17 }
  0x91   :  { %v20_v3 = vmul.f32 0.0078125, %v18_v2 }
  0x93   :  { %v21_v4 = vsub.f32 %v14_v0, %v20_v3 }
  0x95   :  { %v22_v5 = vmul.f32 %v21_v4, %v21_v4 }
  0x97   :  { %v23_v6 = vsel %vm15_vm0, %v22_v5, 0.0 }
  0x98   :  { %24 = vadd.xlane.f32.xlu0 %v23_v6 }
 0x125   :  { %v25_v7 = vpop.xlane.xlu0 %24 }
 0x126   :  { %v26_v8 = vmul.f32 0.0078125, %v25_v7 }
 0x128   :  { %v27_v9 = vadd.f32 1e-05, %v26_v8 }
 0x12a   :  { %53 = vrsqrt.f32 %v27_v9 }
 0x134   :  { %v54_v10 = vpop.eup %53 }
 0x135   :  { %v29_v12 = vmul.f32 %v54_v10, %v21_v4 }
 0x137   :  { %v37_v14 = vmul.f32 %v51_v11, %v29_v12 }
 0x139   :  { %v45_v15 = vadd.f32 %v52_v13, %v37_v14 }
 0x13b   :  { %46 = vst [vmem:[%s90_s3] sm:$0xf] %v45_v15 }

// kernel: _lambda_.29
= control target key start
LH: loop header
LB: loop body
LE: loop exit
PB: predicated region body
PF: predicated region fallthrough
CT: control target
= control target key end

     0   :  { %s729_s1 = inlined_call_operand.vmem [shape: bf16[512,128], index: 1, kind: input, shape index: {}]   ;;  %s730_s0 = inlined_call_operand.vmem [shape: bf16[20,512], index: 0, kind: input, shape index: {}]   ;;  %s731_s2 = inlined_call_operand.vmem [shape: f32[1,128], index: 2, kind: input, shape index: {}]   ;;  %s732_s3 = inlined_call_operand.vmem [shape: f32[20,128], index: 3, kind: input, shape index: {}, may-alias: {3,4}]   ;;  %s733_s4 = inlined_call_operand.vmem [shape: f32[20,128], index: 4, kind: output, shape index: {}, may-alias: {3,4}]  }
   0x1   :  { %v527_v0 = vld [vmem:[%s729_s1 + $0x40] sm:$0xff]   ;;  %v531_v4 = vld [vmem:[%s729_s1 + $0x48] sm:$0xff]   ;;  %v535_v8 = vld [vmem:[%s729_s1 + $0x50] sm:$0xff]  }
   0x2   :  { %v528_v1 = vld [vmem:[%s729_s1 + $0xc0] sm:$0xff]   ;;  %471 = vmatprep.subr.bf16.mxu0 %v527_v0  ;;  %v532_v5 = vld [vmem:[%s729_s1 + $0xc8] sm:$0xff]   ;;  %v536_v9 = vld [vmem:[%s729_s1 + $0xd0] sm:$0xff]  }
   0x3   :  { %v529_v2 = vld [vmem:[%s729_s1] sm:$0xff]   ;;  %499 = vmatprep.subr.bf16.mxu1 %v528_v1  ;;  %v533_v6 = vld [vmem:[%s729_s1 + $0x8] sm:$0xff]   ;;  %v537_v10 = vld [vmem:[%s729_s1 + $0x10] sm:$0xff]  }
   0x4   :  { %v530_v3 = vld [vmem:[%s729_s1 + $0x80] sm:$0xff]   ;;  %472 = vmatpush3.bf16.msra.mxu0 %v529_v2  ;;  %v534_v7 = vld [vmem:[%s729_s1 + $0x88] sm:$0xff]   ;;  %v538_v11 = vld [vmem:[%s729_s1 + $0x90] sm:$0xff]  }
   0x5   :  { %500 = vmatpush3.bf16.msra.mxu1 %v530_v3  ;;  %473 = vmatprep.subr.bf16.mxu0 %v531_v4  ;;  %v539_v12 = vld [vmem:[%s729_s1 + $0x58] sm:$0xff]   ;;  %v543_v16 = vld [vmem:[%s729_s1 + $0x60] sm:$0xff]   ;;  %v547_v20 = vld [vmem:[%s729_s1 + $0x68] sm:$0xff]  }
   0x6   :  { %501 = vmatprep.subr.bf16.mxu1 %v532_v5  ;;  %v540_v13 = vld [vmem:[%s729_s1 + $0xd8] sm:$0xff]   ;;  %v544_v17 = vld [vmem:[%s729_s1 + $0xe0] sm:$0xff]   ;;  %v548_v21 = vld [vmem:[%s729_s1 + $0xe8] sm:$0xff]  }
   0x7   :  { %v541_v14 = vld [vmem:[%s729_s1 + $0x18] sm:$0xff]   ;;  %v545_v18 = vld [vmem:[%s729_s1 + $0x20] sm:$0xff]   ;;  %v549_v22 = vld [vmem:[%s729_s1 + $0x28] sm:$0xff]  }
   0x8   :  { %474 = vmatpush3.bf16.msra.mxu0 %v533_v6  ;;  %v542_v15 = vld [vmem:[%s729_s1 + $0x98] sm:$0xff]   ;;  %v546_v19 = vld [vmem:[%s729_s1 + $0xa0] sm:$0xff]   ;;  %v550_v23 = vld [vmem:[%s729_s1 + $0xa8] sm:$0xff]  }
   0x9   :  { %502 = vmatpush3.bf16.msra.mxu1 %v534_v7  ;;  %475 = vmatprep.subr.bf16.mxu0 %v535_v8  ;;  %v551_v24 = vld [vmem:[%s729_s1 + $0x70] sm:$0xff]   ;;  %v555_v28 = vld [vmem:[%s729_s1 + $0x78] sm:$0xff]   ;;  %v22_v36 = vld [vmem:[%s730_s0 + $0x20] sm:$0x33] }
   0xa   :  { %503 = vmatprep.subr.bf16.mxu1 %v536_v9  ;;  %v552_v25 = vld [vmem:[%s729_s1 + $0xf0] sm:$0xff]   ;;  %v556_v29 = vld [vmem:[%s729_s1 + $0xf8] sm:$0xff]   ;;  %v436_v37 = vcombine.high %v22_v36, %v22_v36  ;;  %v23_v38 = vld [vmem:[%s730_s0 + $0x28] sm:$0x33]  ;;  %v435_v40 = vcombine.low %v22_v36, %v22_v36 }
   0xb   :  { %v553_v26 = vld [vmem:[%s729_s1 + $0x30] sm:$0xff]   ;;  %v557_v30 = vld [vmem:[%s729_s1 + $0x38] sm:$0xff]   ;;  %v438_v39 = vcombine.high %v23_v38, %v23_v38  ;;  %v437_v41 = vcombine.low %v23_v38, %v23_v38  ;;  %v430_v44 = vld [vmem:[%s731_s2] ss:$0 sm:$0xff] }
   0xc   :  { %476 = vmatpush3.bf16.msra.mxu0 %v537_v10  ;;  %v554_v27 = vld [vmem:[%s729_s1 + $0xb0] sm:$0xff]   ;;  %v558_v31 = vld [vmem:[%s729_s1 + $0xb8] sm:$0xff]   ;;  %v417_v55 = vld [vmem:[%s732_s3] sm:$0xff] }
   0xd   :  { %504 = vmatpush3.bf16.msra.mxu1 %v538_v11  ;;  %477 = vmatprep.subr.bf16.mxu0 %v539_v12  ;;  %v559_v32 = vld [vmem:[%s730_s0] ss:$16 sps:$4 sm:$0xff]   ;;  %v561_v33 = vld [vmem:[%s730_s0 + $0x4] ss:$16 sps:$4 sm:$0xff]   ;;  %v562_v34 = vld [vmem:[%s730_s0 + $0x8] ss:$16 sps:$4 sm:$0xff]  }
   0xe   :  { %505 = vmatprep.subr.bf16.mxu1 %v540_v13  ;;  %v564_v35 = vld [vmem:[%s730_s0 + $0xc] ss:$16 sps:$4 sm:$0xff]   ;;  %353 = vmatprep.mubr.bf16.mxu0 %v561_v33 }
   0xf   :  { %401 = vmatprep.mubr.bf16.mxu1 %v564_v35  ;;  %v418_v59 = vld [vmem:[%s732_s3 + $0x8] sm:$0xff] }
  0x10   :  { %478 = vmatpush3.bf16.msra.mxu0 %v541_v14 }
  0x11   :  { %506 = vmatpush3.bf16.msra.mxu1 %v542_v15  ;;  %479 = vmatprep.subr.bf16.mxu0 %v543_v16 }
  0x12   :  { %507 = vmatprep.subr.bf16.mxu1 %v544_v17 }
  0x14   :  { %480 = vmatpush3.bf16.msra.mxu0 %v545_v18 }
  0x15   :  { %508 = vmatpush3.bf16.msra.mxu1 %v546_v19  ;;  %481 = vmatprep.subr.bf16.mxu0 %v547_v20 }
  0x16   :  { %509 = vmatprep.subr.bf16.mxu1 %v548_v21 }
  0x18   :  { %482 = vmatpush3.bf16.msra.mxu0 %v549_v22 }
  0x19   :  { %510 = vmatpush3.bf16.msra.mxu1 %v550_v23  ;;  %483 = vmatprep.subr.bf16.mxu0 %v551_v24 }
  0x1a   :  { %511 = vmatprep.subr.bf16.mxu1 %v552_v25 }
  0x1c   :  { %484 = vmatpush3.bf16.msra.mxu0 %v553_v26 }
  0x1d   :  { %512 = vmatpush3.bf16.msra.mxu1 %v554_v27  ;;  %485 = vmatprep.subr.bf16.mxu0 %v555_v28 }
  0x1e   :  { %513 = vmatprep.subr.bf16.mxu1 %v556_v29 }
  0x20   :  { %486 = vmatpush3.bf16.msra.mxu0 %v557_v30 }
  0x21   :  { %514 = vmatpush3.bf16.msra.mxu1 %v558_v31 }
  0x23   :  { %354 = vmatmul.mubr.bf16.vlgmr.msra.gmra.mrb[0].mxu0 %v559_v32 }
  0x24   :  { %402 = vmatmul.mubr.bf16.vlgmr.msra.gmra.mrb[0].mxu1 %v562_v34  ;;  %361 = vmatprep.mubr.bf16.mxu0 %v436_v37 }
  0x25   :  { %409 = vmatprep.mubr.bf16.mxu1 %v438_v39 }
  0x2b   :  { %362 = vmatmul.mubr.bf16.gmra.mrb[4].mxu0 %v435_v40 }
  0x2c   :  { %410 = vmatmul.mubr.bf16.gmra.mrb[4].mxu1 %v437_v41 }
  0xf6   :  { %v487_v42 = vpop.f32.mrb[0].mxu0 }
  0xf7   :  { %v515_v43 = vpop.f32.mrb[0].mxu1  ;;  %v488_v45 = vpop.f32.mrb[1].mxu0 }
  0xf8   :  { %v489_v46 = vadd.f32 %v488_v45, %v487_v42  ;;  %v516_v47 = vpop.f32.mrb[1].mxu1  ;;  %v490_v48 = vpop.f32.mrb[2].mxu0 }
  0xf9   :  { %v517_v49 = vadd.f32 %v516_v47, %v515_v43  ;;  %v518_v50 = vpop.f32.mrb[2].mxu1  ;;  %v491_v51 = vpop.f32.mrb[3].mxu0 }
  0xfa   :  { %v356_v52 = vadd.f32 %v489_v46, %v430_v44  ;;  %v492_v53 = vadd.f32 %v491_v51, %v490_v48  ;;  %v519_v54 = vpop.f32.mrb[3].mxu1 }
  0xfb   :  { %v520_v56 = vadd.f32 %v519_v54, %v518_v50 }
  0xfc   :  { %v404_v57 = vadd.f32 %v517_v49, %v356_v52  ;;  %v359_v58 = vadd.f32 %v492_v53, %v430_v44 }
  0xfe   :  { %v420_v60 = vadd.f32 %v417_v55, %v404_v57  ;;  %v407_v61 = vadd.f32 %v520_v56, %v359_v58  ;;  %v493_v62 = vpop.f32.mrb[4].mxu0 }
  0xff   :  { %v521_v63 = vpop.f32.mrb[4].mxu1  ;;  %v494_v0 = vpop.f32.mrb[5].mxu0 }
 0x100   :  { %423 = vst [vmem:[%s733_s4] sm:$0xff] %v420_v60  ;;  %v421_v1 = vadd.f32 %v418_v59, %v407_v61  ;;  %v495_v2 = vadd.f32 %v494_v0, %v493_v62  ;;  %v522_v3 = vpop.f32.mrb[5].mxu1  ;;  %v496_v4 = vpop.f32.mrb[6].mxu0 }
 0x101   :  { %v523_v5 = vadd.f32 %v522_v3, %v521_v63  ;;  %v524_v6 = vpop.f32.mrb[6].mxu1  ;;  %v497_v7 = vpop.f32.mrb[7].mxu0 }
 0x102   :  { %424 = vst [vmem:[%s733_s4 + $0x8] sm:$0xff] %v421_v1  ;;  %v364_v8 = vadd.f32 %v495_v2, %v430_v44  ;;  %v525_v9 = vpop.f32.mrb[7].mxu1 }
 0x104   :  { %v412_v11 = vadd.f32 %v523_v5, %v364_v8 }
 0x109   :  { %v419_v10 = vld [vmem:[%s732_s3 + $0x10] sm:$0xf] }
 0x10a   :  { %v422_v12 = vadd.f32 %v419_v10, %v412_v11 }
 0x10c   :  { %425 = vst [vmem:[%s733_s4 + $0x10] sm:$0xf] %v422_v12 }

// kernel: _lambda_.28
= control target key start
LH: loop header
LB: loop body
LE: loop exit
PB: predicated region body
PF: predicated region fallthrough
CT: control target
= control target key end

     0   :  { %vm28_vm0 = vcmask 1043456   ;;  %v911_v43 = vmov 0   ;;  %s1308_s0 = inlined_call_operand.vmem [shape: f32[20,128], index: 0, kind: input, shape index: {}]   ;;  %s1309_s3 = inlined_call_operand.vmem [shape: bf16[128,512], index: 3, kind: input, shape index: {}]   ;;  %s1310_s1 = inlined_call_operand.vmem [shape: f32[1,128], index: 1, kind: input, shape index: {}]   ;;  %s1311_s2 = inlined_call_operand.vmem [shape: f32[1,128], index: 2, kind: input, shape index: {}]   ;;  %s1312_s4 = inlined_call_operand.vmem [shape: f32[1,512], index: 4, kind: input, shape index: {}]   ;;  %s1313_s5 = inlined_call_operand.vmem [shape: bf16[20,512], index: 5, kind: output, shape index: {}]  }
   0x1   :  { %v21_v0 = vld [vmem:[%s1308_s0] sm:$0xff]  ;;  %v23_v1 = vld [vmem:[%s1308_s0 + $0x10] sm:$0xf]  ;;  %v22_v3 = vld [vmem:[%s1308_s0 + $0x8] sm:$0xff]  ;;  %329 = vmatprep.mubr.bf16.mxu0 %v911_v43  ;;  %380 = vmatprep.mubr.bf16.mxu1 %v911_v43 }
   0x2   :  { %24 = vadd.xlane.f32.xlu0 %v21_v0  ;;  %v29_v2 = vsel %vm28_vm0, %v23_v1, 0.0  ;;  %v809_v4 = vld [vmem:[%s1309_s3 + $0x4] ss:$16 sps:$4 sm:$0xff]   ;;  %v811_v5 = vld [vmem:[%s1309_s3 + $0xc] ss:$16 sps:$4 sm:$0xff]  }
   0x3   :  { %30 = vadd.xlane.f32.xlu1 %v29_v2  ;;  %297 = vmatprep.subr.bf16.mxu0 %v809_v4  ;;  %v813_v6 = vld [vmem:[%s1309_s3] ss:$16 sps:$4 sm:$0xff]   ;;  %v814_v7 = vld [vmem:[%s1309_s3 + $0x8] ss:$16 sps:$4 sm:$0xff]   ;;  %v815_v8 = vld [vmem:[%s1309_s3 + $0x24] ss:$16 sps:$4 sm:$0xff]  }
   0x4   :  { %348 = vmatprep.subr.bf16.mxu1 %v811_v5  ;;  %298 = vmatpush1.bf16.msra.mxu0 %v813_v6  ;;  %v817_v9 = vld [vmem:[%s1309_s3 + $0x2c] ss:$16 sps:$4 sm:$0xff]   ;;  %v819_v23 = vld [vmem:[%s1309_s3 + $0x20] ss:$16 sps:$4 sm:$0xff]   ;;  %v820_v24 = vld [vmem:[%s1309_s3 + $0x28] ss:$16 sps:$4 sm:$0xff]  }
   0x5   :  { %349 = vmatpush1.bf16.msra.mxu1 %v814_v7  ;;  %299 = vmatprep.subr.bf16.mxu0 %v815_v8  ;;  %v821_v25 = vld [vmem:[%s1309_s3 + $0x44] ss:$16 sps:$4 sm:$0xff]   ;;  %v823_v26 = vld [vmem:[%s1309_s3 + $0x4c] ss:$16 sps:$4 sm:$0xff]   ;;  %v825_v27 = vld [vmem:[%s1309_s3 + $0x40] ss:$16 sps:$4 sm:$0xff]  }
   0x6   :  { %26 = vadd.xlane.f32.xlu0 %v22_v3  ;;  %350 = vmatprep.subr.bf16.mxu1 %v817_v9  ;;  %v826_v28 = vld [vmem:[%s1309_s3 + $0x48] ss:$16 sps:$4 sm:$0xff]   ;;  %v827_v29 = vld [vmem:[%s1309_s3 + $0x64] ss:$16 sps:$4 sm:$0xff]   ;;  %v829_v30 = vld [vmem:[%s1309_s3 + $0x6c] ss:$16 sps:$4 sm:$0xff]  }
   0x7   :  { %v831_v31 = vld [vmem:[%s1309_s3 + $0x60] ss:$16 sps:$4 sm:$0xff]   ;;  %v832_v32 = vld [vmem:[%s1309_s3 + $0x68] ss:$16 sps:$4 sm:$0xff]   ;;  %v833_v33 = vld [vmem:[%s1309_s3 + $0x84] ss:$16 sps:$4 sm:$0xff]  }
   0x8   :  { %300 = vmatpush1.bf16.msra.mxu0 %v819_v23  ;;  %v835_v34 = vld [vmem:[%s1309_s3 + $0x8c] ss:$16 sps:$4 sm:$0xff]   ;;  %v837_v35 = vld [vmem:[%s1309_s3 + $0x80] ss:$16 sps:$4 sm:$0xff]   ;;  %v838_v36 = vld [vmem:[%s1309_s3 + $0x88] ss:$16 sps:$4 sm:$0xff]  }
   0x9   :  { %351 = vmatpush1.bf16.msra.mxu1 %v820_v24  ;;  %301 = vmatprep.subr.bf16.mxu0 %v821_v25  ;;  %v839_v37 = vld [vmem:[%s1309_s3 + $0xa4] ss:$16 sps:$4 sm:$0xff]   ;;  %v841_v38 = vld [vmem:[%s1309_s3 + $0xac] ss:$16 sps:$4 sm:$0xff]   ;;  %v843_v39 = vld [vmem:[%s1309_s3 + $0xa0] ss:$16 sps:$4 sm:$0xff]  }
   0xa   :  { %352 = vmatprep.subr.bf16.mxu1 %v823_v26  ;;  %v844_v40 = vld [vmem:[%s1309_s3 + $0xa8] ss:$16 sps:$4 sm:$0xff]   ;;  %v845_v41 = vld [vmem:[%s1309_s3 + $0xc4] ss:$16 sps:$4 sm:$0xff]   ;;  %v847_v42 = vld [vmem:[%s1309_s3 + $0xcc] ss:$16 sps:$4 sm:$0xff]  }
   0xb   :  { %v849_v44 = vld [vmem:[%s1309_s3 + $0xc0] ss:$16 sps:$4 sm:$0xff]   ;;  %v850_v45 = vld [vmem:[%s1309_s3 + $0xc8] ss:$16 sps:$4 sm:$0xff]   ;;  %v851_v46 = vld [vmem:[%s1309_s3 + $0xe4] ss:$16 sps:$4 sm:$0xff]  }
   0xc   :  { %302 = vmatpush1.bf16.msra.mxu0 %v825_v27  ;;  %v853_v47 = vld [vmem:[%s1309_s3 + $0xec] ss:$16 sps:$4 sm:$0xff]   ;;  %v855_v48 = vld [vmem:[%s1309_s3 + $0xe0] ss:$16 sps:$4 sm:$0xff]   ;;  %v856_v49 = vld [vmem:[%s1309_s3 + $0xe8] ss:$16 sps:$4 sm:$0xff]  }
   0xd   :  { %353 = vmatpush1.bf16.msra.mxu1 %v826_v28  ;;  %303 = vmatprep.subr.bf16.mxu0 %v827_v29  ;;  %v761_v61 = vld [vmem:[%s1310_s1] ss:$0 sm:$0xff] }
   0xe   :  { %354 = vmatprep.subr.bf16.mxu1 %v829_v30  ;;  %v762_v2 = vld [vmem:[%s1311_s2] ss:$0 sm:$0xff] }
  0x10   :  { %304 = vmatpush1.bf16.msra.mxu0 %v831_v31 }
  0x11   :  { %355 = vmatpush1.bf16.msra.mxu1 %v832_v32  ;;  %305 = vmatprep.subr.bf16.mxu0 %v833_v33 }
  0x12   :  { %356 = vmatprep.subr.bf16.mxu1 %v835_v34 }
  0x14   :  { %306 = vmatpush1.bf16.msra.mxu0 %v837_v35 }
  0x15   :  { %357 = vmatpush1.bf16.msra.mxu1 %v838_v36  ;;  %307 = vmatprep.subr.bf16.mxu0 %v839_v37 }
  0x16   :  { %358 = vmatprep.subr.bf16.mxu1 %v841_v38 }
  0x18   :  { %308 = vmatpush1.bf16.msra.mxu0 %v843_v39 }
  0x19   :  { %359 = vmatpush1.bf16.msra.mxu1 %v844_v40  ;;  %309 = vmatprep.subr.bf16.mxu0 %v845_v41 }
  0x1a   :  { %360 = vmatprep.subr.bf16.mxu1 %v847_v42 }
  0x1c   :  { %310 = vmatpush1.bf16.msra.mxu0 %v849_v44 }
  0x1d   :  { %361 = vmatpush1.bf16.msra.mxu1 %v850_v45  ;;  %311 = vmatprep.subr.bf16.mxu0 %v851_v46 }
  0x1e   :  { %362 = vmatprep.subr.bf16.mxu1 %v853_v47 }
  0x20   :  { %312 = vmatpush1.bf16.msra.mxu0 %v855_v48 }
  0x21   :  { %363 = vmatpush1.bf16.msra.mxu1 %v856_v49 }
  0x8f   :  { %v25_v10 = vpop.xlane.xlu0 %24 }
  0x90   :  { %v33_v11 = vmul.f32 0.0078125, %v25_v10  ;;  %v31_v12 = vpop.xlane.xlu1 %30 }
  0x91   :  { %v35_v13 = vmul.f32 0.0078125, %v31_v12 }
  0x92   :  { %v971_v14 = vsub.f32 %v21_v0, %v33_v11  ;;  %v117_v11 = vlaneseq }
  0x93   :  { %v973_v15 = vsub.f32 %v23_v1, %v35_v13  ;;  %v27_v16 = vpop.xlane.xlu0 %26 }
  0x94   :  { %v34_v17 = vmul.f32 0.0078125, %v27_v16  ;;  %v39_v18 = vmul.f32 %v971_v14, %v971_v14  ;;  %v118_v12 = vshrl.u32 %v117_v11, 7 }
  0x95   :  { %v41_v19 = vmul.f32 %v973_v15, %v973_v15 }
  0x96   :  { %v979_v20 = vsub.f32 %v22_v3, %v34_v17  ;;  %42 = vadd.xlane.f32.xlu1 %v39_v18  ;;  %v119_v13 = vsub.s32 0, %v118_v12  ;;  %v123_v16 = vsub.s32 1, %v118_v12  ;;  %v131_v17 = vsub.s32 3, %v118_v12 }
  0x97   :  { %v46_v21 = vsel %vm28_vm0, %v41_v19, 0.0 }
  0x98   :  { %v40_v22 = vmul.f32 %v979_v20, %v979_v20 }
  0x9a   :  { %47 = vadd.xlane.f32.xlu1 %v46_v21  ;;  %44 = vadd.xlane.f32.xlu0 %v40_v22 }
 0x123   :  { %v43_v50 = vpop.xlane.xlu1 %42 }
 0x124   :  { %v49_v51 = vmul.f32 0.0078125, %v43_v50 }
 0x126   :  { %v52_v52 = vadd.f32 1e-05, %v49_v51 }
 0x127   :  { %v48_v53 = vpop.xlane.xlu1 %47  ;;  %v45_v54 = vpop.xlane.xlu0 %44 }
 0x128   :  { %857 = vrsqrt.f32 %v52_v52  ;;  %v51_v55 = vmul.f32 0.0078125, %v48_v53  ;;  %v50_v56 = vmul.f32 0.0078125, %v45_v54 }
 0x12a   :  { %v54_v57 = vadd.f32 1e-05, %v51_v55  ;;  %v53_v58 = vadd.f32 1e-05, %v50_v56 }
 0x12c   :  { %859 = vrsqrt.f32 %v54_v57 }
 0x12d   :  { %861 = vrsqrt.f32 %v53_v58 }
 0x132   :  { %v858_v59 = vpop.eup %857 }
 0x133   :  { %v58_v60 = vmul.f32 %v858_v59, %v971_v14  ;;  %v127_v14 = vsub.s32 2, %v118_v12 }
 0x135   :  { %v68_v1 = vmul.f32 %v761_v61, %v58_v60 }
 0x136   :  { %v860_v62 = vpop.eup %859 }
 0x137   :  { %v862_v63 = vpop.eup %861  ;;  %v60_v4 = vmul.f32 %v860_v62, %v973_v15  ;;  %v78_v5 = vadd.f32 %v762_v2, %v68_v1  ;;  %v115_v15 = vld [vmem:[%s1312_s4] sm:$0xf] }
 0x138   :  { %v59_v0 = vmul.f32 %v862_v63, %v979_v20  ;;  %v1074_v18 = vrot.slane %v115_v15, %v119_v13  ;;  %v1076_v19 = vrot.slane %v115_v15, %v127_v14  ;;  %v1078_v20 = vrot.slane %v115_v15, %v123_v16 }
 0x139   :  { %v70_v8 = vmul.f32 %v761_v61, %v60_v4  ;;  %v1080_v21 = vrot.slane %v115_v15, %v131_v17 }
 0x13a   :  { %v69_v3 = vmul.f32 %v761_v61, %v59_v0 }
 0x13b   :  { %v80_v9 = vadd.f32 %v762_v2, %v70_v8 }
 0x13c   :  { %v79_v6 = vadd.f32 %v762_v2, %v69_v3 }
 0x13d   :  { %v82_v10 = vpack.c.bf16 %v80_v9, %v80_v9 }
 0x13e   :  { %v81_v7 = vpack.c.bf16 %v79_v6, %v78_v5 }
 0x140   :  { %330 = vmatmul.mubr.bf16.vlgmr.msra.gmra.mrb[0].mxu0 %v81_v7  ;;  %381 = vmatmul.mubr.bf16.vlgmr.msra.gmra.mrb[0].mxu1 %v81_v7  ;;  %v912_v7 = vmov -1.0  }
 0x141   :  { %339 = vmatprep.mubr.bf16.mxu0 %v911_v43  ;;  %390 = vmatprep.mubr.bf16.mxu1 %v911_v43 }
 0x148   :  { %340 = vmatmul.mubr.bf16.gmra.mrb[4].mxu0 %v82_v10  ;;  %391 = vmatmul.mubr.bf16.gmra.mrb[4].mxu1 %v82_v10 }
 0x213   :  { %v331_v22 = vpop.f32.mrb[0].mxu0  ;;  %v382_v23 = vpop.f32.mrb[0].mxu1 }
 0x214   :  { %v332_v24 = vadd.f32 %v331_v22, %v1074_v18  ;;  %v383_v25 = vadd.f32 %v382_v23, %v1076_v19  ;;  %v333_v26 = vpop.f32.mrb[1].mxu0  ;;  %v384_v27 = vpop.f32.mrb[1].mxu1 }
 0x215   :  { %v334_v28 = vadd.f32 %v333_v26, %v1078_v20  ;;  %v1086_v29 = vadd.f32 %v384_v27, %v1080_v21  ;;  %v335_v30 = vpop.f32.mrb[2].mxu0  ;;  %v386_v31 = vpop.f32.mrb[2].mxu1 }
 0x216   :  { %v411_v32 = vmul.f32 0.70710677, %v332_v24  ;;  %v413_v33 = vmul.f32 0.70710677, %v383_v25  ;;  %v337_v39 = vpop.f32.mrb[3].mxu0  ;;  %v388_v44 = vpop.f32.mrb[3].mxu1  ;;  %v1104_v55 = vadd.f32 %v335_v30, %v1074_v18  ;;  %v1112_v63 = vadd.f32 %v386_v31, %v1076_v19 }
 0x217   :  { %v1088_v34 = vmul.f32 0.70710677, %v334_v28  ;;  %v1092_v38 = vmul.f32 0.70710677, %v1086_v29  ;;  %v1106_v58 = vmul.f32 0.5, %v332_v24  ;;  %v1114_v1 = vmul.f32 0.5, %v383_v25 }
 0x218   :  { %v447_v35 = vand.u32 2147483647, %v411_v32  ;;  %v449_v36 = vand.u32 2147483647, %v413_v33  ;;  %vm423_vm1 = vcmp.ge.f32.partialorder %v411_v32, 0.0  ;;  %vm425_vm2 = vcmp.ge.f32.partialorder %v413_v33, 0.0 }
 0x219   :  { %v448_v37 = vand.u32 2147483647, %v1088_v34  ;;  %v450_v50 = vand.u32 2147483647, %v1092_v38  ;;  %v1109_v62 = vmul.f32 0.70710677, %v1104_v55  ;;  %v1117_v3 = vadd.f32 %v337_v39, %v1078_v20 }
 0x21a   :  { %v459_v40 = vmul.f32 0.3275911, %v447_v35  ;;  %v603_v41 = vsub.f32 0.0, %v447_v35  ;;  %v461_v42 = vmul.f32 0.3275911, %v449_v36  ;;  %v605_v49 = vsub.f32 0.0, %v449_v36 }
 0x21b   :  { %v460_v43 = vmul.f32 0.3275911, %v448_v37  ;;  %v1094_v47 = vpop.f32.mrb[4].mxu0  ;;  %v1096_v48 = vpop.f32.mrb[4].mxu1  ;;  %v462_v59 = vmul.f32 0.3275911, %v450_v50  ;;  %v1138_v24 = vadd.f32 %v388_v44, %v1080_v21 }
 0x21c   :  { %v471_v45 = vadd.f32 1.0, %v459_v40  ;;  %v473_v46 = vadd.f32 1.0, %v461_v42  ;;  %v1099_v51 = vpop.f32.mrb[5].mxu0  ;;  %v1101_v52 = vpop.f32.mrb[5].mxu1  ;;  %v615_v53 = vmul.f32 %v603_v41, %v447_v35  ;;  %v604_v61 = vsub.f32 0.0, %v448_v37 }
 0x21d   :  { %v472_v54 = vadd.f32 1.0, %v460_v43  ;;  %v345_v56 = vpop.f32.mrb[6].mxu0  ;;  %v396_v57 = vpop.f32.mrb[6].mxu1  ;;  %v474_v2 = vadd.f32 1.0, %v462_v59  ;;  %v617_v5 = vmul.f32 %v605_v49, %v449_v36  ;;  %v451_v6 = vand.u32 2147483647, %v1109_v62 }
 0x21e   :  { %863 = vrcp.f32 %v471_v45  ;;  %v346_v60 = vpop.f32.mrb[7].mxu0  ;;  %v397_v0 = vpop.f32.mrb[7].mxu1  ;;  %v627_v4 = vmul.f32 1.442695, %v615_v53  ;;  %v1121_v8 = vsel %vm423_vm1, 1.0, %v912_v7  ;;  %v1123_v9 = vmul.f32 0.5, %v334_v28 }
 0x21f   :  { %865 = vrcp.f32 %v473_v46  ;;  %v606_v10 = vsub.f32 0.0, %v450_v50  ;;  %v1126_v11 = vmul.f32 0.70710677, %v1112_v63  ;;  %v616_v12 = vmul.f32 %v604_v61, %v448_v37 }
 0x220   :  { %867 = vrcp.f32 %v472_v54  ;;  %v463_v13 = vmul.f32 0.3275911, %v451_v6  ;;  %v607_v14 = vsub.f32 0.0, %v451_v6  ;;  %v1130_v15 = vsel %vm425_vm2, 1.0, %v912_v7 }
 0x221   :  { %869 = vrcp.f32 %v474_v2  ;;  %vm424_vm3 = vcmp.ge.f32.partialorder %v1088_v34, 0.0  ;;  %v453_v16 = vand.u32 2147483647, %v1126_v11  ;;  %v1135_v17 = vmul.f32 0.70710677, %v1117_v3 }
 0x222   :  { %871 = vpow2.f32 %v627_v4  ;;  %v631_v22 = vmul.f32 1.442695, %v617_v5  ;;  %v475_v23 = vadd.f32 1.0, %v463_v13  ;;  %v618_v25 = vmul.f32 %v606_v10, %v450_v50 }
 0x223   :  { %v465_v26 = vmul.f32 0.3275911, %v453_v16  ;;  %v609_v27 = vsub.f32 0.0, %v453_v16  ;;  %v452_v28 = vand.u32 2147483647, %v1135_v17  ;;  %v1144_v31 = vsel %vm424_vm3, 1.0, %v912_v7 }
 0x224   :  { %v629_v32 = vmul.f32 1.442695, %v616_v12  ;;  %873 = vrcp.f32 %v475_v23  ;;  %v619_v33 = vmul.f32 %v607_v14, %v451_v6  ;;  %v1151_v42 = vmul.f32 0.70710677, %v1138_v24 }
 0x225   :  { %v477_v36 = vadd.f32 1.0, %v465_v26  ;;  %v621_v37 = vmul.f32 %v609_v27, %v453_v16  ;;  %v464_v39 = vmul.f32 0.3275911, %v452_v28  ;;  %875 = vpow2.f32 %v631_v22 }
 0x226   :  { %v608_v41 = vsub.f32 0.0, %v452_v28  ;;  %v633_v44 = vmul.f32 1.442695, %v618_v25  ;;  %vm426_vm4 = vcmp.ge.f32.partialorder %v1092_v38, 0.0  ;;  %v454_v50 = vand.u32 2147483647, %v1151_v42 }
 0x227   :  { %877 = vrcp.f32 %v477_v36  ;;  %v476_v45 = vadd.f32 1.0, %v464_v39  ;;  %v635_v56 = vmul.f32 1.442695, %v619_v33  ;;  %v639_v57 = vmul.f32 1.442695, %v621_v37 }
 0x228   :  { %v1141_v30 = vpop.eup %863  ;;  %879 = vpow2.f32 %v629_v32  ;;  %v620_v61 = vmul.f32 %v608_v41, %v452_v28  ;;  %v466_v0 = vmul.f32 0.3275911, %v454_v50  ;;  %v610_v13 = vsub.f32 0.0, %v454_v50 }
 0x229   :  { %v1146_v34 = vpop.eup %865  ;;  %v495_v35 = vmul.f32 1.0614054, %v1141_v30  ;;  %881 = vrcp.f32 %v476_v45  ;;  %v1165_v14 = vadd.f32 %v1094_v47, %v1074_v18  ;;  %v1177_v37 = vsel %vm426_vm4, 1.0, %v912_v7 }
 0x22a   :  { %v497_v40 = vmul.f32 1.0614054, %v1146_v34  ;;  %v1153_v46 = vpop.eup %867  ;;  %883 = vpow2.f32 %v633_v44  ;;  %v478_v12 = vadd.f32 1.0, %v466_v0  ;;  %v637_v27 = vmul.f32 1.442695, %v620_v61 }
 0x22b   :  { %v507_v43 = vadd.f32 -1.4531521, %v495_v35  ;;  %v496_v54 = vmul.f32 1.0614054, %v1153_v46  ;;  %v1159_v59 = vpop.eup %869  ;;  %885 = vpow2.f32 %v635_v56  ;;  %v622_v28 = vmul.f32 %v610_v13, %v454_v50 }
 0x22c   :  { %v509_v49 = vadd.f32 -1.4531521, %v497_v40  ;;  %v498_v5 = vmul.f32 1.0614054, %v1159_v59  ;;  %v872_v6 = vpop.eup %871  ;;  %887 = vrcp.f32 %v478_v12  ;;  %v1180_v39 = vmul.f32 0.70710677, %v1165_v14 }
 0x22d   :  { %v519_v53 = vmul.f32 %v1141_v30, %v507_v43  ;;  %v508_v4 = vadd.f32 -1.4531521, %v496_v54  ;;  %889 = vpow2.f32 %v639_v57  ;;  %v641_v38 = vmul.f32 1.442695, %v622_v28 }
 0x22e   :  { %v521_v60 = vmul.f32 %v1146_v34, %v509_v49  ;;  %v510_v23 = vadd.f32 -1.4531521, %v498_v5  ;;  %v1169_v25 = vpop.eup %873  ;;  %891 = vpow2.f32 %v637_v27  ;;  %v1197_v5 = vadd.f32 %v1096_v48, %v1076_v19 }
 0x22f   :  { %v531_v2 = vadd.f32 1.4214138, %v519_v53  ;;  %v520_v22 = vmul.f32 %v1153_v46, %v508_v4  ;;  %v499_v18 = vmul.f32 1.0614054, %v1169_v25  ;;  %v876_v47 = vpop.eup %875  ;;  %v1193_v4 = vand.u32 2147483647, %v1180_v39 }
 0x230   :  { %v533_v10 = vadd.f32 1.4214138, %v521_v60  ;;  %v522_v35 = vmul.f32 %v1159_v59, %v510_v23  ;;  %vm427_vm5 = vcmp.ge.f32.partialorder %v1109_v62, 0.0  ;;  %893 = vpow2.f32 %v641_v38 }
 0x231   :  { %v543_v16 = vmul.f32 %v1141_v30, %v531_v2  ;;  %v532_v33 = vadd.f32 1.4214138, %v520_v22  ;;  %v1182_v40 = vpop.eup %877  ;;  %v511_v45 = vadd.f32 -1.4531521, %v499_v18  ;;  %v467_v28 = vmul.f32 0.3275911, %v1193_v4 }
 0x232   :  { %v545_v26 = vmul.f32 %v1146_v34, %v533_v10  ;;  %v534_v44 = vadd.f32 1.4214138, %v522_v35  ;;  %v880_v49 = vpop.eup %879  ;;  %v501_v53 = vmul.f32 1.0614054, %v1182_v40  ;;  %vm429_vm6 = vcmp.ge.f32.partialorder %v1126_v11, 0.0 }
 0x233   :  { %v555_v32 = vadd.f32 -0.28449672, %v543_v16  ;;  %v544_v43 = vmul.f32 %v1153_v46, %v532_v33  ;;  %v523_v60 = vmul.f32 %v1169_v25, %v511_v45  ;;  %v1190_v61 = vpop.eup %881  ;;  %vm428_vm7 = vcmp.ge.f32.partialorder %v1135_v17, 0.0 }
 0x234   :  { %v557_v36 = vadd.f32 -0.28449672, %v545_v26  ;;  %v546_v57 = vmul.f32 %v1159_v59, %v534_v44  ;;  %v513_v2 = vadd.f32 -1.4531521, %v501_v53  ;;  %v884_v10 = vpop.eup %883  ;;  %v500_v27 = vmul.f32 1.0614054, %v1190_v61 }
 0x235   :  { %v567_v41 = vmul.f32 %v1141_v30, %v555_v32  ;;  %v556_v56 = vadd.f32 -0.28449672, %v544_v43  ;;  %v535_v22 = vadd.f32 1.4214138, %v523_v60  ;;  %v886_v32 = vpop.eup %885  ;;  %v479_v43 = vadd.f32 1.0, %v467_v28 }
 0x236   :  { %v569_v50 = vmul.f32 %v1146_v34, %v557_v36  ;;  %v558_v16 = vadd.f32 -0.28449672, %v546_v57  ;;  %v525_v26 = vmul.f32 %v1182_v40, %v513_v2  ;;  %v440_v17 = vsel %vm428_vm7, 1.0, %v912_v7 }
 0x237   :  { %v579_v54 = vadd.f32 0.2548296, %v567_v41  ;;  %v568_v13 = vmul.f32 %v1153_v46, %v556_v56  ;;  %v547_v48 = vmul.f32 %v1169_v25, %v535_v22  ;;  %v512_v41 = vadd.f32 -1.4531521, %v500_v27 }
 0x238   :  { %v581_v0 = vadd.f32 0.2548296, %v569_v50  ;;  %v570_v19 = vmul.f32 %v1159_v59, %v558_v16  ;;  %v537_v36 = vadd.f32 1.4214138, %v525_v26  ;;  %895 = vrcp.f32 %v479_v43 }
 0x239   :  { %v591_v12 = vmul.f32 %v1141_v30, %v579_v54  ;;  %v580_v35 = vadd.f32 0.2548296, %v568_v13  ;;  %v1207_v30 = vpop.eup %887  ;;  %v559_v50 = vadd.f32 -0.28449672, %v547_v48  ;;  %v524_v56 = vmul.f32 %v1190_v61, %v512_v41 }
 0x23a   :  { %v593_v23 = vmul.f32 %v1146_v34, %v581_v0  ;;  %v582_v45 = vadd.f32 0.2548296, %v570_v19  ;;  %v890_v53 = vpop.eup %889  ;;  %v549_v54 = vmul.f32 %v1182_v40, %v537_v36  ;;  %v502_v57 = vmul.f32 1.0614054, %v1207_v30 }
 0x23b   :  { %v651_v33 = vmul.f32 %v872_v6, %v591_v12  ;;  %v592_v44 = vmul.f32 %v1153_v46, %v580_v35  ;;  %v571_v2 = vmul.f32 %v1169_v25, %v559_v50  ;;  %v892_v46 = vpop.eup %891  ;;  %v536_v16 = vadd.f32 1.4214138, %v524_v56 }
 0x23c   :  { %v653_v18 = vmul.f32 %v876_v47, %v593_v23  ;;  %v594_v0 = vmul.f32 %v1159_v59, %v582_v45  ;;  %v561_v13 = vadd.f32 -0.28449672, %v549_v54  ;;  %v514_v22 = vadd.f32 -1.4531521, %v502_v57 }
 0x23d   :  { %v663_v34 = vsub.f32 1.0, %v651_v33  ;;  %v652_v60 = vmul.f32 %v880_v49, %v592_v44  ;;  %v583_v28 = vadd.f32 0.2548296, %v571_v2  ;;  %v548_v35 = vmul.f32 %v1190_v61, %v536_v16  ;;  %v894_v2 = vpop.eup %893 }
 0x23e   :  { %v665_v6 = vsub.f32 1.0, %v653_v18  ;;  %v654_v27 = vmul.f32 %v884_v10, %v594_v0  ;;  %v573_v33 = vmul.f32 %v1182_v40, %v561_v13  ;;  %v402_v45 = vmul.f32 0.5, %v1086_v29 }
 0x23f   :  { %v675_v47 = vmul.f32 %v663_v34, %v1121_v8  ;;  %v664_v26 = vsub.f32 1.0, %v652_v60  ;;  %v526_v8 = vmul.f32 %v1207_v30, %v514_v22  ;;  %v560_v36 = vadd.f32 -0.28449672, %v548_v35 }
 0x240   :  { %v677_v12 = vmul.f32 %v665_v6, %v1130_v15  ;;  %v666_v19 = vsub.f32 1.0, %v654_v27  ;;  %v595_v15 = vmul.f32 %v1169_v25, %v583_v28  ;;  %v585_v18 = vadd.f32 0.2548296, %v573_v33 }
 0x241   :  { %v687_v23 = vadd.f32 1.0, %v675_v47  ;;  %v676_v49 = vmul.f32 %v664_v26, %v1144_v31  ;;  %v538_v41 = vadd.f32 1.4214138, %v526_v8  ;;  %v572_v50 = vmul.f32 %v1190_v61, %v560_v36 }
 0x242   :  { %v689_v59 = vadd.f32 1.0, %v677_v12  ;;  %v678_v34 = vmul.f32 %v666_v19, %v1177_v37  ;;  %v655_v44 = vmul.f32 %v886_v32, %v595_v15  ;;  %v597_v38 = vmul.f32 %v1182_v40, %v585_v18 }
 0x243   :  { %v699_v48 = vmul.f32 %v687_v23, %v1106_v58  ;;  %v688_v10 = vadd.f32 1.0, %v676_v49  ;;  %v550_v31 = vmul.f32 %v1207_v30, %v538_v41  ;;  %v439_v37 = vsel %vm427_vm5, 1.0, %v912_v7 }
 0x244   :  { %v701_v25 = vmul.f32 %v689_v59, %v1114_v1  ;;  %v690_v6 = vadd.f32 1.0, %v678_v34  ;;  %v667_v54 = vsub.f32 1.0, %v655_v44  ;;  %v657_v32 = vmul.f32 %v890_v53, %v597_v38 }
 0x245   :  { %v700_v58 = vmul.f32 %v688_v10, %v1123_v9  ;;  %v584_v43 = vadd.f32 0.2548296, %v572_v50  ;;  %v562_v56 = vadd.f32 -0.28449672, %v550_v31  ;;  %v1235_v47 = vmul.f32 0.70710677, %v1197_v5 }
 0x246   :  { %v702_v57 = vmul.f32 %v690_v6, %v402_v45  ;;  %v679_v40 = vmul.f32 %v667_v54, %v439_v37  ;;  %v669_v1 = vsub.f32 1.0, %v657_v32  ;;  %v1246_v0 = vadd.f32 %v1099_v51, %v1078_v20  ;;  %v1255_v51 = vpop.eup %895 }
 0x247   :  { %v801_v29 = vpack.c.bf16 %v700_v58, %v699_v48  ;;  %v596_v9 = vmul.f32 %v1190_v61, %v584_v43  ;;  %v574_v60 = vmul.f32 %v1207_v30, %v562_v56  ;;  %v457_v53 = vand.u32 2147483647, %v1235_v47 }
 0x248   :  { %v802_v62 = vpack.c.bf16 %v702_v57, %v701_v25  ;;  %v691_v61 = vadd.f32 1.0, %v679_v40  ;;  %v441_v13 = vsel %vm429_vm6, 1.0, %v912_v7  ;;  %v403_v22 = vmul.f32 0.5, %v1104_v55 }
 0x249   :  { %751 = vst [vmem:[%s1313_s5] sm:$0xff] %v801_v29  ;;  %v656_v11 = vmul.f32 %v892_v46, %v596_v9  ;;  %v586_v12 = vadd.f32 0.2548296, %v574_v60  ;;  %v469_v16 = vmul.f32 0.3275911, %v457_v53  ;;  %v681_v23 = vmul.f32 %v669_v1, %v441_v13 }
 0x24a   :  { %752 = vst [vmem:[%s1313_s5 + $0x8] sm:$0xff] %v802_v62  ;;  %vm430_vm8 = vcmp.ge.f32.partialorder %v1151_v42, 0.0  ;;  %v1260_v27 = vmul.f32 0.70710677, %v1246_v0  ;;  %v503_v35 = vmul.f32 1.0614054, %v1255_v51  ;;  %v1265_v55 = vadd.f32 %v1101_v52, %v1080_v21 }
 0x24b   :  { %v668_v26 = vsub.f32 1.0, %v656_v11  ;;  %v598_v20 = vmul.f32 %v1207_v30, %v586_v12  ;;  %v481_v46 = vadd.f32 1.0, %v469_v16  ;;  %v703_v8 = vmul.f32 %v691_v61, %v403_v22 }
 0x24c   :  { %v404_v30 = vmul.f32 0.5, %v1117_v3  ;;  %v456_v59 = vand.u32 2147483647, %v1260_v27  ;;  %v693_v49 = vadd.f32 1.0, %v681_v23  ;;  %v515_v48 = vadd.f32 -1.4531521, %v503_v35 }
 0x24d   :  { %v680_v28 = vmul.f32 %v668_v26, %v440_v17  ;;  %v658_v33 = vmul.f32 %v894_v2, %v598_v20  ;;  %897 = vrcp.f32 %v481_v46  ;;  %v405_v18 = vmul.f32 0.5, %v1112_v63 }
 0x24e   :  { %v442_v36 = vsel %vm430_vm8, 1.0, %v912_v7  ;;  %v611_v41 = vsub.f32 0.0, %v1193_v4  ;;  %v468_v21 = vmul.f32 0.3275911, %v456_v59  ;;  %v527_v3 = vmul.f32 %v1255_v51, %v515_v48 }
 0x24f   :  { %v692_v19 = vadd.f32 1.0, %v680_v28  ;;  %v670_v15 = vsub.f32 1.0, %v658_v33  ;;  %v1276_v34 = vmul.f32 0.70710677, %v1265_v55  ;;  %v406_v44 = vmul.f32 0.5, %v1138_v24 }
 0x250   :  { %v480_v45 = vadd.f32 1.0, %v468_v21  ;;  %v705_v38 = vmul.f32 %v693_v49, %v405_v18  ;;  %v539_v31 = vadd.f32 1.4214138, %v527_v3  ;;  %v623_v42 = vmul.f32 %v611_v41, %v1193_v4 }
 0x251   :  { %v704_v52 = vmul.f32 %v692_v19, %v404_v30  ;;  %v682_v10 = vmul.f32 %v670_v15, %v442_v36  ;;  %v458_v25 = vand.u32 2147483647, %v1276_v34  ;;  %v613_v54 = vsub.f32 0.0, %v457_v53 }
 0x252   :  { %899 = vrcp.f32 %v480_v45  ;;  %v551_v6 = vmul.f32 %v1255_v51, %v539_v31  ;;  %v643_v56 = vmul.f32 1.442695, %v623_v42  ;;  %v612_v40 = vsub.f32 0.0, %v456_v59 }
 0x253   :  { %v803_v50 = vpack.c.bf16 %v704_v52, %v703_v8  ;;  %v694_v63 = vadd.f32 1.0, %v682_v10  ;;  %v470_v37 = vmul.f32 0.3275911, %v458_v25  ;;  %v625_v57 = vmul.f32 %v613_v54, %v457_v53 }
 0x254   :  { %v563_v32 = vadd.f32 -0.28449672, %v551_v6  ;;  %v624_v11 = vmul.f32 %v612_v40, %v456_v59  ;;  %v614_v16 = vsub.f32 0.0, %v458_v25  ;;  %vm431_vm9 = vcmp.ge.f32.partialorder %v1180_v39, 0.0 }
 0x255   :  { %753 = vst [vmem:[%s1313_s5 + $0x10] sm:$0xff] %v803_v50  ;;  %v706_v58 = vmul.f32 %v694_v63, %v406_v44  ;;  %v482_v29 = vadd.f32 1.0, %v470_v37  ;;  %v647_v2 = vmul.f32 1.442695, %v625_v57  ;;  %vm433_vm10 = vcmp.ge.f32.partialorder %v1235_v47, 0.0 }
 0x256   :  { %v575_v1 = vmul.f32 %v1255_v51, %v563_v32  ;;  %v645_v26 = vmul.f32 1.442695, %v624_v11  ;;  %v626_v28 = vmul.f32 %v614_v16, %v458_v25  ;;  %vm432_vm11 = vcmp.ge.f32.partialorder %v1260_v27, 0.0 }
 0x257   :  { %v804_v24 = vpack.c.bf16 %v706_v58, %v705_v38  ;;  %v898_v43 = vpop.eup %897  ;;  %901 = vrcp.f32 %v482_v29  ;;  %v443_v38 = vsel %vm431_vm9, 1.0, %v912_v7  ;;  %v444_v32 = vsel %vm432_vm11, 1.0, %v912_v7 }
 0x258   :  { %v505_v4 = vmul.f32 1.0614054, %v898_v43  ;;  %903 = vpow2.f32 %v643_v56  ;;  %v587_v12 = vadd.f32 0.2548296, %v575_v1  ;;  %v649_v48 = vmul.f32 1.442695, %v626_v28 }
 0x259   :  { %754 = vst [vmem:[%s1313_s5 + $0x18] sm:$0xff] %v804_v24  ;;  %905 = vpow2.f32 %v647_v2  ;;  %v445_v24 = vsel %vm433_vm10, 1.0, %v912_v7  ;;  %v408_v47 = vmul.f32 0.5, %v1246_v0  ;;  %vm434_vm12 = vcmp.ge.f32.partialorder %v1276_v34, 0.0 }
 0x25a   :  { %v517_v9 = vadd.f32 -1.4531521, %v505_v4  ;;  %v599_v53 = vmul.f32 %v1255_v51, %v587_v12  ;;  %907 = vpow2.f32 %v645_v26  ;;  %v446_v2 = vsel %vm434_vm12, 1.0, %v912_v7 }
 0x25b   :  { %909 = vpow2.f32 %v649_v48  ;;  %v409_v11 = vmul.f32 0.5, %v1197_v5  ;;  %v410_v0 = vmul.f32 0.5, %v1265_v55 }
 0x25c   :  { %v529_v60 = vmul.f32 %v898_v43, %v517_v9  ;;  %v900_v62 = vpop.eup %899 }
 0x25d   :  { %v504_v13 = vmul.f32 1.0614054, %v900_v62 }
 0x25e   :  { %v541_v61 = vadd.f32 1.4214138, %v529_v60 }
 0x25f   :  { %v516_v23 = vadd.f32 -1.4531521, %v504_v13 }
 0x260   :  { %v553_v22 = vmul.f32 %v898_v43, %v541_v61 }
 0x261   :  { %v528_v17 = vmul.f32 %v900_v62, %v516_v23  ;;  %v902_v46 = vpop.eup %901 }
 0x262   :  { %v565_v20 = vadd.f32 -0.28449672, %v553_v22  ;;  %v506_v8 = vmul.f32 1.0614054, %v902_v46  ;;  %v904_v30 = vpop.eup %903 }
 0x263   :  { %v540_v35 = vadd.f32 1.4214138, %v528_v17  ;;  %v659_v59 = vmul.f32 %v904_v30, %v599_v53  ;;  %v906_v10 = vpop.eup %905 }
 0x264   :  { %v577_v33 = vmul.f32 %v898_v43, %v565_v20  ;;  %v518_v15 = vadd.f32 -1.4531521, %v506_v8  ;;  %v908_v42 = vpop.eup %907 }
 0x265   :  { %v552_v19 = vmul.f32 %v900_v62, %v540_v35  ;;  %v671_v51 = vsub.f32 1.0, %v659_v59  ;;  %v910_v57 = vpop.eup %909 }
 0x266   :  { %v589_v49 = vadd.f32 0.2548296, %v577_v33  ;;  %v530_v41 = vmul.f32 %v902_v46, %v518_v15 }
 0x267   :  { %v564_v36 = vadd.f32 -0.28449672, %v552_v19  ;;  %v683_v50 = vmul.f32 %v671_v51, %v443_v38 }
 0x268   :  { %v601_v18 = vmul.f32 %v898_v43, %v589_v49  ;;  %v542_v52 = vadd.f32 1.4214138, %v530_v41  ;;  %v407_v43 = vmul.f32 0.5, %v1165_v14 }
 0x269   :  { %v576_v21 = vmul.f32 %v900_v62, %v564_v36  ;;  %v695_v6 = vadd.f32 1.0, %v683_v50 }
 0x26a   :  { %v661_v3 = vmul.f32 %v906_v10, %v601_v18  ;;  %v554_v45 = vmul.f32 %v902_v46, %v542_v52 }
 0x26b   :  { %v588_v44 = vadd.f32 0.2548296, %v576_v21  ;;  %v707_v40 = vmul.f32 %v695_v6, %v407_v43 }
 0x26c   :  { %v566_v31 = vadd.f32 -0.28449672, %v554_v45  ;;  %v673_v25 = vsub.f32 1.0, %v661_v3 }
 0x26d   :  { %v600_v63 = vmul.f32 %v900_v62, %v588_v44 }
 0x26e   :  { %v578_v58 = vmul.f32 %v902_v46, %v566_v31  ;;  %v685_v56 = vmul.f32 %v673_v25, %v445_v24 }
 0x26f   :  { %v660_v39 = vmul.f32 %v908_v42, %v600_v63 }
 0x270   :  { %v590_v37 = vadd.f32 0.2548296, %v578_v58  ;;  %v697_v9 = vadd.f32 1.0, %v685_v56 }
 0x271   :  { %v672_v54 = vsub.f32 1.0, %v660_v39 }
 0x272   :  { %v602_v4 = vmul.f32 %v902_v46, %v590_v37  ;;  %v709_v61 = vmul.f32 %v697_v9, %v409_v11 }
 0x273   :  { %v684_v29 = vmul.f32 %v672_v54, %v444_v32 }
 0x274   :  { %v662_v27 = vmul.f32 %v910_v57, %v602_v4 }
 0x275   :  { %v696_v1 = vadd.f32 1.0, %v684_v29 }
 0x276   :  { %v674_v62 = vsub.f32 1.0, %v662_v27 }
 0x277   :  { %v708_v60 = vmul.f32 %v696_v1, %v408_v47 }
 0x278   :  { %v686_v14 = vmul.f32 %v674_v62, %v446_v2 }
 0x279   :  { %v805_v12 = vpack.c.bf16 %v708_v60, %v707_v40 }
 0x27a   :  { %v698_v13 = vadd.f32 1.0, %v686_v14 }
 0x27b   :  { %755 = vst [vmem:[%s1313_s5 + $0x20] sm:$0x33] %v805_v12 }
 0x27c   :  { %v710_v16 = vmul.f32 %v698_v13, %v410_v0 }
 0x27e   :  { %v806_v34 = vpack.c.bf16 %v710_v16, %v709_v61 }
 0x280   :  { %756 = vst [vmem:[%s1313_s5 + $0x28] sm:$0x33] %v806_v34 }

// kernel: _lambda_.38
= control target key start
LH: loop header
LB: loop body
LE: loop exit
PB: predicated region body
PF: predicated region fallthrough
CT: control target
= control target key end

     0   :  { %v185_v0 = vmov 0.0   ;;  %vm186_vm0 = vmmov 0   ;;  %s248_s1 = inlined_call_operand.vmem [shape: bf16[128,128], index: 1, kind: input, shape index: {}]   ;;  %s249_s0 = inlined_call_operand.vmem [shape: bf16[6,128], index: 0, kind: input, shape index: {}]   ;;  %s250_s2 = inlined_call_operand.vmem [shape: f32[1,128], index: 2, kind: input, shape index: {}]   ;;  %s251_s3 = inlined_call_operand.vmem [shape: f32[6,128], index: 3, kind: input, shape index: {}, may-alias: {3,4}]   ;;  %s252_s4 = inlined_call_operand.vmem [shape: f32[6,128], index: 4, kind: output, shape index: {}, may-alias: {3,4}]  }
   0x1   :  { %155 = vmatprep.subr.bf16.mxu0 %v185_v0  ;;  %v177_v1 = vld [vmem:[%s248_s1] sm:$0xff]   ;;  %171 = vmatprep.mubr.msk.bf16.mxu0 %vm186_vm0, %v185_v0  ;;  %v178_v2 = vld [vmem:[%s248_s1 + $0x8] sm:$0xff]   ;;  %v179_v3 = vld [vmem:[%s248_s1 + $0x10] sm:$0xff]  }
   0x2   :  { %156 = vmatpush3.bf16.msra.mxu0 %v177_v1  ;;  %v180_v4 = vld [vmem:[%s248_s1 + $0x18] sm:$0xff]   ;;  %v181_v5 = vld [vmem:[%s248_s1 + $0x20] sm:$0xff]   ;;  %v182_v6 = vld [vmem:[%s248_s1 + $0x28] sm:$0xff]  }
   0x3   :  { %157 = vmatprep.subr.bf16.mxu0 %v185_v0  ;;  %v183_v7 = vld [vmem:[%s248_s1 + $0x30] sm:$0xff]   ;;  %v184_v8 = vld [vmem:[%s248_s1 + $0x38] sm:$0xff]   ;;  %v18_v9 = vld [vmem:[%s249_s0] sm:$0x7] }
   0x4   :  { %v137_v10 = vld [vmem:[%s250_s2] ss:$0 sm:$0xff] }
   0x5   :  { %v130_v12 = vld [vmem:[%s251_s3] sm:$0x3f] }
   0x6   :  { %158 = vmatpush3.bf16.msra.mxu0 %v178_v2 }
   0x7   :  { %159 = vmatprep.subr.bf16.mxu0 %v185_v0 }
   0xa   :  { %160 = vmatpush3.bf16.msra.mxu0 %v179_v3 }
   0xb   :  { %161 = vmatprep.subr.bf16.mxu0 %v185_v0 }
   0xe   :  { %162 = vmatpush3.bf16.msra.mxu0 %v180_v4 }
   0xf   :  { %163 = vmatprep.subr.bf16.mxu0 %v185_v0 }
  0x12   :  { %164 = vmatpush3.bf16.msra.mxu0 %v181_v5 }
  0x13   :  { %165 = vmatprep.subr.bf16.mxu0 %v185_v0 }
  0x16   :  { %166 = vmatpush3.bf16.msra.mxu0 %v182_v6 }
  0x17   :  { %167 = vmatprep.subr.bf16.mxu0 %v185_v0 }
  0x1a   :  { %168 = vmatpush3.bf16.msra.mxu0 %v183_v7 }
  0x1b   :  { %169 = vmatprep.subr.bf16.mxu0 %v185_v0 }
  0x1e   :  { %170 = vmatpush3.bf16.msra.mxu0 %v184_v8 }
  0x21   :  { %172 = vmatmul.mubr.bf16.vlgmr.msra.gmra.mrb[0].mxu0 %v18_v9 }
  0xf4   :  { %v124_v11 = vpop.f32.mrb[0].mxu0 }
  0xf5   :  { %v125_v13 = vadd.f32 %v137_v10, %v124_v11  ;;  %v173_v14 = vpop.f32.mrb[1].mxu0 }
  0xf6   :  { %v127_v15 = vpop.f32.mrb[2].mxu0 }
  0xf7   :  { %v131_v16 = vadd.f32 %v130_v12, %v125_v13  ;;  %v174_v17 = vpop.f32.mrb[3].mxu0 }
  0xf9   :  { %132 = vst [vmem:[%s252_s4] sm:$0x3f] %v131_v16 }

// kernel: _lambda_.36
= control target key start
LH: loop header
LB: loop body
LE: loop exit
PB: predicated region body
PF: predicated region fallthrough
CT: control target
= control target key end

     0   :  { %vm22_vm0 = vcmask 1045504   ;;  %v427_v3 = vmov 0.0   ;;  %v428_v27 = vmov 0   ;;  %vm429_vm1 = vmmov 0   ;;  %s552_s0 = inlined_call_operand.vmem [shape: f32[6,128], index: 0, kind: input, shape index: {}]   ;;  %s553_s3 = inlined_call_operand.vmem [shape: bf16[128,384], index: 3, kind: input, shape index: {}]   ;;  %s554_s1 = inlined_call_operand.vmem [shape: f32[1,128], index: 1, kind: input, shape index: {}]   ;;  %s555_s2 = inlined_call_operand.vmem [shape: f32[1,128], index: 2, kind: input, shape index: {}]   ;;  %s556_s4 = inlined_call_operand.vmem [shape: f32[1,384], index: 4, kind: input, shape index: {}]   ;;  %s557_s5 = inlined_call_operand.vmem [shape: bf16[6,384], index: 5, kind: output, shape index: {}]  }
   0x1   :  { %v21_v0 = vld [vmem:[%s552_s0] sm:$0x3f]  ;;  %370 = vmatprep.subr.bf16.mxu1 %v427_v3  ;;  %v396_v5 = vld [vmem:[%s553_s3 + $0x8] ss:$12 sps:$4 sm:$0xff]   ;;  %v403_v15 = vld [vmem:[%s553_s3 + $0x30] ss:$12 sps:$4 sm:$0xff]   ;;  %263 = vmatprep.mubr.bf16.mxu0 %v428_v27  ;;  %v88_v43 = vlaneseq }
   0x2   :  { %v23_v1 = vsel %vm22_vm0, %v21_v0, 0.0  ;;  %v393_v2 = vld [vmem:[%s553_s3 + $0x4] ss:$12 sps:$4 sm:$0xff]   ;;  %v395_v4 = vld [vmem:[%s553_s3] ss:$12 sps:$4 sm:$0xff]   ;;  %371 = vmatpush3.bf16.msra.mxu1 %v396_v5  ;;  %386 = vmatprep.mubr.msk.bf16.mxu1 %vm429_vm1, %v427_v3 }
   0x3   :  { %24 = vadd.xlane.f32.xlu0 %v23_v1  ;;  %231 = vmatprep.subr.bf16.mxu0 %v393_v2  ;;  %v397_v6 = vld [vmem:[%s553_s3 + $0x1c] ss:$12 sps:$4 sm:$0xff]   ;;  %v399_v7 = vld [vmem:[%s553_s3 + $0x18] ss:$12 sps:$4 sm:$0xff]   ;;  %v400_v8 = vld [vmem:[%s553_s3 + $0x20] ss:$12 sps:$4 sm:$0xff]  }
   0x4   :  { %232 = vmatpush1.bf16.msra.mxu0 %v395_v4  ;;  %372 = vmatprep.subr.bf16.mxu1 %v427_v3  ;;  %v401_v9 = vld [vmem:[%s553_s3 + $0x34] ss:$12 sps:$4 sm:$0xff]   ;;  %v404_v16 = vld [vmem:[%s553_s3 + $0x38] ss:$12 sps:$4 sm:$0xff]   ;;  %v408_v19 = vld [vmem:[%s553_s3 + $0x50] ss:$12 sps:$4 sm:$0xff]  }
   0x5   :  { %233 = vmatprep.subr.bf16.mxu0 %v397_v6  ;;  %v405_v17 = vld [vmem:[%s553_s3 + $0x4c] ss:$12 sps:$4 sm:$0xff]   ;;  %v407_v18 = vld [vmem:[%s553_s3 + $0x48] ss:$12 sps:$4 sm:$0xff]   ;;  %v409_v20 = vld [vmem:[%s553_s3 + $0x64] ss:$12 sps:$4 sm:$0xff]  }
   0x6   :  { %373 = vmatpush3.bf16.msra.mxu1 %v400_v8  ;;  %v411_v21 = vld [vmem:[%s553_s3 + $0x60] ss:$12 sps:$4 sm:$0xff]   ;;  %v412_v22 = vld [vmem:[%s553_s3 + $0x68] ss:$12 sps:$4 sm:$0xff]   ;;  %v415_v24 = vld [vmem:[%s553_s3 + $0x78] ss:$12 sps:$4 sm:$0xff]  }
   0x7   :  { %374 = vmatprep.subr.bf16.mxu1 %v427_v3  ;;  %v413_v23 = vld [vmem:[%s553_s3 + $0x7c] ss:$12 sps:$4 sm:$0xff]   ;;  %v416_v25 = vld [vmem:[%s553_s3 + $0x80] ss:$12 sps:$4 sm:$0xff]   ;;  %v420_v29 = vld [vmem:[%s553_s3 + $0x98] ss:$12 sps:$4 sm:$0xff]  }
   0x8   :  { %234 = vmatpush1.bf16.msra.mxu0 %v399_v7  ;;  %v417_v26 = vld [vmem:[%s553_s3 + $0x94] ss:$12 sps:$4 sm:$0xff]   ;;  %v419_v28 = vld [vmem:[%s553_s3 + $0x90] ss:$12 sps:$4 sm:$0xff]   ;;  %v421_v30 = vld [vmem:[%s553_s3 + $0xac] ss:$12 sps:$4 sm:$0xff]  }
   0x9   :  { %235 = vmatprep.subr.bf16.mxu0 %v401_v9  ;;  %v423_v31 = vld [vmem:[%s553_s3 + $0xa8] ss:$12 sps:$4 sm:$0xff]   ;;  %v424_v32 = vld [vmem:[%s553_s3 + $0xb0] ss:$12 sps:$4 sm:$0xff]   ;;  %v331_v37 = vld [vmem:[%s554_s1] ss:$0 sm:$0xff] }
   0xa   :  { %375 = vmatpush3.bf16.msra.mxu1 %v404_v16  ;;  %v332_v39 = vld [vmem:[%s555_s2] ss:$0 sm:$0xff]  ;;  %v89_v44 = vshrl.u32 %v88_v43, 7 }
   0xb   :  { %376 = vmatprep.subr.bf16.mxu1 %v427_v3  ;;  %v86_v47 = vld [vmem:[%s556_s4] sm:$0x7] }
   0xc   :  { %236 = vmatpush1.bf16.msra.mxu0 %v403_v15  ;;  %v90_v45 = vsub.s32 0, %v89_v44  ;;  %v98_v46 = vsub.s32 2, %v89_v44  ;;  %v94_v48 = vsub.s32 1, %v89_v44 }
   0xd   :  { %237 = vmatprep.subr.bf16.mxu0 %v405_v17 }
   0xe   :  { %377 = vmatpush3.bf16.msra.mxu1 %v408_v19  ;;  %v91_v49 = vrot.slane %v86_v47, %v90_v45  ;;  %v99_v50 = vrot.slane %v86_v47, %v98_v46  ;;  %v95_v51 = vrot.slane %v86_v47, %v94_v48 }
   0xf   :  { %378 = vmatprep.subr.bf16.mxu1 %v427_v3 }
  0x10   :  { %238 = vmatpush1.bf16.msra.mxu0 %v407_v18 }
  0x11   :  { %239 = vmatprep.subr.bf16.mxu0 %v409_v20 }
  0x12   :  { %379 = vmatpush3.bf16.msra.mxu1 %v412_v22 }
  0x13   :  { %380 = vmatprep.subr.bf16.mxu1 %v427_v3 }
  0x14   :  { %240 = vmatpush1.bf16.msra.mxu0 %v411_v21 }
  0x15   :  { %241 = vmatprep.subr.bf16.mxu0 %v413_v23 }
  0x16   :  { %381 = vmatpush3.bf16.msra.mxu1 %v416_v25 }
  0x17   :  { %382 = vmatprep.subr.bf16.mxu1 %v427_v3 }
  0x18   :  { %242 = vmatpush1.bf16.msra.mxu0 %v415_v24 }
  0x19   :  { %243 = vmatprep.subr.bf16.mxu0 %v417_v26 }
  0x1a   :  { %383 = vmatpush3.bf16.msra.mxu1 %v420_v29 }
  0x1b   :  { %384 = vmatprep.subr.bf16.mxu1 %v427_v3 }
  0x1c   :  { %244 = vmatpush1.bf16.msra.mxu0 %v419_v28 }
  0x1d   :  { %245 = vmatprep.subr.bf16.mxu0 %v421_v30 }
  0x1e   :  { %385 = vmatpush3.bf16.msra.mxu1 %v424_v32 }
  0x20   :  { %246 = vmatpush1.bf16.msra.mxu0 %v423_v31 }
  0x90   :  { %v25_v10 = vpop.xlane.xlu0 %24 }
  0x91   :  { %v27_v11 = vmul.f32 0.0078125, %v25_v10 }
  0x93   :  { %v28_v12 = vsub.f32 %v21_v0, %v27_v11 }
  0x95   :  { %v29_v13 = vmul.f32 %v28_v12, %v28_v12 }
  0x97   :  { %v30_v14 = vsel %vm22_vm0, %v29_v13, 0.0 }
  0x98   :  { %31 = vadd.xlane.f32.xlu0 %v30_v14 }
 0x125   :  { %v32_v33 = vpop.xlane.xlu0 %31 }
 0x126   :  { %v33_v34 = vmul.f32 0.0078125, %v32_v33 }
 0x128   :  { %v34_v35 = vadd.f32 1e-05, %v33_v34 }
 0x12a   :  { %425 = vrsqrt.f32 %v34_v35 }
 0x134   :  { %v426_v36 = vpop.eup %425 }
 0x135   :  { %v36_v38 = vmul.f32 %v426_v36, %v28_v12 }
 0x137   :  { %v44_v40 = vmul.f32 %v331_v37, %v36_v38 }
 0x139   :  { %v52_v41 = vadd.f32 %v332_v39, %v44_v40 }
 0x13b   :  { %v53_v42 = vpack.c.bf16 %v52_v41, %v52_v41 }
 0x13d   :  { %264 = vmatmul.mubr.bf16.vlgmr.msra.gmra.mrb[0].mxu0 %v53_v42  ;;  %387 = vmatmul.mubr.bf16.vlgmr.msra.gmra.mrb[0].mxu1 %v53_v42 }
 0x210   :  { %v265_v52 = vpop.f32.mrb[0].mxu0  ;;  %v306_v53 = vpop.f32.mrb[0].mxu1 }
 0x211   :  { %v266_v54 = vadd.f32 %v265_v52, %v91_v49  ;;  %v307_v55 = vadd.f32 %v306_v53, %v99_v50  ;;  %v267_v56 = vpop.f32.mrb[1].mxu0  ;;  %v388_v57 = vpop.f32.mrb[1].mxu1 }
 0x212   :  { %v268_v58 = vadd.f32 %v267_v56, %v95_v51  ;;  %v269_v59 = vpop.f32.mrb[2].mxu0  ;;  %v309_v60 = vpop.f32.mrb[2].mxu1 }
 0x213   :  { %v360_v61 = vpack.c.bf16 %v307_v55, %v307_v55  ;;  %v270_v62 = vpop.f32.mrb[3].mxu0  ;;  %v389_v63 = vpop.f32.mrb[3].mxu1 }
 0x214   :  { %v359_v0 = vpack.c.bf16 %v268_v58, %v266_v54 }
 0x215   :  { %326 = vst [vmem:[%s557_s5 + $0x8] sm:$0x7] %v360_v61 }
 0x216   :  { %325 = vst [vmem:[%s557_s5] sm:$0x77] %v359_v0 }

// kernel: _lambda_.37
= control target key start
LH: loop header
LB: loop body
LE: loop exit
PB: predicated region body
PF: predicated region fallthrough
CT: control target
= control target key end

     0   :  { %s539_s6 = smov 0   ;;  %s594_s0 = inlined_call_operand.vmem [shape: bf16[2,3,384], index: 0, kind: input, shape index: {}]   ;;  %s595_s1 = inlined_call_operand.vmem [shape: bf16[2,3,128], index: 1, kind: output, shape index: {}]  }
   0x1 LB: > { %s446_s7 = sadd.s32 4294967295, %s522_s6   ;;  %p450_p0 = scmp.ge.s32.totalorder %s522_s6, 1  ;;  %s522_s6 = sphi %s539_s6, %s11_s6  }
   0x2   : > { %p87_p1 = scmp.lt.s32.totalorder %s522_s6, 3 }
   0x4   : > { %p88_p2 = pnand %p450_p0, %p87_p1 }
   0x5   : > { %p106_p3 = scmp.lt.s32.totalorder (!%p88_p2), %s446_s7, 1  ;;  %v524_v0 = vmov (!%p88_p2), 0.0   ;;  %vm525_vm0 = vmmov (!%p88_p2), 0   ;;  %vm119_vm1 = vcmask (!%p88_p2), 523264   ;;  %vm167_vm2 = vcmask (!%p88_p2), 18432   ;;  %s526_s12 = smov (!%p88_p2), 64  }
   0x6   : > { %91 = sbr.rel (%p88_p2) target bundleno = 1427 (0x593), region = 24  ;;  %470 = vmatprep.subr.bf16.mxu0 (!%p88_p2), %v524_v0  ;;  %472 = vmatprep.mubr.msk.bf16.mxu0 (!%p88_p2), %vm525_vm0, %v524_v0  ;;  %vm184_vm3 = vcmask (!%p88_p2), 1040384   ;;  %vm185_vm4 = vcmask (!%p88_p2), 1041408   ;;  %v527_v18 = vmov (!%p88_p2), 65535   ;;  %vm180_vm5 = vcmask (!%p88_p2), 23552  }
   0x7   : > { %476 = vmatprep.subr.bf16.mxu1 (!%p88_p2), %v524_v0  ;;  %478 = vmatprep.mubr.msk.bf16.mxu1 (!%p88_p2), %vm525_vm0, %v524_v0  ;;  %v186_v19 = vsel (!%p88_p2), %vm184_vm3, 4294967295, %v527_v18  ;;  %vm232_vm6 = vcmask (!%p88_p2), 517120   ;;  %vm233_vm7 = vsmask.f32 (!%p88_p2), 1280  ;;  %v528_v54 = vmov (!%p88_p2), 1983009808  }
   0x8   : > { %v187_v20 = vsel (!%p88_p2), %vm185_vm4, %v186_v19, 0  ;;  %vm234_vm8 = vmand (!%p88_p2), %vm232_vm6, %vm233_vm7  ;;  %v379_v55 = vunpack.c.l.s4 (!%p88_p2), %v528_v54  ;;  %v381_v56 = vlaneseq (!%p88_p2)  ;;  %vm388_vm9 = vcmask (!%p88_p2), 1041920  }
   0x9   : > { %vm389_vm10 = vmand (!%p88_p2), %vm388_vm9, %vm233_vm7 }
   0xa   : > { %v380_v57 = vunpack.c.0.s8 (!%p88_p2), %v379_v55  ;;  %v382_v58 = vshrl.u32 (!%p88_p2), %v381_v56, 7 }
   0xc   : > { %v383_v59 = vsub.s32 (!%p88_p2), %v380_v57, %v382_v58 }
   0xd   : > { %s597_s7 = smov (!%p106_p3, %s446_s7), 1 }
   0xe   : > { %s494_s8 = smul.u32 6, %s597_s7  ;;  %s452_s13 = sshll.u32 %s597_s7, 1 }
   0xf   : > { %s577_s16 = scalar_lea.vmem %s595_s1, %s452_s13 }
  0x10   : > { %s555_s11 = scalar_lea.vmem %s594_s0, %s494_s8  ;;  %v235_v30 = vld [vmem:[%s577_s16] sm:$0x3] }
  0x11   : > { %v117_v1 = vld [vmem:[%s555_s11 + $0x2] sm:$0x3]  ;;  %v116_v3 = vld [vmem:[%s555_s11] sm:$0x3]  ;;  %v118_v17 = vld [vmem:[%s555_s11 + $0x4] sm:$0x3] }
  0x12   : > { %v124_v2 = vsel %vm119_vm1, %v117_v1, 0  ;;  %v456_v10 = vld.sshfl [vmem:[%s555_s11 + $0x2] sm:$0x3 pattern:$0x76325410]  ;;  %v189_v21 = vand.u32 %v187_v20, %v118_v17 }
  0x13   : > { %471 = vmatpush3.bf16.xpose.msra.mxu0 %v124_v2  ;;  %259 = vrot.lane.b32.xlu1 %v456_v10, %s526_s12  ;;  %v455_v11 = vld.sshfl [vmem:[%s555_s11] sm:$0x3 pattern:$0x76325410] }
  0x14   : > { %488 = vmatprep.subr.bf16.mxu0 %v524_v0  ;;  %477 = vmatpush3.bf16.msra.mxu1 %v189_v21  ;;  %v458_v42 = vld.sshfl [vmem:[%s555_s11 + $0x4] sm:$0x3 pattern:$0x76325410] }
  0x15   : > { %482 = vmatprep.subr.bf16.mxu1 %v524_v0 }
  0x17   : > { %249 = vrot.lane.b32.xlu1 %v455_v11, %s526_s12 }
  0x1a   : > { %473 = vmatmul.mubr.msk.bf16.vlgmr.msra.gmra.mrb[0].mxu0 %vm119_vm1, %v116_v3 }
  0x1b   : > { %490 = vmatprep.mubr.msk.bf16.mxu0 %vm525_vm0, %v524_v0 }
  0x85   : > { %v260_v24 = vpop.permute.xlu1 %259 }
  0x86   : > { %v265_v26 = vsel %vm119_vm1, %v260_v24, 0 }
  0x89   : > { %v250_v28 = vpop.permute.xlu1 %249 }
  0xed   : > { %v160_v4 = vpop.f32.mrb[0].mxu0 }
  0xee   : > { %v166_v5 = vmul.f32 0.125, %v160_v4  ;;  %v474_v6 = vpop.f32.mrb[1].mxu0 }
  0xef   : > { %v163_v7 = vpop.f32.mrb[2].mxu0 }
  0xf0   : > { %v475_v8 = vpop.f32.mrb[3].mxu0  ;;  %v168_v9 = vsel %vm167_vm2, %v166_v5, -inf }
  0xf1   : > { %169 = vmax.xlane.f32.xlu0 %v168_v9 }
 0x17e   : > { %v170_v12 = vpop.xlane.xlu0 %169 }
 0x17f   : > { %v171_v13 = vsub.f32 %v166_v5, %v170_v12 }
 0x181   : > { %v172_v14 = vmul.f32 1.442695, %v171_v13 }
 0x183   : > { %508 = vpow2.f32 %v172_v14 }
 0x18d   : > { %v509_v15 = vpop.eup %508 }
 0x18e   : > { %v174_v16 = vsel %vm167_vm2, %v509_v15, 0.0 }
 0x18f   : > { %175 = vadd.xlane.f32.xlu0 %v174_v16 }
 0x21c   : > { %v176_v22 = vpop.xlane.xlu0 %175 }
 0x21d   : > { %510 = vrcp.f32 %v176_v22 }
 0x227   : > { %v511_v23 = vpop.eup %510 }
 0x228   : > { %v178_v25 = vmul.f32 %v511_v23, %v509_v15 }
 0x22a   : > { %v179_v27 = vpack.c.bf16 %v178_v25, %v178_v25 }
 0x22c   : > { %479 = vmatmul.mubr.msk.bf16.vlgmr.msra.gmra.mrb[0].mxu1 %vm180_vm5, %v179_v27 }
 0x22d   : > { %483 = vmatpush3.bf16.xpose.msra.mxu1 %v265_v26  ;;  %484 = vmatprep.mubr.msk.bf16.mxu1 %vm525_vm0, %v524_v0 }
 0x234   : > { %485 = vmatmul.mubr.msk.bf16.vlgmr.msra.gmra.mrb[4].mxu1 %vm119_vm1, %v250_v28 }
 0x2ff   : > { %v225_v29 = vpop.f32.mrb[0].mxu1 }
 0x300   : > { %v231_v31 = vpack.c.bf16 %v225_v29, %v225_v29  ;;  %v480_v32 = vpop.f32.mrb[1].mxu1 }
 0x301   : > { %v228_v33 = vpop.f32.mrb[2].mxu1 }
 0x302   : > { %v236_v34 = vsel %vm234_vm8, %v231_v31, %v235_v30  ;;  %v481_v35 = vpop.f32.mrb[3].mxu1 }
 0x303   : > { %237 = vst [vmem:[%s577_s16] sm:$0x3] %v236_v34 }
 0x307   : > { %v301_v36 = vpop.f32.mrb[4].mxu1 }
 0x308   : > { %v307_v37 = vmul.f32 0.125, %v301_v36  ;;  %v486_v38 = vpop.f32.mrb[5].mxu1 }
 0x309   : > { %v304_v39 = vpop.f32.mrb[6].mxu1 }
 0x30a   : > { %v487_v40 = vpop.f32.mrb[7].mxu1  ;;  %v308_v41 = vsel %vm167_vm2, %v307_v37, -inf  ;;  %v390_v2 = vld [vmem:[%s577_s16] sm:$0x3] }
 0x30b   : > { %309 = vmax.xlane.f32.xlu0 %v308_v41 }
 0x321   : > { %328 = vrot.lane.b32.xlu0 %v458_v42, %s526_s12 }
 0x398   : > { %v310_v43 = vpop.xlane.xlu0 %309 }
 0x399   : > { %v311_v44 = vsub.f32 %v307_v37, %v310_v43 }
 0x39b   : > { %v312_v45 = vmul.f32 1.442695, %v311_v44 }
 0x39c   : > { %v329_v48 = vpop.permute.xlu0 %328 }
 0x39d   : > { %512 = vpow2.f32 %v312_v45  ;;  %v334_v49 = vand.u32 %v329_v48, %v187_v20 }
 0x39f   : > { %489 = vmatpush3.bf16.msra.mxu0 %v334_v49 }
 0x3a7   : > { %v513_v46 = vpop.eup %512 }
 0x3a8   : > { %v314_v47 = vsel %vm167_vm2, %v513_v46, 0.0 }
 0x3a9   : > { %315 = vadd.xlane.f32.xlu1 %v314_v47 }
 0x436   : > { %v316_v50 = vpop.xlane.xlu1 %315 }
 0x437   : > { %514 = vrcp.f32 %v316_v50 }
 0x441   : > { %v515_v51 = vpop.eup %514 }
 0x442   : > { %v318_v52 = vmul.f32 %v515_v51, %v513_v46 }
 0x444   : > { %v319_v53 = vpack.c.bf16 %v318_v52, %v318_v52 }
 0x446   : > { %491 = vmatmul.mubr.msk.bf16.vlgmr.msra.gmra.mrb[4].mxu0 %vm180_vm5, %v319_v53 }
 0x519   : > { %v370_v60 = vpop.f32.mrb[4].mxu0 }
 0x51a   : > { %v376_v61 = vpack.c.bf16 %v370_v60, %v370_v60  ;;  %v492_v62 = vpop.f32.mrb[5].mxu0 }
 0x51b   : > { %v373_v63 = vpop.f32.mrb[6].mxu0 }
 0x51c   : > { %v384_v0 = vrot.slane %v376_v61, %v383_v59  ;;  %v493_v1 = vpop.f32.mrb[7].mxu0 }
 0x51e   : > { %385 = vrot.lane.b32.xlu0 %v384_v0, %s526_s12 }
 0x590   : > { %v386_v3 = vpop.permute.xlu0 %385 }
 0x591   : > { %v391_v4 = vsel %vm389_vm10, %v386_v3, %v390_v2 }
 0x592   : > { %392 = vst [vmem:[%s577_s16] sm:$0x3] %v391_v4 }
 0x593 PF: > { %s11_s6 = sadd.s32 1, %s522_s6  }
 0x594   : > { %p8_p4 = scmp.ge.s32.totalorder %s11_s6, 4  }
 0x596   :  { %10 = sbr.rel (!%p8_p4) target bundleno = 1 (0x1), region = 54 }

// kernel: _lambda_.40
= control target key start
LH: loop header
LB: loop body
LE: loop exit
PB: predicated region body
PF: predicated region fallthrough
CT: control target
= control target key end

     0   :  { %s637_s1 = inlined_call_operand.vmem [shape: bf16[512,128], index: 1, kind: input, shape index: {}]   ;;  %s638_s0 = inlined_call_operand.vmem [shape: bf16[6,512], index: 0, kind: input, shape index: {}]   ;;  %s639_s2 = inlined_call_operand.vmem [shape: f32[1,128], index: 2, kind: input, shape index: {}]   ;;  %s640_s3 = inlined_call_operand.vmem [shape: f32[6,128], index: 3, kind: input, shape index: {}, may-alias: {3,4}]   ;;  %s641_s4 = inlined_call_operand.vmem [shape: f32[6,128], index: 4, kind: output, shape index: {}, may-alias: {3,4}]  }
   0x1   :  { %v465_v0 = vld [vmem:[%s637_s1 + $0x40] sm:$0xff]   ;;  %v469_v4 = vld [vmem:[%s637_s1 + $0x48] sm:$0xff]   ;;  %v473_v8 = vld [vmem:[%s637_s1 + $0x50] sm:$0xff]  }
   0x2   :  { %v466_v1 = vld [vmem:[%s637_s1 + $0xc0] sm:$0xff]   ;;  %421 = vmatprep.subr.bf16.mxu0 %v465_v0  ;;  %v470_v5 = vld [vmem:[%s637_s1 + $0xc8] sm:$0xff]   ;;  %v474_v9 = vld [vmem:[%s637_s1 + $0xd0] sm:$0xff]  }
   0x3   :  { %v467_v2 = vld [vmem:[%s637_s1] sm:$0xff]   ;;  %443 = vmatprep.subr.bf16.mxu1 %v466_v1  ;;  %v471_v6 = vld [vmem:[%s637_s1 + $0x8] sm:$0xff]   ;;  %v475_v10 = vld [vmem:[%s637_s1 + $0x10] sm:$0xff]  }
   0x4   :  { %v468_v3 = vld [vmem:[%s637_s1 + $0x80] sm:$0xff]   ;;  %422 = vmatpush3.bf16.msra.mxu0 %v467_v2  ;;  %v472_v7 = vld [vmem:[%s637_s1 + $0x88] sm:$0xff]   ;;  %v476_v11 = vld [vmem:[%s637_s1 + $0x90] sm:$0xff]  }
   0x5   :  { %444 = vmatpush3.bf16.msra.mxu1 %v468_v3  ;;  %423 = vmatprep.subr.bf16.mxu0 %v469_v4  ;;  %v477_v12 = vld [vmem:[%s637_s1 + $0x58] sm:$0xff]   ;;  %v481_v16 = vld [vmem:[%s637_s1 + $0x60] sm:$0xff]   ;;  %v485_v20 = vld [vmem:[%s637_s1 + $0x68] sm:$0xff]  }
   0x6   :  { %445 = vmatprep.subr.bf16.mxu1 %v470_v5  ;;  %v478_v13 = vld [vmem:[%s637_s1 + $0xd8] sm:$0xff]   ;;  %v482_v17 = vld [vmem:[%s637_s1 + $0xe0] sm:$0xff]   ;;  %v486_v21 = vld [vmem:[%s637_s1 + $0xe8] sm:$0xff]  }
   0x7   :  { %v479_v14 = vld [vmem:[%s637_s1 + $0x18] sm:$0xff]   ;;  %v483_v18 = vld [vmem:[%s637_s1 + $0x20] sm:$0xff]   ;;  %v487_v22 = vld [vmem:[%s637_s1 + $0x28] sm:$0xff]  }
   0x8   :  { %424 = vmatpush3.bf16.msra.mxu0 %v471_v6  ;;  %v480_v15 = vld [vmem:[%s637_s1 + $0x98] sm:$0xff]   ;;  %v484_v19 = vld [vmem:[%s637_s1 + $0xa0] sm:$0xff]   ;;  %v488_v23 = vld [vmem:[%s637_s1 + $0xa8] sm:$0xff]  }
   0x9   :  { %446 = vmatpush3.bf16.msra.mxu1 %v472_v7  ;;  %425 = vmatprep.subr.bf16.mxu0 %v473_v8  ;;  %v489_v24 = vld [vmem:[%s637_s1 + $0x70] sm:$0xff]   ;;  %v493_v28 = vld [vmem:[%s637_s1 + $0x78] sm:$0xff]   ;;  %v18_v32 = vld [vmem:[%s638_s0] sm:$0x77] }
   0xa   :  { %447 = vmatprep.subr.bf16.mxu1 %v474_v9  ;;  %v490_v25 = vld [vmem:[%s637_s1 + $0xf0] sm:$0xff]   ;;  %v494_v29 = vld [vmem:[%s637_s1 + $0xf8] sm:$0xff]   ;;  %v19_v33 = vld [vmem:[%s638_s0 + $0x8] sm:$0x77]  ;;  %v385_v34 = vcombine.low %v18_v32, %v18_v32  ;;  %v386_v35 = vcombine.high %v18_v32, %v18_v32 }
   0xb   :  { %v491_v26 = vld [vmem:[%s637_s1 + $0x30] sm:$0xff]   ;;  %v495_v30 = vld [vmem:[%s637_s1 + $0x38] sm:$0xff]   ;;  %v387_v36 = vcombine.low %v19_v33, %v19_v33  ;;  %v388_v37 = vcombine.high %v19_v33, %v19_v33  ;;  %v384_v40 = vld [vmem:[%s639_s2] ss:$0 sm:$0xff] }
   0xc   :  { %426 = vmatpush3.bf16.msra.mxu0 %v475_v10  ;;  %v492_v27 = vld [vmem:[%s637_s1 + $0xb0] sm:$0xff]   ;;  %v496_v31 = vld [vmem:[%s637_s1 + $0xb8] sm:$0xff]   ;;  %329 = vmatprep.mubr.bf16.mxu0 %v386_v35  ;;  %v377_v50 = vld [vmem:[%s640_s3] sm:$0x3f] }
   0xd   :  { %448 = vmatpush3.bf16.msra.mxu1 %v476_v11  ;;  %427 = vmatprep.subr.bf16.mxu0 %v477_v12 }
   0xe   :  { %449 = vmatprep.subr.bf16.mxu1 %v478_v13  ;;  %369 = vmatprep.mubr.bf16.mxu1 %v388_v37 }
  0x10   :  { %428 = vmatpush3.bf16.msra.mxu0 %v479_v14 }
  0x11   :  { %450 = vmatpush3.bf16.msra.mxu1 %v480_v15  ;;  %429 = vmatprep.subr.bf16.mxu0 %v481_v16 }
  0x12   :  { %451 = vmatprep.subr.bf16.mxu1 %v482_v17 }
  0x14   :  { %430 = vmatpush3.bf16.msra.mxu0 %v483_v18 }
  0x15   :  { %452 = vmatpush3.bf16.msra.mxu1 %v484_v19  ;;  %431 = vmatprep.subr.bf16.mxu0 %v485_v20 }
  0x16   :  { %453 = vmatprep.subr.bf16.mxu1 %v486_v21 }
  0x18   :  { %432 = vmatpush3.bf16.msra.mxu0 %v487_v22 }
  0x19   :  { %454 = vmatpush3.bf16.msra.mxu1 %v488_v23  ;;  %433 = vmatprep.subr.bf16.mxu0 %v489_v24 }
  0x1a   :  { %455 = vmatprep.subr.bf16.mxu1 %v490_v25 }
  0x1c   :  { %434 = vmatpush3.bf16.msra.mxu0 %v491_v26 }
  0x1d   :  { %456 = vmatpush3.bf16.msra.mxu1 %v492_v27  ;;  %435 = vmatprep.subr.bf16.mxu0 %v493_v28 }
  0x1e   :  { %457 = vmatprep.subr.bf16.mxu1 %v494_v29 }
  0x20   :  { %436 = vmatpush3.bf16.msra.mxu0 %v495_v30 }
  0x21   :  { %458 = vmatpush3.bf16.msra.mxu1 %v496_v31 }
  0x23   :  { %330 = vmatmul.mubr.bf16.vlgmr.msra.gmra.mrb[0].mxu0 %v385_v34 }
  0x24   :  { %370 = vmatmul.mubr.bf16.vlgmr.msra.gmra.mrb[0].mxu1 %v387_v36 }
  0xf6   :  { %v437_v38 = vpop.f32.mrb[0].mxu0 }
  0xf7   :  { %v459_v39 = vpop.f32.mrb[0].mxu1  ;;  %v438_v41 = vpop.f32.mrb[1].mxu0 }
  0xf8   :  { %v460_v42 = vpop.f32.mrb[1].mxu1  ;;  %v439_v43 = vadd.f32 %v438_v41, %v437_v38  ;;  %v440_v45 = vpop.f32.mrb[2].mxu0 }
  0xf9   :  { %v461_v44 = vadd.f32 %v460_v42, %v459_v39  ;;  %v462_v46 = vpop.f32.mrb[2].mxu1  ;;  %v441_v47 = vpop.f32.mrb[3].mxu0 }
  0xfa   :  { %v463_v48 = vpop.f32.mrb[3].mxu1  ;;  %v332_v49 = vadd.f32 %v439_v43, %v384_v40 }
  0xfc   :  { %v372_v51 = vadd.f32 %v461_v44, %v332_v49 }
  0xfe   :  { %v378_v52 = vadd.f32 %v377_v50, %v372_v51 }
 0x100   :  { %379 = vst [vmem:[%s641_s4] sm:$0x3f] %v378_v52 }

// kernel: _lambda_.46
= control target key start
LH: loop header
LB: loop body
LE: loop exit
PB: predicated region body
PF: predicated region fallthrough
CT: control target
= control target key end

     0   :  { %vm15_vm0 = vcmask 1041408   ;;  %s87_s0 = inlined_call_operand.vmem [shape: f32[2,128], index: 0, kind: input, shape index: {}]   ;;  %s88_s1 = inlined_call_operand.vmem [shape: f32[1,128], index: 1, kind: input, shape index: {}]   ;;  %s89_s2 = inlined_call_operand.vmem [shape: f32[1,128], index: 2, kind: input, shape index: {}]   ;;  %s90_s3 = inlined_call_operand.vmem [shape: f32[2,128], index: 3, kind: output, shape index: {}]  }
   0x1   :  { %v14_v0 = vld [vmem:[%s87_s0] sm:$0x3] }
   0x2   :  { %v16_v1 = vsel %vm15_vm0, %v14_v0, 0.0  ;;  %v51_v11 = vld [vmem:[%s88_s1] ss:$0 sm:$0xff] }
   0x3   :  { %17 = vadd.xlane.f32.xlu0 %v16_v1  ;;  %v52_v13 = vld [vmem:[%s89_s2] ss:$0 sm:$0xff] }
  0x90   :  { %v18_v2 = vpop.xlane.xlu0 %17 }
  0x91   :  { %v20_v3 = vmul.f32 0.0078125, %v18_v2 }
  0x93   :  { %v21_v4 = vsub.f32 %v14_v0, %v20_v3 }
  0x95   :  { %v22_v5 = vmul.f32 %v21_v4, %v21_v4 }
  0x97   :  { %v23_v6 = vsel %vm15_vm0, %v22_v5, 0.0 }
  0x98   :  { %24 = vadd.xlane.f32.xlu0 %v23_v6 }
 0x125   :  { %v25_v7 = vpop.xlane.xlu0 %24 }
 0x126   :  { %v26_v8 = vmul.f32 0.0078125, %v25_v7 }
 0x128   :  { %v27_v9 = vadd.f32 1e-05, %v26_v8 }
 0x12a   :  { %53 = vrsqrt.f32 %v27_v9 }
 0x134   :  { %v54_v10 = vpop.eup %53 }
 0x135   :  { %v29_v12 = vmul.f32 %v54_v10, %v21_v4 }
 0x137   :  { %v37_v14 = vmul.f32 %v51_v11, %v29_v12 }
 0x139   :  { %v45_v15 = vadd.f32 %v52_v13, %v37_v14 }
 0x13b   :  { %46 = vst [vmem:[%s90_s3] sm:$0x3] %v45_v15 }

// kernel: _lambda_.39
= control target key start
LH: loop header
LB: loop body
LE: loop exit
PB: predicated region body
PF: predicated region fallthrough
CT: control target
= control target key end

     0   :  { %vm22_vm0 = vcmask 1045504   ;;  %v582_v33 = vmov 0   ;;  %v88_v50 = vlaneseq  ;;  %s762_s0 = inlined_call_operand.vmem [shape: f32[6,128], index: 0, kind: input, shape index: {}]   ;;  %s763_s3 = inlined_call_operand.vmem [shape: bf16[128,512], index: 3, kind: input, shape index: {}]   ;;  %s764_s1 = inlined_call_operand.vmem [shape: f32[1,128], index: 1, kind: input, shape index: {}]   ;;  %s765_s2 = inlined_call_operand.vmem [shape: f32[1,128], index: 2, kind: input, shape index: {}]   ;;  %s766_s4 = inlined_call_operand.vmem [shape: f32[1,512], index: 4, kind: input, shape index: {}]   ;;  %s767_s5 = inlined_call_operand.vmem [shape: bf16[6,512], index: 5, kind: output, shape index: {}]  }
   0x1   :  { %v21_v0 = vld [vmem:[%s762_s0] sm:$0x3f]  ;;  %v518_v3 = vld [vmem:[%s763_s3 + $0xc] ss:$16 sps:$4 sm:$0xff]   ;;  %v521_v5 = vld [vmem:[%s763_s3 + $0x8] ss:$16 sps:$4 sm:$0xff]   ;;  %300 = vmatprep.mubr.bf16.mxu0 %v582_v33  ;;  %341 = vmatprep.mubr.bf16.mxu1 %v582_v33 }
   0x2   :  { %v23_v1 = vsel %vm22_vm0, %v21_v0, 0.0  ;;  %v516_v2 = vld [vmem:[%s763_s3 + $0x4] ss:$16 sps:$4 sm:$0xff]   ;;  %v520_v4 = vld [vmem:[%s763_s3] ss:$16 sps:$4 sm:$0xff]   ;;  %309 = vmatprep.subr.bf16.mxu1 %v518_v3  ;;  %v89_v51 = vshrl.u32 %v88_v50, 7 }
   0x3   :  { %24 = vadd.xlane.f32.xlu0 %v23_v1  ;;  %268 = vmatprep.subr.bf16.mxu0 %v516_v2  ;;  %v522_v6 = vld [vmem:[%s763_s3 + $0x24] ss:$16 sps:$4 sm:$0xff]   ;;  %v524_v7 = vld [vmem:[%s763_s3 + $0x2c] ss:$16 sps:$4 sm:$0xff]   ;;  %v526_v8 = vld [vmem:[%s763_s3 + $0x20] ss:$16 sps:$4 sm:$0xff]  }
   0x4   :  { %269 = vmatpush1.bf16.msra.mxu0 %v520_v4  ;;  %310 = vmatpush1.bf16.msra.mxu1 %v521_v5  ;;  %v527_v9 = vld [vmem:[%s763_s3 + $0x28] ss:$16 sps:$4 sm:$0xff]   ;;  %v528_v10 = vld [vmem:[%s763_s3 + $0x44] ss:$16 sps:$4 sm:$0xff]   ;;  %v530_v11 = vld [vmem:[%s763_s3 + $0x4c] ss:$16 sps:$4 sm:$0xff]  }
   0x5   :  { %270 = vmatprep.subr.bf16.mxu0 %v522_v6  ;;  %311 = vmatprep.subr.bf16.mxu1 %v524_v7  ;;  %v532_v17 = vld [vmem:[%s763_s3 + $0x40] ss:$16 sps:$4 sm:$0xff]   ;;  %v533_v18 = vld [vmem:[%s763_s3 + $0x48] ss:$16 sps:$4 sm:$0xff]   ;;  %v534_v19 = vld [vmem:[%s763_s3 + $0x64] ss:$16 sps:$4 sm:$0xff]  }
   0x6   :  { %v536_v20 = vld [vmem:[%s763_s3 + $0x6c] ss:$16 sps:$4 sm:$0xff]   ;;  %v538_v21 = vld [vmem:[%s763_s3 + $0x60] ss:$16 sps:$4 sm:$0xff]   ;;  %v539_v22 = vld [vmem:[%s763_s3 + $0x68] ss:$16 sps:$4 sm:$0xff]  }
   0x7   :  { %v540_v23 = vld [vmem:[%s763_s3 + $0x84] ss:$16 sps:$4 sm:$0xff]   ;;  %v542_v24 = vld [vmem:[%s763_s3 + $0x8c] ss:$16 sps:$4 sm:$0xff]   ;;  %v544_v25 = vld [vmem:[%s763_s3 + $0x80] ss:$16 sps:$4 sm:$0xff]  }
   0x8   :  { %271 = vmatpush1.bf16.msra.mxu0 %v526_v8  ;;  %312 = vmatpush1.bf16.msra.mxu1 %v527_v9  ;;  %v545_v26 = vld [vmem:[%s763_s3 + $0x88] ss:$16 sps:$4 sm:$0xff]   ;;  %v546_v27 = vld [vmem:[%s763_s3 + $0xa4] ss:$16 sps:$4 sm:$0xff]   ;;  %v548_v28 = vld [vmem:[%s763_s3 + $0xac] ss:$16 sps:$4 sm:$0xff]  }
   0x9   :  { %272 = vmatprep.subr.bf16.mxu0 %v528_v10  ;;  %313 = vmatprep.subr.bf16.mxu1 %v530_v11  ;;  %v550_v29 = vld [vmem:[%s763_s3 + $0xa0] ss:$16 sps:$4 sm:$0xff]   ;;  %v551_v30 = vld [vmem:[%s763_s3 + $0xa8] ss:$16 sps:$4 sm:$0xff]   ;;  %v552_v31 = vld [vmem:[%s763_s3 + $0xc4] ss:$16 sps:$4 sm:$0xff]  }
   0xa   :  { %v554_v32 = vld [vmem:[%s763_s3 + $0xcc] ss:$16 sps:$4 sm:$0xff]   ;;  %v556_v34 = vld [vmem:[%s763_s3 + $0xc0] ss:$16 sps:$4 sm:$0xff]   ;;  %v557_v35 = vld [vmem:[%s763_s3 + $0xc8] ss:$16 sps:$4 sm:$0xff]  }
   0xb   :  { %v558_v36 = vld [vmem:[%s763_s3 + $0xe4] ss:$16 sps:$4 sm:$0xff]   ;;  %v560_v37 = vld [vmem:[%s763_s3 + $0xec] ss:$16 sps:$4 sm:$0xff]   ;;  %v562_v38 = vld [vmem:[%s763_s3 + $0xe0] ss:$16 sps:$4 sm:$0xff]  }
   0xc   :  { %273 = vmatpush1.bf16.msra.mxu0 %v532_v17  ;;  %314 = vmatpush1.bf16.msra.mxu1 %v533_v18  ;;  %v563_v39 = vld [vmem:[%s763_s3 + $0xe8] ss:$16 sps:$4 sm:$0xff]   ;;  %v476_v44 = vld [vmem:[%s764_s1] ss:$0 sm:$0xff]  ;;  %v90_v52 = vsub.s32 0, %v89_v51  ;;  %v98_v53 = vsub.s32 2, %v89_v51 }
   0xd   :  { %274 = vmatprep.subr.bf16.mxu0 %v534_v19  ;;  %315 = vmatprep.subr.bf16.mxu1 %v536_v20  ;;  %v477_v46 = vld [vmem:[%s765_s2] ss:$0 sm:$0xff]  ;;  %v94_v55 = vsub.s32 1, %v89_v51  ;;  %v102_v56 = vsub.s32 3, %v89_v51 }
   0xe   :  { %v86_v54 = vld [vmem:[%s766_s4] sm:$0xf] }
   0xf   :  { %v91_v57 = vrot.slane %v86_v54, %v90_v52  ;;  %v99_v58 = vrot.slane %v86_v54, %v98_v53  ;;  %v95_v59 = vrot.slane %v86_v54, %v94_v55  ;;  %v103_v60 = vrot.slane %v86_v54, %v102_v56 }
  0x10   :  { %275 = vmatpush1.bf16.msra.mxu0 %v538_v21  ;;  %316 = vmatpush1.bf16.msra.mxu1 %v539_v22 }
  0x11   :  { %276 = vmatprep.subr.bf16.mxu0 %v540_v23  ;;  %317 = vmatprep.subr.bf16.mxu1 %v542_v24 }
  0x14   :  { %277 = vmatpush1.bf16.msra.mxu0 %v544_v25  ;;  %318 = vmatpush1.bf16.msra.mxu1 %v545_v26 }
  0x15   :  { %278 = vmatprep.subr.bf16.mxu0 %v546_v27  ;;  %319 = vmatprep.subr.bf16.mxu1 %v548_v28 }
  0x18   :  { %279 = vmatpush1.bf16.msra.mxu0 %v550_v29  ;;  %320 = vmatpush1.bf16.msra.mxu1 %v551_v30 }
  0x19   :  { %280 = vmatprep.subr.bf16.mxu0 %v552_v31  ;;  %321 = vmatprep.subr.bf16.mxu1 %v554_v32 }
  0x1c   :  { %281 = vmatpush1.bf16.msra.mxu0 %v556_v34  ;;  %322 = vmatpush1.bf16.msra.mxu1 %v557_v35 }
  0x1d   :  { %282 = vmatprep.subr.bf16.mxu0 %v558_v36  ;;  %323 = vmatprep.subr.bf16.mxu1 %v560_v37 }
  0x20   :  { %283 = vmatpush1.bf16.msra.mxu0 %v562_v38  ;;  %324 = vmatpush1.bf16.msra.mxu1 %v563_v39 }
  0x90   :  { %v25_v12 = vpop.xlane.xlu0 %24 }
  0x91   :  { %v27_v13 = vmul.f32 0.0078125, %v25_v12 }
  0x93   :  { %v28_v14 = vsub.f32 %v21_v0, %v27_v13 }
  0x95   :  { %v29_v15 = vmul.f32 %v28_v14, %v28_v14 }
  0x97   :  { %v30_v16 = vsel %vm22_vm0, %v29_v15, 0.0 }
  0x98   :  { %31 = vadd.xlane.f32.xlu0 %v30_v16 }
 0x125   :  { %v32_v40 = vpop.xlane.xlu0 %31 }
 0x126   :  { %v33_v41 = vmul.f32 0.0078125, %v32_v40 }
 0x128   :  { %v34_v42 = vadd.f32 1e-05, %v33_v41 }
 0x12a   :  { %564 = vrsqrt.f32 %v34_v42 }
 0x134   :  { %v565_v43 = vpop.eup %564 }
 0x135   :  { %v36_v45 = vmul.f32 %v565_v43, %v28_v14 }
 0x137   :  { %v44_v47 = vmul.f32 %v476_v44, %v36_v45 }
 0x139   :  { %v52_v48 = vadd.f32 %v477_v46, %v44_v47 }
 0x13b   :  { %v53_v49 = vpack.c.bf16 %v52_v48, %v52_v48 }
 0x13d   :  { %301 = vmatmul.mubr.bf16.vlgmr.msra.gmra.mrb[0].mxu0 %v53_v49  ;;  %342 = vmatmul.mubr.bf16.vlgmr.msra.gmra.mrb[0].mxu1 %v53_v49 }
 0x210   :  { %v302_v61 = vpop.f32.mrb[0].mxu0  ;;  %v343_v62 = vpop.f32.mrb[0].mxu1 }
 0x211   :  { %v724_v63 = vadd.f32 %v302_v61, %v91_v57  ;;  %v726_v0 = vadd.f32 %v343_v62, %v99_v58  ;;  %v304_v1 = vpop.f32.mrb[1].mxu0  ;;  %v345_v2 = vpop.f32.mrb[1].mxu1 }
 0x212   :  { %v728_v3 = vadd.f32 %v304_v1, %v95_v59  ;;  %v730_v4 = vadd.f32 %v345_v2, %v103_v60  ;;  %v306_v5 = vpop.f32.mrb[2].mxu0  ;;  %v347_v6 = vpop.f32.mrb[2].mxu1 }
 0x213   :  { %v733_v7 = vmul.f32 0.70710677, %v724_v63  ;;  %v736_v8 = vmul.f32 0.70710677, %v726_v0  ;;  %v307_v14 = vpop.f32.mrb[3].mxu0  ;;  %v348_v18 = vpop.f32.mrb[3].mxu1 }
 0x214   :  { %v739_v9 = vmul.f32 0.70710677, %v728_v3  ;;  %v745_v13 = vmul.f32 0.70710677, %v730_v4 }
 0x215   :  { %v366_v10 = vand.u32 2147483647, %v733_v7  ;;  %v368_v11 = vand.u32 2147483647, %v736_v8  ;;  %vm358_vm1 = vcmp.ge.f32.partialorder %v733_v7, 0.0  ;;  %vm360_vm2 = vcmp.ge.f32.partialorder %v736_v8, 0.0 }
 0x216   :  { %v367_v12 = vand.u32 2147483647, %v739_v9  ;;  %v369_v21 = vand.u32 2147483647, %v745_v13  ;;  %vm359_vm3 = vcmp.ge.f32.partialorder %v739_v9, 0.0  ;;  %vm361_vm4 = vcmp.ge.f32.partialorder %v745_v13, 0.0 }
 0x217   :  { %v370_v15 = vmul.f32 0.3275911, %v366_v10  ;;  %v372_v16 = vmul.f32 0.3275911, %v368_v11  ;;  %v418_v25 = vsub.f32 0.0, %v366_v10  ;;  %v420_v26 = vsub.f32 0.0, %v368_v11 }
 0x218   :  { %v371_v17 = vmul.f32 0.3275911, %v367_v12  ;;  %v373_v23 = vmul.f32 0.3275911, %v369_v21  ;;  %v419_v29 = vsub.f32 0.0, %v367_v12  ;;  %v421_v34 = vsub.f32 0.0, %v369_v21 }
 0x219   :  { %v374_v19 = vadd.f32 1.0, %v370_v15  ;;  %v376_v20 = vadd.f32 1.0, %v372_v16  ;;  %v422_v28 = vmul.f32 %v418_v25, %v366_v10  ;;  %v424_v32 = vmul.f32 %v420_v26, %v368_v11 }
 0x21a   :  { %v375_v22 = vadd.f32 1.0, %v371_v17  ;;  %v377_v24 = vadd.f32 1.0, %v373_v23  ;;  %v423_v39 = vmul.f32 %v419_v29, %v367_v12  ;;  %v425_v45 = vmul.f32 %v421_v34, %v369_v21 }
 0x21b   :  { %566 = vrcp.f32 %v374_v19  ;;  %v426_v37 = vmul.f32 1.442695, %v422_v28  ;;  %v430_v41 = vmul.f32 1.442695, %v424_v32  ;;  %v583_v26 = vmov -1.0  }
 0x21c   :  { %568 = vrcp.f32 %v376_v20  ;;  %v428_v50 = vmul.f32 1.442695, %v423_v39  ;;  %v432_v55 = vmul.f32 1.442695, %v425_v45  ;;  %v362_v28 = vsel %vm358_vm1, 1.0, %v583_v26 }
 0x21d   :  { %570 = vrcp.f32 %v375_v22  ;;  %v351_v9 = vmul.f32 0.5, %v728_v3 }
 0x21e   :  { %572 = vrcp.f32 %v377_v24 }
 0x21f   :  { %574 = vpow2.f32 %v426_v37  ;;  %v363_v37 = vsel %vm359_vm3, 1.0, %v583_v26 }
 0x220   :  { %576 = vpow2.f32 %v430_v41  ;;  %v352_v41 = vmul.f32 0.5, %v726_v0 }
 0x221   :  { %578 = vpow2.f32 %v428_v50 }
 0x222   :  { %580 = vpow2.f32 %v432_v55 }
 0x225   :  { %v567_v27 = vpop.eup %566 }
 0x226   :  { %v569_v30 = vpop.eup %568  ;;  %v382_v31 = vmul.f32 1.0614054, %v567_v27 }
 0x227   :  { %v384_v33 = vmul.f32 1.0614054, %v569_v30  ;;  %v571_v36 = vpop.eup %570 }
 0x228   :  { %v386_v35 = vadd.f32 -1.4531521, %v382_v31  ;;  %v383_v42 = vmul.f32 1.0614054, %v571_v36  ;;  %v573_v43 = vpop.eup %572 }
 0x229   :  { %v388_v38 = vadd.f32 -1.4531521, %v384_v33  ;;  %v385_v48 = vmul.f32 1.0614054, %v573_v43  ;;  %v575_v15 = vpop.eup %574 }
 0x22a   :  { %v390_v40 = vmul.f32 %v567_v27, %v386_v35  ;;  %v387_v47 = vadd.f32 -1.4531521, %v383_v42  ;;  %v577_v17 = vpop.eup %576  ;;  %v365_v42 = vsel %vm361_vm4, 1.0, %v583_v26 }
 0x22b   :  { %v392_v44 = vmul.f32 %v569_v30, %v388_v38  ;;  %v389_v53 = vadd.f32 -1.4531521, %v385_v48  ;;  %v579_v25 = vpop.eup %578  ;;  %v353_v48 = vmul.f32 0.5, %v730_v4 }
 0x22c   :  { %v394_v46 = vadd.f32 1.4214138, %v390_v40  ;;  %v391_v52 = vmul.f32 %v571_v36, %v387_v47  ;;  %v581_v32 = vpop.eup %580 }
 0x22d   :  { %v396_v49 = vadd.f32 1.4214138, %v392_v44  ;;  %v393_v58 = vmul.f32 %v573_v43, %v389_v53 }
 0x22e   :  { %v398_v51 = vmul.f32 %v567_v27, %v394_v46  ;;  %v395_v57 = vadd.f32 1.4214138, %v391_v52 }
 0x22f   :  { %v400_v54 = vmul.f32 %v569_v30, %v396_v49  ;;  %v397_v62 = vadd.f32 1.4214138, %v393_v58 }
 0x230   :  { %v402_v56 = vadd.f32 -0.28449672, %v398_v51  ;;  %v399_v61 = vmul.f32 %v571_v36, %v395_v57 }
 0x231   :  { %v404_v59 = vadd.f32 -0.28449672, %v400_v54  ;;  %v401_v6 = vmul.f32 %v573_v43, %v397_v62 }
 0x232   :  { %v406_v60 = vmul.f32 %v567_v27, %v402_v56  ;;  %v403_v5 = vadd.f32 -0.28449672, %v399_v61 }
 0x233   :  { %v408_v1 = vmul.f32 %v569_v30, %v404_v59  ;;  %v405_v14 = vadd.f32 -0.28449672, %v401_v6 }
 0x234   :  { %v410_v2 = vadd.f32 0.2548296, %v406_v60  ;;  %v407_v12 = vmul.f32 %v571_v36, %v403_v5 }
 0x235   :  { %v412_v10 = vadd.f32 0.2548296, %v408_v1  ;;  %v409_v20 = vmul.f32 %v573_v43, %v405_v14 }
 0x236   :  { %v414_v11 = vmul.f32 %v567_v27, %v410_v2  ;;  %v411_v19 = vadd.f32 0.2548296, %v407_v12  ;;  %v364_v27 = vsel %vm360_vm2, 1.0, %v583_v26 }
 0x237   :  { %v416_v16 = vmul.f32 %v569_v30, %v412_v10  ;;  %v413_v24 = vadd.f32 0.2548296, %v409_v20 }
 0x238   :  { %v434_v18 = vmul.f32 %v575_v15, %v414_v11  ;;  %v415_v23 = vmul.f32 %v571_v36, %v411_v19  ;;  %v350_v36 = vmul.f32 0.5, %v724_v63 }
 0x239   :  { %v436_v21 = vmul.f32 %v577_v17, %v416_v16  ;;  %v417_v30 = vmul.f32 %v573_v43, %v413_v24 }
 0x23a   :  { %v438_v22 = vsub.f32 1.0, %v434_v18  ;;  %v435_v7 = vmul.f32 %v579_v25, %v415_v23 }
 0x23b   :  { %v440_v29 = vsub.f32 1.0, %v436_v21  ;;  %v437_v35 = vmul.f32 %v581_v32, %v417_v30 }
 0x23c   :  { %v442_v31 = vmul.f32 %v438_v22, %v362_v28  ;;  %v439_v8 = vsub.f32 1.0, %v435_v7 }
 0x23d   :  { %v444_v33 = vmul.f32 %v440_v29, %v364_v27  ;;  %v441_v40 = vsub.f32 1.0, %v437_v35 }
 0x23e   :  { %v446_v34 = vadd.f32 1.0, %v442_v31  ;;  %v443_v39 = vmul.f32 %v439_v8, %v363_v37 }
 0x23f   :  { %v448_v38 = vadd.f32 1.0, %v444_v33  ;;  %v445_v45 = vmul.f32 %v441_v40, %v365_v42 }
 0x240   :  { %v450_v44 = vmul.f32 %v446_v34, %v350_v36  ;;  %v447_v43 = vadd.f32 1.0, %v443_v39 }
 0x241   :  { %v452_v46 = vmul.f32 %v448_v38, %v352_v41  ;;  %v449_v13 = vadd.f32 1.0, %v445_v45 }
 0x242   :  { %v451_v47 = vmul.f32 %v447_v43, %v351_v9 }
 0x243   :  { %v453_v50 = vmul.f32 %v449_v13, %v353_v48 }
 0x244   :  { %v512_v49 = vpack.c.bf16 %v451_v47, %v450_v44 }
 0x245   :  { %v513_v63 = vpack.c.bf16 %v453_v50, %v452_v46 }
 0x246   :  { %470 = vst [vmem:[%s767_s5] sm:$0x77] %v512_v49 }
 0x247   :  { %471 = vst [vmem:[%s767_s5 + $0x8] sm:$0x77] %v513_v63 }

// kernel: _lambda_.47
= control target key start
LH: loop header
LB: loop body
LE: loop exit
PB: predicated region body
PF: predicated region fallthrough
CT: control target
= control target key end

     0   :  { %vm23_vm0 = vcmask 1041408   ;;  %s342_s0 = inlined_call_operand.vmem [shape: f32[2,128], index: 0, kind: input, shape index: {}]   ;;  %s343_s1 = inlined_call_operand.vmem [shape: f32[1,128], index: 1, kind: input, shape index: {}]   ;;  %s344_s2 = inlined_call_operand.vmem [shape: f32[1,128], index: 2, kind: input, shape index: {}]   ;;  %s345_s3 = inlined_call_operand.vmem [shape: bf16[128,10], index: 3, kind: input, shape index: {}]   ;;  %s346_s4 = inlined_call_operand.vmem [shape: f32[1,10], index: 4, kind: input, shape index: {}]   ;;  %s347_s5 = inlined_call_operand.hbm [shape: f32[2,10], index: 5, kind: output, shape index: {}]  }
   0x1   :  { %v22_v0 = vld [vmem:[%s342_s0] sm:$0x3] }
   0x2   :  { %v24_v1 = vsel %vm23_vm0, %v22_v0, 0.0 }
   0x3   :  { %25 = vadd.xlane.f32.xlu0 %v24_v1 }
   0x4   :  { %10 = vsyncpa [#allocation3], 0  ;;  %v225_v2 = vld [vmem:[%s345_s3] sm:$0xff]   ;;  %v259_v3 = vmov 0.0   ;;  %v226_v4 = vld [vmem:[%s345_s3 + $0x8] sm:$0xff]   ;;  %vm260_vm1 = vmmov 0  }
   0x5   :  { %202 = vmatprep.subr.bf16.mxu0 %v259_v3  ;;  %v227_v10 = vld [vmem:[%s345_s3 + $0x10] sm:$0xff]   ;;  %v228_v11 = vld [vmem:[%s345_s3 + $0x18] sm:$0xff]   ;;  %v229_v12 = vld [vmem:[%s345_s3 + $0x20] sm:$0xff]   ;;  %218 = vmatprep.mubr.msk.bf16.mxu0 %vm260_vm1, %v259_v3  ;;  %s261_s15 = smov [#allocation2]   ;;  %vm166_vm2 = vcmask 74752  }
   0x6   :  { %203 = vmatpush3.bf16.msra.mxu0 %v225_v2  ;;  %v230_v13 = vld [vmem:[%s345_s3 + $0x28] sm:$0xff]   ;;  %v231_v14 = vld [vmem:[%s345_s3 + $0x30] sm:$0xff]   ;;  %v232_v15 = vld [vmem:[%s345_s3 + $0x38] sm:$0xff]   ;;  %s174_s16 = sshll.u32 %s261_s15, 4  ;;  %s175_s16 = int_to_ptr.vmem [resolvable:$true] %s174_s16 }
   0x7   :  { %204 = vmatprep.subr.bf16.mxu0 %v259_v3  ;;  %v182_v20 = vld [vmem:[%s343_s1] ss:$0 sm:$0xff]  ;;  %s235_s1 = scalar_lea.vmem %s175_s16, 32  ;;  %p240_p1 = scmp.lt.s32.totalorder %s175_s16, %s175_s16 }
   0x8   :  { %v183_v22 = vld [vmem:[%s344_s2] ss:$0 sm:$0xff]  ;;  %p236_p0 = scmp.ne.s32.totalorder %s175_s16, %s235_s1  ;;  %p241_p2 = scmp.lt.s32.totalorder %s235_s1, %s235_s1 }
   0x9   :  { %v184_v26 = vld [vmem:[%s346_s4] ss:$0 sm:$0xff] }
   0xa   :  { %205 = vmatpush3.bf16.msra.mxu0 %v226_v4  ;;  %p242_p3 = por %p241_p2, %p240_p1 }
   0xb   :  { %206 = vmatprep.subr.bf16.mxu0 %v259_v3 }
   0xc   :  { %p243_p4 = pnand %p242_p3, %p236_p0 }
   0xe   :  { %207 = vmatpush3.bf16.msra.mxu0 %v227_v10 }
   0xf   :  { %208 = vmatprep.subr.bf16.mxu0 %v259_v3 }
  0x12   :  { %209 = vmatpush3.bf16.msra.mxu0 %v228_v11 }
  0x13   :  { %210 = vmatprep.subr.bf16.mxu0 %v259_v3 }
  0x16   :  { %211 = vmatpush3.bf16.msra.mxu0 %v229_v12 }
  0x17   :  { %212 = vmatprep.subr.bf16.mxu0 %v259_v3 }
  0x1a   :  { %213 = vmatpush3.bf16.msra.mxu0 %v230_v13 }
  0x1b   :  { %214 = vmatprep.subr.bf16.mxu0 %v259_v3 }
  0x1e   :  { %215 = vmatpush3.bf16.msra.mxu0 %v231_v14 }
  0x1f   :  { %216 = vmatprep.subr.bf16.mxu0 %v259_v3 }
  0x22   :  { %217 = vmatpush3.bf16.msra.mxu0 %v232_v15 }
  0x90   :  { %v26_v5 = vpop.xlane.xlu0 %25 }
  0x91   :  { %v28_v6 = vmul.f32 0.0078125, %v26_v5 }
  0x93   :  { %v29_v7 = vsub.f32 %v22_v0, %v28_v6 }
  0x95   :  { %v30_v8 = vmul.f32 %v29_v7, %v29_v7 }
  0x97   :  { %v31_v9 = vsel %vm23_vm0, %v30_v8, 0.0 }
  0x98   :  { %32 = vadd.xlane.f32.xlu0 %v31_v9 }
 0x125   :  { %v33_v16 = vpop.xlane.xlu0 %32 }
 0x126   :  { %v34_v17 = vmul.f32 0.0078125, %v33_v16 }
 0x128   :  { %v35_v18 = vadd.f32 1e-05, %v34_v17 }
 0x12a   :  { %233 = vrsqrt.f32 %v35_v18 }
 0x134   :  { %v234_v19 = vpop.eup %233 }
 0x135   :  { %v37_v21 = vmul.f32 %v234_v19, %v29_v7 }
 0x137   :  { %v45_v23 = vmul.f32 %v182_v20, %v37_v21 }
 0x139   :  { %v53_v24 = vadd.f32 %v183_v22, %v45_v23 }
 0x13b   :  { %v54_v25 = vpack.c.bf16 %v53_v24, %v53_v24 }
 0x13d   :  { %219 = vmatmul.mubr.bf16.vlgmr.msra.gmra.mrb[0].mxu0 %v54_v25 }
 0x210   :  { %v160_v27 = vpop.f32.mrb[0].mxu0 }
 0x211   :  { %v161_v28 = vadd.f32 %v184_v26, %v160_v27  ;;  %v220_v29 = vpop.f32.mrb[1].mxu0 }
 0x212   :  { %v163_v30 = vpop.f32.mrb[2].mxu0 }
 0x213   :  { %v221_v31 = vpop.f32.mrb[3].mxu0  ;;  %167 = vst.msk [vmem:[#allocation2] sm:$0x3] %vm166_vm2, %v161_v28 }
 0x214   :  { %246 = shalt.err (!%p243_p4)
}
 0x215   :  { %s247_s4 = scalar_lea.hbm %s347_s5, 32 }
 0x216   :  { %p248_p5 = scmp.ne.s32.totalorder %s347_s5, %s247_s4  ;;  %p251_p6 = scmp.lt.u32.totalorder %s247_s4, %s347_s5 }
 0x218   :  { %p253_p7 = pnand %p251_p6, %p248_p5 }
 0x21a   :  { %256 = shalt.err (!%p253_p7)
}
 0x21b   :  { %177 = dma.vmem_to_hbm [thread:$0]  %s175_s16, 32, %s347_s5, [#allocation3]  }
 0x21c   :  { %257 = dma.done.wait [#allocation3], 32  }
 0x21d   :  { %258 = vsyncadd [#allocation3], 4294967264 }
 0x21e   :  { %181 = vsyncpa [#allocation3], 1 }

</bundles_post_ra>
